<compile_context>
chip_gen: v7x
topology: tpu7x:2x2x1
jax: 0.10.0
libtpu: 0.0.40
codegen_flags: <defaults>
</compile_context>

<pallas_src>
import jax
import jax.numpy as jnp
import numpy as np
from jax.experimental import pallas as pl
from jax.experimental.pallas import tpu as pltpu


# ---------------- Pallas kernels ----------------

def _make_conv_stats_kernel(KH, KW, OH, OW, stride, C, OC):
    """Implicit-im2col conv (one image per grid step) + per-image BN partial stats."""
    T = KH * KW
    OHW = OH * OW

    def kernel(x_ref, w_ref, y_ref, mean_ref, m2_ref):
        # x_ref:   (1, Hp, Wp, C)  bf16  one padded NHWC image (auto double-buffered)
        # w_ref:   (T, C, OC)      bf16  per-tap weight slices, VMEM resident
        # y_ref:   (1, OC, OHW)    bf16  conv output, channel-major / lane-dense
        # mean_ref, m2_ref: (1, 1, OC) f32 per-image BN partials (mean, sum of sq. deviations)
        acc = jnp.zeros((OHW, OC), jnp.float32)
        for t in range(T):                       # static unroll over taps = implicit im2col
            kh, kw = divmod(t, KW)
            if stride == 1:
                xt = x_ref[0, kh:kh + OH, kw:kw + OW, :]                       # (OH, OW, C)
            else:
                # TODO(synk): strided-window path (stride>1) uses strided VMEM ref loads.
                xt = x_ref[0, pl.ds(kh, OH, stride), pl.ds(kw, OW, stride), :]
            # Leading-dim collapse only (lane dim untouched); free when OW % 8 == 0.
            acc = acc + jnp.dot(xt.reshape(OHW, C), w_ref[t],
                                preferred_element_type=jnp.float32)
        # Round once to the storage dtype, then derive stats from the *stored* values so the
        # normalization statistics match the values they are applied to in kernel 2.
        y32 = acc.astype(jnp.bfloat16).astype(jnp.float32)                     # (OHW, OC)
        mu = jnp.mean(y32, axis=0, keepdims=True)                              # (1, OC)
        mean_ref[0] = mu
        m2_ref[0] = jnp.sum((y32 - mu) ** 2, axis=0, keepdims=True)            # (1, OC)
        # Store transposed (OC, OHW): lane-dense and already NCHW-ordered (XLU transpose,
        # cheap for OC <= 128).
        y_ref[0] = jnp.transpose(y32).astype(jnp.bfloat16)

    return kernel


def _bn_apply_kernel(y_ref, scale_ref, shift_ref, o_ref):
    # y_ref: (1, OC, OHW) bf16; scale/shift: (OC, 1) f32; o_ref: (1, OC, OHW) f32.
    # Pure FMA on lane-dense blocks; scale/shift already fold mean, var, eps, gamma, beta.
    o_ref[0] = y_ref[0].astype(jnp.float32) * scale_ref[...] + shift_ref[...]


# ---------------- Wrapper ----------------

def conv_norm_2d(x_nchw, weight, gamma, beta, *, stride=1, padding=0, eps=1e-5,
                 vmem_limit_bytes=48 * 1024 * 1024):
    """Conv2d(bias=False) + BatchNorm2d (training-mode batch statistics).

    x_nchw: (N, C, H, W) f32; weight: (OC, C, KH, KW) f32; gamma/beta: (OC,) f32.
    returns: (N, OC, OH, OW) f32.
    """
    N, C, H, W = x_nchw.shape
    OC, _, KH, KW = weight.shape
    OH = (H + 2 * padding - KH) // stride + 1
    OW = (W + 2 * padding - KW) // stride + 1
    OHW = OH * OW
    T = KH * KW
    Hp, Wp = H + 2 * padding, W + 2 * padding

    # --- glue: NCHW -> padded NHWC bf16 (single pass over the small input tensor) ---
    # TODO(synk): fold this input transpose/pad into kernel 1 (NCHW blocks + in-kernel
    #   relayout, masked edge loads) to save one XLA pass over the input.
    x_nhwc = jnp.transpose(x_nchw, (0, 2, 3, 1)).astype(jnp.bfloat16)
    xp = jnp.pad(x_nhwc, ((0, 0), (padding, padding), (padding, padding), (0, 0)))
    # weight (OC, C, KH, KW) -> (KH, KW, C, OC) -> (T, C, OC): per-tap (C, OC) slices.
    w_taps = jnp.transpose(weight, (2, 3, 1, 0)).reshape(T, C, OC).astype(jnp.bfloat16)

    conv_kernel = _make_conv_stats_kernel(KH, KW, OH, OW, stride, C, OC)

    # --- kernel 1: implicit-im2col conv + per-image BN partial stats ---
    # One grid step per image, "parallel" so the batch shards across v7x's 2 TensorCores.
    # TODO(synk): add an output-row tile axis once (Hp*Wp*C + OC*OH*OW) per image no longer
    #   fits comfortably in VMEM (very large feature maps).
    conv_t, part_mean, part_m2 = pl.pallas_call(
        conv_kernel,
        out_shape=(
            jax.ShapeDtypeStruct((N, OC, OHW), jnp.bfloat16),
            jax.ShapeDtypeStruct((N, 1, OC), jnp.float32),
            jax.ShapeDtypeStruct((N, 1, OC), jnp.float32),
        ),
        grid_spec=pltpu.PrefetchScalarGridSpec(
            num_scalar_prefetch=0,
            grid=(N,),
            in_specs=[
                pl.BlockSpec((1, Hp, Wp, C), lambda n: (n, 0, 0, 0)),
                pl.BlockSpec((T, C, OC), lambda n: (0, 0, 0)),
            ],
            out_specs=(
                pl.BlockSpec((1, OC, OHW), lambda n: (n, 0, 0)),
                pl.BlockSpec((1, 1, OC), lambda n: (n, 0, 0)),
                pl.BlockSpec((1, 1, OC), lambda n: (n, 0, 0)),
            ),
        ),
        compiler_params=pltpu.CompilerParams(
            dimension_semantics=("parallel",),
            vmem_limit_bytes=vmem_limit_bytes),
    )(xp, w_taps)

    # --- Chan-style merge of per-image (mean, M2) partials -> batch stats (plain JAX, tiny) ---
    mean_b = part_mean[:, 0, :]                                    # (N, OC)
    m2_b = part_m2[:, 0, :]                                        # (N, OC)
    mean = jnp.mean(mean_b, axis=0)                                # (OC,)
    m2 = jnp.sum(m2_b, axis=0) + OHW * jnp.sum((mean_b - mean) ** 2, axis=0)
    var = m2 / (N * OHW)                                           # biased var (BN training)
    scale = gamma.astype(jnp.float32) * jax.lax.rsqrt(var + eps)   # (OC,)
    shift = beta.astype(jnp.float32) - mean * scale                # (OC,)

    # --- kernel 2: lane-dense BN apply; writes the final NCHW-ordered output directly ---
    out_flat = pl.pallas_call(
        _bn_apply_kernel,
        out_shape=jax.ShapeDtypeStruct((N, OC, OHW), jnp.float32),
        grid_spec=pltpu.PrefetchScalarGridSpec(
            num_scalar_prefetch=0,
            grid=(N,),
            in_specs=[
                pl.BlockSpec((1, OC, OHW), lambda n: (n, 0, 0)),
                pl.BlockSpec((OC, 1), lambda n: (0, 0)),
                pl.BlockSpec((OC, 1), lambda n: (0, 0)),
            ],
            out_specs=pl.BlockSpec((1, OC, OHW), lambda n: (n, 0, 0)),
        ),
        compiler_params=pltpu.CompilerParams(
            dimension_semantics=("parallel",),
            vmem_limit_bytes=vmem_limit_bytes),
    )(conv_t, scale.reshape(OC, 1), shift.reshape(OC, 1))

    # Contiguous (free) reshape only — no transpose back to NCHW needed.
    return out_flat.reshape(N, OC, OH, OW)


# ---------------- Reference (plain JAX, f32) for verification ----------------

def conv_norm_2d_ref(x_nchw, weight, gamma, beta, *, stride=1, padding=0, eps=1e-5):
    y = jax.lax.conv_general_dilated(
        x_nchw, weight,
        window_strides=(stride, stride),
        padding=[(padding, padding), (padding, padding)],
        dimension_numbers=("NCHW", "OIHW", "NCHW"),
    )
    mean = jnp.mean(y, axis=(0, 2, 3), keepdims=True)
    var = jnp.mean((y - mean) ** 2, axis=(0, 2, 3), keepdims=True)
    g = gamma.reshape(1, -1, 1, 1)
    b = beta.reshape(1, -1, 1, 1)
    return (y - mean) * jax.lax.rsqrt(var + eps) * g + b


if __name__ == "__main__":
    # ConvNorm2d(in_channels=4, out_channels=8, kernel_size=3, stride=1, padding=1)
    N, C, H, W = 2, 4, 16, 16
    OC, KH, KW = 8, 3, 3
    stride, padding = 1, 1

    key = jax.random.PRNGKey(0)
    kx, kw = jax.random.split(key)
    x = jax.random.normal(kx, (N, C, H, W), dtype=jnp.float32)
    # nn.init.normal_(conv.weight, 0.0, 0.02)
    conv_w = 0.02 * jax.random.normal(kw, (OC, C, KH, KW), dtype=jnp.float32)
    # norm.weight = 1, norm.bias = 0
    gamma = jnp.ones((OC,), dtype=jnp.float32)
    beta = jnp.zeros((OC,), dtype=jnp.float32)

    out = conv_norm_2d(x, conv_w, gamma, beta, stride=stride, padding=padding)
    out = jax.block_until_ready(out)

    ref = conv_norm_2d_ref(x, conv_w, gamma, beta, stride=stride, padding=padding)
    # bf16 inputs/weights/intermediate (f32 MXU accumulation) vs the pure-f32 reference.
    np.testing.assert_allclose(np.asarray(out), np.asarray(ref), rtol=3e-2, atol=3e-2)

    print("KERNEL_OK")
</pallas_src>

<mosaic_0001>
module attributes {stable_mosaic.version = 11 : i64} {
  func.func @kernel(%arg0: i32, %arg1: memref<1x18x18x4xbf16, #tpu.memory_space<vmem>>, %arg2: memref<9x4x8xbf16, #tpu.memory_space<vmem>>, %arg3: memref<1x8x256xbf16, #tpu.memory_space<vmem>>, %arg4: memref<1x1x8xf32, #tpu.memory_space<vmem>>, %arg5: memref<1x1x8xf32, #tpu.memory_space<vmem>>) attributes {dimension_semantics = [#tpu.dimension_semantics<parallel>], iteration_bounds = array<i64: 2>, scalar_prefetch = 0 : i64, scratch_operands = 0 : i64, tpu.core_type = #tpu.core_type<tc>, window_params = [{transform_indices = @transform_0, window_bounds = array<i64: 1, 18, 18, 4>}, {pipeline_mode = #tpu.pipeline_mode<synchronous>, transform_indices = @transform_1, window_bounds = array<i64: 9, 4, 8>}, {transform_indices = @transform_2, window_bounds = array<i64: 1, 8, 256>}, {transform_indices = @transform_3, window_bounds = array<i64: 1, 1, 8>}, {transform_indices = @transform_4, window_bounds = array<i64: 1, 1, 8>}]} {
    %cst = arith.constant 0.000000e+00 : f32
    %0 = vector.broadcast %cst : f32 to vector<256x8xf32>
    %c0 = arith.constant 0 : index
    %c0_0 = arith.constant 0 : index
    %c0_1 = arith.constant 0 : index
    %c0_2 = arith.constant 0 : index
    %1 = vector.load %arg1[%c0, %c0_0, %c0_1, %c0_2] : memref<1x18x18x4xbf16, #tpu.memory_space<vmem>>, vector<1x16x16x4xbf16>
    %2 = vector.shape_cast %1 : vector<1x16x16x4xbf16> to vector<16x16x4xbf16>
    %3 = vector.shape_cast %2 : vector<16x16x4xbf16> to vector<256x4xbf16>
    %c0_3 = arith.constant 0 : index
    %c0_4 = arith.constant 0 : index
    %c0_5 = arith.constant 0 : index
    %4 = vector.load %arg2[%c0_3, %c0_4, %c0_5] : memref<9x4x8xbf16, #tpu.memory_space<vmem>>, vector<1x4x8xbf16>
    %5 = vector.shape_cast %4 : vector<1x4x8xbf16> to vector<4x8xbf16>
    %cst_6 = arith.constant dense<0.000000e+00> : vector<256x8xf32>
    %6 = tpu.matmul %3, %5, %cst_6 {dimension_numbers = #tpu.dot_dimension_numbers<[1], [0], [0], [1], [0, 0, 1, 1], [], []>} : vector<256x4xbf16>, vector<4x8xbf16>, vector<256x8xf32> -> vector<256x8xf32>
    %7 = arith.addf %0, %6 : vector<256x8xf32>
    %c0_7 = arith.constant 0 : index
    %c0_8 = arith.constant 0 : index
    %c1 = arith.constant 1 : index
    %c0_9 = arith.constant 0 : index
    %8 = vector.load %arg1[%c0_7, %c0_8, %c1, %c0_9] : memref<1x18x18x4xbf16, #tpu.memory_space<vmem>>, vector<1x16x16x4xbf16>
    %9 = vector.shape_cast %8 : vector<1x16x16x4xbf16> to vector<16x16x4xbf16>
    %10 = vector.shape_cast %9 : vector<16x16x4xbf16> to vector<256x4xbf16>
    %c1_10 = arith.constant 1 : index
    %c0_11 = arith.constant 0 : index
    %c0_12 = arith.constant 0 : index
    %11 = vector.load %arg2[%c1_10, %c0_11, %c0_12] : memref<9x4x8xbf16, #tpu.memory_space<vmem>>, vector<1x4x8xbf16>
    %12 = vector.shape_cast %11 : vector<1x4x8xbf16> to vector<4x8xbf16>
    %cst_13 = arith.constant dense<0.000000e+00> : vector<256x8xf32>
    %13 = tpu.matmul %10, %12, %cst_13 {dimension_numbers = #tpu.dot_dimension_numbers<[1], [0], [0], [1], [0, 0, 1, 1], [], []>} : vector<256x4xbf16>, vector<4x8xbf16>, vector<256x8xf32> -> vector<256x8xf32>
    %14 = arith.addf %7, %13 : vector<256x8xf32>
    %c0_14 = arith.constant 0 : index
    %c0_15 = arith.constant 0 : index
    %c2 = arith.constant 2 : index
    %c0_16 = arith.constant 0 : index
    %15 = vector.load %arg1[%c0_14, %c0_15, %c2, %c0_16] : memref<1x18x18x4xbf16, #tpu.memory_space<vmem>>, vector<1x16x16x4xbf16>
    %16 = vector.shape_cast %15 : vector<1x16x16x4xbf16> to vector<16x16x4xbf16>
    %17 = vector.shape_cast %16 : vector<16x16x4xbf16> to vector<256x4xbf16>
    %c2_17 = arith.constant 2 : index
    %c0_18 = arith.constant 0 : index
    %c0_19 = arith.constant 0 : index
    %18 = vector.load %arg2[%c2_17, %c0_18, %c0_19] : memref<9x4x8xbf16, #tpu.memory_space<vmem>>, vector<1x4x8xbf16>
    %19 = vector.shape_cast %18 : vector<1x4x8xbf16> to vector<4x8xbf16>
    %cst_20 = arith.constant dense<0.000000e+00> : vector<256x8xf32>
    %20 = tpu.matmul %17, %19, %cst_20 {dimension_numbers = #tpu.dot_dimension_numbers<[1], [0], [0], [1], [0, 0, 1, 1], [], []>} : vector<256x4xbf16>, vector<4x8xbf16>, vector<256x8xf32> -> vector<256x8xf32>
    %21 = arith.addf %14, %20 : vector<256x8xf32>
    %c0_21 = arith.constant 0 : index
    %c1_22 = arith.constant 1 : index
    %c0_23 = arith.constant 0 : index
    %c0_24 = arith.constant 0 : index
    %22 = vector.load %arg1[%c0_21, %c1_22, %c0_23, %c0_24] : memref<1x18x18x4xbf16, #tpu.memory_space<vmem>>, vector<1x16x16x4xbf16>
    %23 = vector.shape_cast %22 : vector<1x16x16x4xbf16> to vector<16x16x4xbf16>
    %24 = vector.shape_cast %23 : vector<16x16x4xbf16> to vector<256x4xbf16>
    %c3 = arith.constant 3 : index
    %c0_25 = arith.constant 0 : index
    %c0_26 = arith.constant 0 : index
    %25 = vector.load %arg2[%c3, %c0_25, %c0_26] : memref<9x4x8xbf16, #tpu.memory_space<vmem>>, vector<1x4x8xbf16>
    %26 = vector.shape_cast %25 : vector<1x4x8xbf16> to vector<4x8xbf16>
    %cst_27 = arith.constant dense<0.000000e+00> : vector<256x8xf32>
    %27 = tpu.matmul %24, %26, %cst_27 {dimension_numbers = #tpu.dot_dimension_numbers<[1], [0], [0], [1], [0, 0, 1, 1], [], []>} : vector<256x4xbf16>, vector<4x8xbf16>, vector<256x8xf32> -> vector<256x8xf32>
    %28 = arith.addf %21, %27 : vector<256x8xf32>
    %c0_28 = arith.constant 0 : index
    %c1_29 = arith.constant 1 : index
    %c1_30 = arith.constant 1 : index
    %c0_31 = arith.constant 0 : index
    %29 = vector.load %arg1[%c0_28, %c1_29, %c1_30, %c0_31] : memref<1x18x18x4xbf16, #tpu.memory_space<vmem>>, vector<1x16x16x4xbf16>
    %30 = vector.shape_cast %29 : vector<1x16x16x4xbf16> to vector<16x16x4xbf16>
    %31 = vector.shape_cast %30 : vector<16x16x4xbf16> to vector<256x4xbf16>
    %c4 = arith.constant 4 : index
    %c0_32 = arith.constant 0 : index
    %c0_33 = arith.constant 0 : index
    %32 = vector.load %arg2[%c4, %c0_32, %c0_33] : memref<9x4x8xbf16, #tpu.memory_space<vmem>>, vector<1x4x8xbf16>
    %33 = vector.shape_cast %32 : vector<1x4x8xbf16> to vector<4x8xbf16>
    %cst_34 = arith.constant dense<0.000000e+00> : vector<256x8xf32>
    %34 = tpu.matmul %31, %33, %cst_34 {dimension_numbers = #tpu.dot_dimension_numbers<[1], [0], [0], [1], [0, 0, 1, 1], [], []>} : vector<256x4xbf16>, vector<4x8xbf16>, vector<256x8xf32> -> vector<256x8xf32>
    %35 = arith.addf %28, %34 : vector<256x8xf32>
    %c0_35 = arith.constant 0 : index
    %c1_36 = arith.constant 1 : index
    %c2_37 = arith.constant 2 : index
    %c0_38 = arith.constant 0 : index
    %36 = vector.load %arg1[%c0_35, %c1_36, %c2_37, %c0_38] : memref<1x18x18x4xbf16, #tpu.memory_space<vmem>>, vector<1x16x16x4xbf16>
    %37 = vector.shape_cast %36 : vector<1x16x16x4xbf16> to vector<16x16x4xbf16>
    %38 = vector.shape_cast %37 : vector<16x16x4xbf16> to vector<256x4xbf16>
    %c5 = arith.constant 5 : index
    %c0_39 = arith.constant 0 : index
    %c0_40 = arith.constant 0 : index
    %39 = vector.load %arg2[%c5, %c0_39, %c0_40] : memref<9x4x8xbf16, #tpu.memory_space<vmem>>, vector<1x4x8xbf16>
    %40 = vector.shape_cast %39 : vector<1x4x8xbf16> to vector<4x8xbf16>
    %cst_41 = arith.constant dense<0.000000e+00> : vector<256x8xf32>
    %41 = tpu.matmul %38, %40, %cst_41 {dimension_numbers = #tpu.dot_dimension_numbers<[1], [0], [0], [1], [0, 0, 1, 1], [], []>} : vector<256x4xbf16>, vector<4x8xbf16>, vector<256x8xf32> -> vector<256x8xf32>
    %42 = arith.addf %35, %41 : vector<256x8xf32>
    %c0_42 = arith.constant 0 : index
    %c2_43 = arith.constant 2 : index
    %c0_44 = arith.constant 0 : index
    %c0_45 = arith.constant 0 : index
    %43 = vector.load %arg1[%c0_42, %c2_43, %c0_44, %c0_45] : memref<1x18x18x4xbf16, #tpu.memory_space<vmem>>, vector<1x16x16x4xbf16>
    %44 = vector.shape_cast %43 : vector<1x16x16x4xbf16> to vector<16x16x4xbf16>
    %45 = vector.shape_cast %44 : vector<16x16x4xbf16> to vector<256x4xbf16>
    %c6 = arith.constant 6 : index
    %c0_46 = arith.constant 0 : index
    %c0_47 = arith.constant 0 : index
    %46 = vector.load %arg2[%c6, %c0_46, %c0_47] : memref<9x4x8xbf16, #tpu.memory_space<vmem>>, vector<1x4x8xbf16>
    %47 = vector.shape_cast %46 : vector<1x4x8xbf16> to vector<4x8xbf16>
    %cst_48 = arith.constant dense<0.000000e+00> : vector<256x8xf32>
    %48 = tpu.matmul %45, %47, %cst_48 {dimension_numbers = #tpu.dot_dimension_numbers<[1], [0], [0], [1], [0, 0, 1, 1], [], []>} : vector<256x4xbf16>, vector<4x8xbf16>, vector<256x8xf32> -> vector<256x8xf32>
    %49 = arith.addf %42, %48 : vector<256x8xf32>
    %c0_49 = arith.constant 0 : index
    %c2_50 = arith.constant 2 : index
    %c1_51 = arith.constant 1 : index
    %c0_52 = arith.constant 0 : index
    %50 = vector.load %arg1[%c0_49, %c2_50, %c1_51, %c0_52] : memref<1x18x18x4xbf16, #tpu.memory_space<vmem>>, vector<1x16x16x4xbf16>
    %51 = vector.shape_cast %50 : vector<1x16x16x4xbf16> to vector<16x16x4xbf16>
    %52 = vector.shape_cast %51 : vector<16x16x4xbf16> to vector<256x4xbf16>
    %c7 = arith.constant 7 : index
    %c0_53 = arith.constant 0 : index
    %c0_54 = arith.constant 0 : index
    %53 = vector.load %arg2[%c7, %c0_53, %c0_54] : memref<9x4x8xbf16, #tpu.memory_space<vmem>>, vector<1x4x8xbf16>
    %54 = vector.shape_cast %53 : vector<1x4x8xbf16> to vector<4x8xbf16>
    %cst_55 = arith.constant dense<0.000000e+00> : vector<256x8xf32>
    %55 = tpu.matmul %52, %54, %cst_55 {dimension_numbers = #tpu.dot_dimension_numbers<[1], [0], [0], [1], [0, 0, 1, 1], [], []>} : vector<256x4xbf16>, vector<4x8xbf16>, vector<256x8xf32> -> vector<256x8xf32>
    %56 = arith.addf %49, %55 : vector<256x8xf32>
    %c0_56 = arith.constant 0 : index
    %c2_57 = arith.constant 2 : index
    %c2_58 = arith.constant 2 : index
    %c0_59 = arith.constant 0 : index
    %57 = vector.load %arg1[%c0_56, %c2_57, %c2_58, %c0_59] : memref<1x18x18x4xbf16, #tpu.memory_space<vmem>>, vector<1x16x16x4xbf16>
    %58 = vector.shape_cast %57 : vector<1x16x16x4xbf16> to vector<16x16x4xbf16>
    %59 = vector.shape_cast %58 : vector<16x16x4xbf16> to vector<256x4xbf16>
    %c8 = arith.constant 8 : index
    %c0_60 = arith.constant 0 : index
    %c0_61 = arith.constant 0 : index
    %60 = vector.load %arg2[%c8, %c0_60, %c0_61] : memref<9x4x8xbf16, #tpu.memory_space<vmem>>, vector<1x4x8xbf16>
    %61 = vector.shape_cast %60 : vector<1x4x8xbf16> to vector<4x8xbf16>
    %cst_62 = arith.constant dense<0.000000e+00> : vector<256x8xf32>
    %62 = tpu.matmul %59, %61, %cst_62 {dimension_numbers = #tpu.dot_dimension_numbers<[1], [0], [0], [1], [0, 0, 1, 1], [], []>} : vector<256x4xbf16>, vector<4x8xbf16>, vector<256x8xf32> -> vector<256x8xf32>
    %63 = arith.addf %56, %62 : vector<256x8xf32>
    %64 = arith.truncf %63 : vector<256x8xf32> to vector<256x8xbf16>
    %65 = arith.extf %64 : vector<256x8xbf16> to vector<256x8xf32>
    %cst_63 = arith.constant dense<0.000000e+00> : vector<8xf32>
    %66 = vector.multi_reduction <add>, %65, %cst_63 [0] : vector<256x8xf32> to vector<8xf32>
    %67 = vector.shape_cast %66 : vector<8xf32> to vector<1x8xf32>
    %cst_64 = arith.constant 2.560000e+02 : f32
    %68 = vector.broadcast %cst_64 : f32 to vector<1x8xf32>
    %69 = arith.divf %67, %68 : vector<1x8xf32>
    %c0_65 = arith.constant 0 : index
    %c0_66 = arith.constant 0 : index
    %c0_67 = arith.constant 0 : index
    %70 = vector.load %arg4[%c0_65, %c0_66, %c0_67] : memref<1x1x8xf32, #tpu.memory_space<vmem>>, vector<1x1x8xf32>
    %71 = vector.shape_cast %70 : vector<1x1x8xf32> to vector<1x8xf32>
    %72 = vector.shape_cast %69 : vector<1x8xf32> to vector<1x1x8xf32>
    tpu.vector_store %arg4[%c0_65, %c0_66, %c0_67], %72 {strides = array<i32>} : memref<1x1x8xf32, #tpu.memory_space<vmem>>, vector<1x1x8xf32>,
    %73 = vector.broadcast %69 : vector<1x8xf32> to vector<256x8xf32>
    %74 = arith.subf %65, %73 : vector<256x8xf32>
    %75 = arith.mulf %74, %74 : vector<256x8xf32>
    %cst_68 = arith.constant dense<0.000000e+00> : vector<8xf32>
    %76 = vector.multi_reduction <add>, %75, %cst_68 [0] : vector<256x8xf32> to vector<8xf32>
    %77 = vector.shape_cast %76 : vector<8xf32> to vector<1x8xf32>
    %c0_69 = arith.constant 0 : index
    %c0_70 = arith.constant 0 : index
    %c0_71 = arith.constant 0 : index
    %78 = vector.load %arg5[%c0_69, %c0_70, %c0_71] : memref<1x1x8xf32, #tpu.memory_space<vmem>>, vector<1x1x8xf32>
    %79 = vector.shape_cast %78 : vector<1x1x8xf32> to vector<1x8xf32>
    %80 = vector.shape_cast %77 : vector<1x8xf32> to vector<1x1x8xf32>
    tpu.vector_store %arg5[%c0_69, %c0_70, %c0_71], %80 {strides = array<i32>} : memref<1x1x8xf32, #tpu.memory_space<vmem>>, vector<1x1x8xf32>,
    %81 = tpu.transpose %65, [1, 0] : vector<256x8xf32> -> vector<8x256xf32>
    %82 = arith.truncf %81 : vector<8x256xf32> to vector<8x256xbf16>
    %c0_72 = arith.constant 0 : index
    %c0_73 = arith.constant 0 : index
    %c0_74 = arith.constant 0 : index
    %83 = vector.load %arg3[%c0_72, %c0_73, %c0_74] : memref<1x8x256xbf16, #tpu.memory_space<vmem>>, vector<1x8x256xbf16>
    %84 = vector.shape_cast %83 : vector<1x8x256xbf16> to vector<8x256xbf16>
    %85 = vector.shape_cast %82 : vector<8x256xbf16> to vector<1x8x256xbf16>
    tpu.vector_store %arg3[%c0_72, %c0_73, %c0_74], %85 {strides = array<i32>} : memref<1x8x256xbf16, #tpu.memory_space<vmem>>, vector<1x8x256xbf16>,
    return
  }
  func.func @transform_0(%arg0: i32) -> (i32, i32, i32, i32) {
    %c0_i32 = arith.constant 0 : i32
    %c0_i32_0 = arith.constant 0 : i32
    %c0_i32_1 = arith.constant 0 : i32
    %c0_i32_2 = arith.constant 0 : i32
    return %arg0, %c0_i32, %c0_i32_0, %c0_i32_1 : i32, i32, i32, i32
  }
  func.func @transform_1(%arg0: i32) -> (i32, i32, i32) {
    %c0_i32 = arith.constant 0 : i32
    %c0_i32_0 = arith.constant 0 : i32
    %c0_i32_1 = arith.constant 0 : i32
    %c0_i32_2 = arith.constant 0 : i32
    return %c0_i32, %c0_i32_0, %c0_i32_1 : i32, i32, i32
  }
  func.func @transform_2(%arg0: i32) -> (i32, i32, i32) {
    %c0_i32 = arith.constant 0 : i32
    %c0_i32_0 = arith.constant 0 : i32
    %c0_i32_1 = arith.constant 0 : i32
    return %arg0, %c0_i32, %c0_i32_0 : i32, i32, i32
  }
  func.func @transform_3(%arg0: i32) -> (i32, i32, i32) {
    %c0_i32 = arith.constant 0 : i32
    %c0_i32_0 = arith.constant 0 : i32
    %c0_i32_1 = arith.constant 0 : i32
    return %arg0, %c0_i32, %c0_i32_0 : i32, i32, i32
  }
  func.func @transform_4(%arg0: i32) -> (i32, i32, i32) {
    %c0_i32 = arith.constant 0 : i32
    %c0_i32_0 = arith.constant 0 : i32
    %c0_i32_1 = arith.constant 0 : i32
    return %arg0, %c0_i32, %c0_i32_0 : i32, i32, i32
  }
}

</mosaic_0001>

<bundles_post_ra>
// kernel: tpu_custom_call.1
= control target key start
LH: loop header
LB: loop body
LE: loop exit
PB: predicated region body
PF: predicated region fallthrough
CT: control target
= control target key end

     0   :  { %10 = vsyncpa [#allocation3], 0  ;;  %s9124_s0 = inlined_call_operand.vmem [shape: bf16[2,18,18,4], index: 0, kind: input, shape index: {}]   ;;  %s9125_s1 = inlined_call_operand.vmem [shape: bf16[9,4,8], index: 1, kind: input, shape index: {}]   ;;  %s9126_s2 = inlined_call_operand.hbm [shape: bf16[2,8,256], index: 2, kind: output, shape index: {0}]   ;;  %s9127_s3 = inlined_call_operand.hbm [shape: f32[2,1,8], index: 3, kind: output, shape index: {1}]   ;;  %s9128_s4 = inlined_call_operand.hbm [shape: f32[2,1,8], index: 4, kind: output, shape index: {2}]  }
   0x1   :  { %12 = vsyncpa [#allocation3 + $0x1], 0 }
   0x2   :  { %13 = vsyncpa [#allocation5], 0 }
   0x3   :  { %15 = vsyncpa [#allocation5 + $0x1], 0  ;;  %s6885_s15 = smov 0   ;;  %s6887_s16 = smov 0  }
   0x4   :  { %s6889_s17 = smov 0   ;;  %s6891_s18 = smov 0  }
   0x5 LB: > { %s6906_s19 = sadd.s32 4294967295, %s6855_s18   ;;  %s5262_s20 = sadd.s32 4294967294, %s6855_s18   ;;  %s6855_s18 = sphi %s6891_s18, %s9201_s18   ;;  %s6851_s17 = sphi %s6889_s17, %s9200_s17   ;;  %s6847_s16 = sphi %s6887_s16, %s9199_s16   ;;  %s6843_s15 = sphi %s6885_s15, %s9198_s15  }
   0x6   : > { %s6910_s21 = sadd.s32 1, %s6855_s18   ;;  %s75_s22 = sadd.s32 1, %s6851_s17 }
   0x7   : > { %s72_s23 = ssub.s32 %s6855_s18, %s6910_s21  ;;  %p85_p0 = scmp.ne.s32.totalorder %s6851_s17, %s6847_s16 }
   0x8   : > { %p73_p1 = scmp.eq.s32.totalorder %s72_s23, 0  ;;  %p86_p2 = scmp.eq.s32.totalorder %s6906_s19, 1 }
   0x9   : > { %p91_p3 = scmp.ne.s32.totalorder %s6847_s16, %s6843_s15  ;;  %p92_p4 = scmp.eq.s32.totalorder %s5262_s20, 1 }
   0xa   : > { %s6923_s24 = scalar_select %p73_p1, %s6851_s17, %s75_s22  }
   0xb   : > { %p6925_p5 = por %p86_p2, %p85_p0  ;;  %p6929_p6 = por %p92_p4, %p91_p3 }
   0xc   : > { %p5265_p7 = scmp.ge.s32.totalorder %s6855_s18, 1  ;;  %p173_p8 = scmp.lt.s32.totalorder %s6855_s18, 3 }
   0xe   : > { %p174_p9 = pnand %p5265_p7, %p173_p8 }
  0x10   : > { %177 = sbr.rel (%p174_p9) target bundleno = 754 (0x2f2), region = 28 }
  0x17   : > { %v5268_v0 = vld [vmem:[%s9125_s1 + $0x2] sm:$0x3]  ;;  %vm748_vm0 = vcmask 1041408   ;;  %v5495_v1 = vld [vmem:[%s9125_s1 + $0x8] sm:$0x3]  ;;  %p207_p10 = scmp.lt.s32.totalorder %s6906_s19, 1 }
  0x18   : > { %6531 = vmatprep.subr.msk.bf16.mxu1 %vm748_vm0, %v5268_v0  ;;  %6535 = vmatprep.subr.msk.bf16.mxu0 %vm748_vm0, %v5495_v1  ;;  %v750_v2 = vsel %vm748_vm0, %v5268_v0, 0  ;;  %v6946_v3 = vsel %vm748_vm0, %v5495_v1, 0  ;;  %v245_v4 = vld [vmem:[%s9125_s1] sm:$0x3]  ;;  %v5560_v5 = vld [vmem:[%s9125_s1 + $0xa] sm:$0x3] }
  0x19   : > { %9144 = vst [vmem:[#allocation9_spill] sm:$0xff] %v6946_v3  ;;  %5968 = vmatpush3.bf16.msra.mxu1 %v750_v2  ;;  %6104 = vmatpush3.bf16.msra.mxu0 %v6946_v3  ;;  %s208_s5 = scalar_select %p207_p10, %s6906_s19, 1  ;;  %vm262_vm1 = vsmask.f32 3328  ;;  %vm263_vm2 = vsmask.f32 7440 }
  0x1a   : > { %6532 = vmatprep.subr.msk.bf16.mxu1 %vm748_vm0, %v245_v4  ;;  %6537 = vmatprep.subr.msk.bf16.mxu0 %vm748_vm0, %v5560_v5  ;;  %vm699_vm3 = vcmask 31744   ;;  %v6974_v17 = vsel %vm748_vm0, %v245_v4, 0  ;;  %v6980_v26 = vld [vmem:[%s9125_s1 + $0xc] sm:$0x3]  ;;  %vm6987_vm4 = vmor %vm262_vm1, %vm263_vm2  ;;  %v6993_v37 = vsel %vm748_vm0, %v5560_v5, 0  ;;  %vm1253_vm5 = vcmask 1042432  }
  0x1b   : > { %s6541_s10 = smul.u32 216, %s208_s5  ;;  %v6997_v41 = vsel %vm748_vm0, %v6980_v26, 0  ;;  %vm1254_vm6 = vcmask 1046532   ;;  %vm4820_vm8 = vcmask 64512   ;;  %s8803_s12 = sand.u32 1, %s6847_s16   ;;  %vm4892_vm9 = vcmask 57344  }
  0x1c   : > { %vm7213_vm7 = vmor %vm1253_vm5, %vm1254_vm6  ;;  %s5808_s14 = sshll.u32 %s6906_s19, 4  ;;  %s200_s22 = scalar_lea.vmem [#allocation4], %s8803_s12 }
  0x1d   : > { %s6961_s13 = scalar_lea.vmem %s9124_s0, %s6541_s10  ;;  %s5137_s23 = sshll.u32 %s200_s22, 4  ;;  %s8821_s23 = int_to_ptr.vmem [resolvable:$true] %s5137_s23 }
  0x1e   : > { %v213_v6 = vld [vmem:[%s6961_s13] sm:$0xf]  ;;  %v214_v7 = vld [vmem:[%s6961_s13 + $0x4] sm:$0xf]  ;;  %v246_v8 = vld [vmem:[%s6961_s13 + $0x8] sm:$0x1]  ;;  %s8819_s29 = scalar_lea.hbm %s9127_s3, %s5808_s14 }
  0x1f   : > { %v266_v9 = vshrl.u32 %v213_v6, 16  ;;  %v269_v10 = vshll.u32 %v213_v6, 16  ;;  %v275_v11 = vshll.u32 %v214_v7, 16  ;;  %v279_v12 = vshrl.u32 %v214_v7, 16  ;;  %v5447_v13 = vld [vmem:[%s6961_s13 + $0xc] sm:$0xf] }
  0x20   : > { %v285_v14 = vshll.u32 %v246_v8, 16  ;;  %v6968_v15 = vld [vmem:[%s6961_s13 + $0x10] sm:$0xf]  ;;  %v6971_v16 = vld [vmem:[%s6961_s13 + $0x14] sm:$0x1]  ;;  %v2070_v23 = vshrl.u32 %v5447_v13, 16 }
  0x21   : > { %v268_v18 = vrot.slane %v266_v9, 4  ;;  %v271_v19 = vrot.slane %v269_v10, 5  ;;  %v277_v20 = vrot.slane %v275_v11, 5  ;;  %v281_v21 = vrot.slane %v279_v12, 4  ;;  %v215_v31 = vld [vmem:[%s6961_s13 + $0xc] sm:$0xf] }
  0x22   : > { %v287_v22 = vrot.slane %v285_v14, 5  ;;  %v2073_v24 = vshll.u32 %v5447_v13, 16  ;;  %v2079_v25 = vshll.u32 %v6968_v15, 16  ;;  %v2083_v29 = vshrl.u32 %v6968_v15, 16  ;;  %v216_v36 = vld [vmem:[%s6961_s13 + $0x10] sm:$0xf] }
  0x23   : > { %v272_v27 = vor.u32 %v271_v19, %v268_v18  ;;  %v282_v28 = vor.u32 %v281_v21, %v277_v20  ;;  %v2089_v30 = vshll.u32 %v6971_v16, 16  ;;  %v2072_v33 = vrot.slane %v2070_v23, 4  ;;  %v247_v44 = vld [vmem:[%s6961_s13 + $0x14] sm:$0x1]  ;;  %v5450_v55 = vld [vmem:[%s6961_s13 + $0x18] sm:$0xf] }
  0x24   : > { %v2075_v34 = vrot.slane %v2073_v24, 5  ;;  %v2081_v35 = vrot.slane %v2079_v25, 5  ;;  %v2085_v40 = vrot.slane %v2083_v29, 4  ;;  %v290_v45 = vshrl.u32 %v215_v31, 16  ;;  %v7006_v60 = vld [vmem:[%s6961_s13 + $0x1c] sm:$0xf] }
  0x25   : > { %v273_v38 = vrot.slane %v272_v27, 4  ;;  %v283_v39 = vrot.slane %v282_v28, 4  ;;  %v2091_v43 = vrot.slane %v2089_v30, 5  ;;  %v293_v46 = vshll.u32 %v215_v31, 16  ;;  %v7014_v1 = vld [vmem:[%s6961_s13 + $0x20] sm:$0x1] }
  0x26   : > { %v2076_v42 = vor.u32 %v2075_v34, %v2072_v33  ;;  %v2086_v49 = vor.u32 %v2085_v40, %v2081_v35  ;;  %v299_v50 = vshll.u32 %v216_v36, 16  ;;  %v292_v53 = vrot.slane %v290_v45, 4  ;;  %v217_v18 = vld [vmem:[%s6961_s13 + $0x18] sm:$0xf]  ;;  %v218_v23 = vld [vmem:[%s6961_s13 + $0x1c] sm:$0xf] }
  0x27   : > { %v278_v47 = vsel %vm6987_vm4, %v273_v38, %v277_v20  ;;  %v288_v48 = vsel %vm6987_vm4, %v283_v39, %v287_v22  ;;  %v295_v54 = vrot.slane %v293_v46, 5  ;;  %v303_v58 = vshrl.u32 %v216_v36, 16  ;;  %v248_v31 = vld [vmem:[%s6961_s13 + $0x20] sm:$0x1]  ;;  %v5453_v40 = vld [vmem:[%s6961_s13 + $0x24] sm:$0xf] }
  0x28   : > { %v5269_v51 = vcombine.low %v278_v47, %v288_v48  ;;  %v2077_v52 = vrot.slane %v2076_v42, 4  ;;  %v2087_v56 = vrot.slane %v2086_v49, 4  ;;  %v301_v57 = vrot.slane %v299_v50, 5  ;;  %v7037_v46 = vld [vmem:[%s6961_s13 + $0x28] sm:$0xf]  ;;  %s6733_s5 = scalar_lea.vmem %s8821_s23, 16 }
  0x29   : > { %v309_v59 = vshll.u32 %v247_v44, 16  ;;  %v2813_v62 = vrot.slane %v6968_v15, 5  ;;  %v2816_v63 = vrot.slane %v6971_v16, 5  ;;  %v296_v0 = vor.u32 %v295_v54, %v292_v53  ;;  %v7046_v54 = vld [vmem:[%s6961_s13 + $0x2c] sm:$0x1]  ;;  %p6734_p11 = scmp.ne.s32.totalorder %s8821_s23, %s6733_s5  ;;  %s6857_s6 = smov [#allocation4]  }
  0x2a   : > { %5969 = vmatprep.mubr.msk.bf16.mxu1 %vm699_vm3, %v5269_v51  ;;  %v2082_v61 = vsel %vm6987_vm4, %v2077_v52, %v2081_v35  ;;  %v2092_v2 = vsel %vm6987_vm4, %v2087_v56, %v2091_v43  ;;  %v305_v4 = vrot.slane %v303_v58, 4  ;;  %v2094_v6 = vshrl.u32 %v5450_v55, 16  ;;  %v5349_v51 = vld [vmem:[%s9125_s1 + $0x4] sm:$0x3]  ;;  %v7246_v16 = vld [vmem:[%s6961_s13 + $0x7c] sm:$0xf] }
  0x2b   : > { %v311_v5 = vrot.slane %v309_v59, 5  ;;  %v5496_v7 = vcombine.low %v2082_v61, %v2092_v2  ;;  %v297_v8 = vrot.slane %v296_v0, 4  ;;  %v2097_v9 = vshll.u32 %v5450_v55, 16  ;;  %v219_v0 = vld [vmem:[%s6961_s13 + $0x24] sm:$0xf]  ;;  %p6735_p12 = pnand %p6734_p11, %p6925_p5  ;;  %s6737_s7 = sshll.u32 %s6857_s6, 4  ;;  %s6738_s7 = int_to_ptr.vmem [resolvable:$false] %s6737_s7 }
  0x2c   : > { %v2103_v10 = vshll.u32 %v7006_v60, 16  ;;  %v306_v11 = vor.u32 %v305_v4, %v301_v57  ;;  %v2096_v12 = vrot.slane %v2094_v6, 4  ;;  %v2107_v13 = vshrl.u32 %v7006_v60, 16  ;;  %s6739_s8 = scalar_lea.vmem %s6738_s7, 32  ;;  %p6740_p0 = scmp.lt.s32.totalorder %s8821_s23, %s6738_s7 }
  0x2d   : > { %v2113_v14 = vshll.u32 %v7014_v1, 16  ;;  %6105 = vmatprep.mubr.msk.bf16.mxu0 %vm699_vm3, %v5496_v7  ;;  %v302_v19 = vsel %vm6987_vm4, %v297_v8, %v301_v57  ;;  %v2099_v20 = vrot.slane %v2097_v9, 5  ;;  %v2820_v22 = vrot.slane %v7006_v60, 5  ;;  %v220_v7 = vld [vmem:[%s6961_s13 + $0x28] sm:$0xf]  ;;  %p6736_p13 = pneg %p6735_p12  ;;  %p6741_p1 = scmp.lt.s32.totalorder %s6739_s8, %s6733_s5 }
  0x2e   : > { %v2105_v21 = vrot.slane %v2103_v10, 5  ;;  %v307_v24 = vrot.slane %v306_v11, 4  ;;  %v2109_v25 = vrot.slane %v2107_v13, 4  ;;  %v2823_v28 = vrot.slane %v7014_v1, 5  ;;  %v249_v13 = vld [vmem:[%s6961_s13 + $0x2c] sm:$0x1] }
  0x2f   : > { %v2115_v27 = vrot.slane %v2113_v14, 5  ;;  %v2100_v29 = vor.u32 %v2099_v20, %v2096_v12  ;;  %v7030_v30 = vrot.slane %v2820_v22, 4  ;;  %v314_v33 = vshrl.u32 %v217_v18, 16  ;;  %p6742_p2 = por %p6741_p1, %p6740_p0 }
  0x30   : > { %v317_v34 = vshll.u32 %v217_v18, 16  ;;  %v312_v35 = vsel %vm6987_vm4, %v307_v24, %v311_v5  ;;  %v2110_v36 = vor.u32 %v2109_v25, %v2105_v21  ;;  %v323_v38 = vshll.u32 %v218_v23, 16  ;;  %v5456_v24 = vld [vmem:[%s6961_s13 + $0x30] sm:$0xf] }
  0x31   : > { %v327_v39 = vshrl.u32 %v218_v23, 16  ;;  %v5270_v42 = vcombine.low %v302_v19, %v312_v35  ;;  %v2101_v43 = vrot.slane %v2100_v29, 4  ;;  %v316_v44 = vrot.slane %v314_v33, 4  ;;  %v7066_v33 = vld [vmem:[%s6961_s13 + $0x34] sm:$0xf]  ;;  %p6743_p3 = pnand %p6742_p2, %p6736_p13 }
  0x32   : > { %v319_v45 = vrot.slane %v317_v34, 5  ;;  %v2111_v47 = vrot.slane %v2110_v36, 4  ;;  %v325_v48 = vrot.slane %v323_v38, 5  ;;  %v333_v50 = vshll.u32 %v248_v31, 16 }
  0x33   : > { %v329_v49 = vrot.slane %v327_v39, 4  ;;  %5970 = vmatmul.mubr.msk.bf16.vlgmr.msra.gmra.mrb[0].mxu1 %vm699_vm3, %v5270_v42  ;;  %v2106_v52 = vsel %vm6987_vm4, %v2101_v43, %v2105_v21  ;;  %v2118_v55 = vshrl.u32 %v5453_v40, 16  ;;  %v2121_v56 = vshll.u32 %v5453_v40, 16  ;;  %v7074_v40 = vld [vmem:[%s6961_s13 + $0x38] sm:$0x1] }
  0x34   : > { %v320_v53 = vor.u32 %v319_v45, %v316_v44  ;;  %6002 = vmatpush3.bf16.msra.mxu1 %v6974_v17  ;;  %v2116_v57 = vsel %vm6987_vm4, %v2111_v47, %v2115_v27  ;;  %v335_v59 = vrot.slane %v333_v50, 5  ;;  %v2127_v61 = vshll.u32 %v7037_v46, 16 }
  0x35   : > { %v330_v58 = vor.u32 %v329_v49, %v325_v48  ;;  %v5497_v2 = vcombine.low %v2106_v52, %v2116_v57  ;;  %v2120_v5 = vrot.slane %v2118_v55, 4  ;;  %v2123_v6 = vrot.slane %v2121_v56, 5  ;;  %6533 = vmatprep.subr.msk.bf16.mxu1 %vm748_vm0, %v5349_v51  ;;  %v221_v52 = vld [vmem:[%s6961_s13 + $0x30] sm:$0xf] }
  0x36   : > { %v321_v4 = vrot.slane %v320_v53, 4  ;;  %v2129_v9 = vrot.slane %v2127_v61, 5  ;;  %v2131_v17 = vshrl.u32 %v7037_v46, 16  ;;  %v2137_v10 = vshll.u32 %v7046_v54, 16 }
  0x37   : > { %v331_v8 = vrot.slane %v330_v58, 4  ;;  %6106 = vmatmul.mubr.msk.bf16.vlgmr.msra.gmra.mrb[0].mxu0 %vm699_vm3, %v5497_v2  ;;  %v2124_v12 = vor.u32 %v2123_v6, %v2120_v5  ;;  %v338_v14 = vshrl.u32 %v219_v0, 16  ;;  %v341_v18 = vshll.u32 %v219_v0, 16  ;;  %v222_v58 = vld [vmem:[%s6961_s13 + $0x34] sm:$0xf] }
  0x38   : > { %v326_v11 = vsel %vm6987_vm4, %v321_v4, %v325_v48  ;;  %6138 = vmatpush3.bf16.msra.mxu0 %v6993_v37  ;;  %v2133_v20 = vrot.slane %v2131_v17, 4  ;;  %v2139_v21 = vrot.slane %v2137_v10, 5  ;;  %v347_v23 = vshll.u32 %v220_v7, 16  ;;  %v250_v4 = vld [vmem:[%s6961_s13 + $0x38] sm:$0x1] }
  0x39   : > { %v336_v19 = vsel %vm6987_vm4, %v331_v8, %v335_v59  ;;  %v2125_v27 = vrot.slane %v2124_v12, 4  ;;  %v340_v29 = vrot.slane %v338_v14, 4  ;;  %v343_v31 = vrot.slane %v341_v18, 5  ;;  %6538 = vmatprep.subr.msk.bf16.mxu0 %vm748_vm0, %v6980_v26  ;;  %v5459_v12 = vld [vmem:[%s6961_s13 + $0x3c] sm:$0xf] }
  0x3a   : > { %v5271_v25 = vcombine.low %v326_v11, %v336_v19  ;;  %v2134_v34 = vor.u32 %v2133_v20, %v2129_v9  ;;  %v349_v35 = vrot.slane %v347_v23, 5  ;;  %v351_v37 = vshrl.u32 %v220_v7, 16  ;;  %v7091_v20 = vld [vmem:[%s6961_s13 + $0x40] sm:$0xf] }
  0x3b   : > { %v357_v36 = vshll.u32 %v249_v13, 16  ;;  %v2130_v38 = vsel %vm6987_vm4, %v2125_v27, %v2129_v9  ;;  %v344_v39 = vor.u32 %v343_v31, %v340_v29  ;;  %v2142_v42 = vshrl.u32 %v5456_v24, 16 }
  0x3c   : > { %5973 = vmatprep.mubr.msk.bf16.mxu1 %vm699_vm3, %v5271_v25  ;;  %v2145_v43 = vshll.u32 %v5456_v24, 16  ;;  %v2135_v44 = vrot.slane %v2134_v34, 4  ;;  %v353_v45 = vrot.slane %v351_v37, 4  ;;  %v2151_v26 = vshll.u32 %v7066_v33, 16  ;;  %v7096_v34 = vld [vmem:[%s6961_s13 + $0x44] sm:$0x1] }
  0x3d   : > { %v359_v47 = vrot.slane %v357_v36, 5  ;;  %v345_v48 = vrot.slane %v344_v39, 4  ;;  %v2144_v49 = vrot.slane %v2142_v42, 4  ;;  %v2155_v51 = vshrl.u32 %v7066_v33, 16  ;;  %v223_v42 = vld [vmem:[%s6961_s13 + $0x3c] sm:$0xf] }
  0x3e   : > { %v2147_v50 = vrot.slane %v2145_v43, 5  ;;  %v2140_v53 = vsel %vm6987_vm4, %v2135_v44, %v2139_v21  ;;  %v354_v55 = vor.u32 %v353_v45, %v349_v35  ;;  %v2153_v56 = vrot.slane %v2151_v26, 5  ;;  %v224_v26 = vld [vmem:[%s6961_s13 + $0x40] sm:$0xf] }
  0x3f   : > { %v2161_v57 = vshll.u32 %v7074_v40, 16  ;;  %v5498_v59 = vcombine.low %v2130_v38, %v2140_v53  ;;  %v350_v61 = vsel %vm6987_vm4, %v345_v48, %v349_v35  ;;  %v2157_v2 = vrot.slane %v2155_v51, 4 }
  0x40   : > { %v2148_v0 = vor.u32 %v2147_v50, %v2144_v49  ;;  %v355_v5 = vrot.slane %v354_v55, 4  ;;  %v362_v7 = vshrl.u32 %v221_v52, 16  ;;  %v365_v8 = vshll.u32 %v221_v52, 16 }
  0x41   : > { %v2163_v6 = vrot.slane %v2161_v57, 5  ;;  %6109 = vmatprep.mubr.msk.bf16.mxu0 %vm699_vm3, %v5498_v59  ;;  %v2158_v17 = vor.u32 %v2157_v2, %v2153_v56  ;;  %v371_v10 = vshll.u32 %v222_v58, 16  ;;  %v375_v11 = vshrl.u32 %v222_v58, 16  ;;  %v5462_v2 = vld [vmem:[%s6961_s13 + $0x48] sm:$0xf] }
  0x42   : > { %v2149_v9 = vrot.slane %v2148_v0, 4  ;;  %v360_v13 = vsel %vm6987_vm4, %v355_v5, %v359_v47  ;;  %v364_v14 = vrot.slane %v362_v7, 4  ;;  %v367_v18 = vrot.slane %v365_v8, 5  ;;  %v7114_v8 = vld [vmem:[%s6961_s13 + $0x4c] sm:$0xf] }
  0x43   : > { %v381_v19 = vshll.u32 %v250_v4, 16  ;;  %v5272_v21 = vcombine.low %v350_v61, %v360_v13  ;;  %v2159_v24 = vrot.slane %v2158_v17, 4  ;;  %v373_v25 = vrot.slane %v371_v10, 5  ;;  %v251_v61 = vld [vmem:[%s6961_s13 + $0x44] sm:$0x1] }
  0x44   : > { %v2154_v23 = vsel %vm6987_vm4, %v2149_v9, %v2153_v56  ;;  %v368_v27 = vor.u32 %v367_v18, %v364_v14  ;;  %v377_v29 = vrot.slane %v375_v11, 4  ;;  %v2166_v35 = vshrl.u32 %v5459_v12, 16 }
  0x45   : > { %v383_v31 = vrot.slane %v381_v19, 5  ;;  %5974 = vmatmul.mubr.msk.bf16.gmra.mrb[4].mxu1 %vm699_vm3, %v5272_v21  ;;  %v2164_v37 = vsel %vm6987_vm4, %v2159_v24, %v2163_v6  ;;  %v2169_v36 = vshll.u32 %v5459_v12, 16  ;;  %v2175_v38 = vshll.u32 %v7091_v20, 16 }
  0x46   : > { %v2179_v39 = vshrl.u32 %v7091_v20, 16  ;;  %v5499_v43 = vcombine.low %v2154_v23, %v2164_v37  ;;  %v369_v44 = vrot.slane %v368_v27, 4  ;;  %v378_v45 = vor.u32 %v377_v29, %v373_v25  ;;  %v7122_v23 = vld [vmem:[%s6961_s13 + $0x50] sm:$0x1]  ;;  %v7126_v27 = vld [vmem:[%s6961_s13 + $0x48] sm:$0xf] }
  0x47   : > { %v2168_v47 = vrot.slane %v2166_v35, 4  ;;  %v2171_v48 = vrot.slane %v2169_v36, 5  ;;  %v2177_v49 = vrot.slane %v2175_v38, 5  ;;  %v2185_v51 = vshll.u32 %v7096_v34, 16  ;;  %v7129_v36 = vld [vmem:[%s6961_s13 + $0x4c] sm:$0xf] }
  0x48   : > { %v2181_v50 = vrot.slane %v2179_v39, 4  ;;  %6110 = vmatmul.mubr.msk.bf16.gmra.mrb[4].mxu0 %vm699_vm3, %v5499_v43  ;;  %v374_v52 = vsel %vm6987_vm4, %v369_v44, %v373_v25  ;;  %v379_v53 = vrot.slane %v378_v45, 4  ;;  %v386_v55 = vshrl.u32 %v223_v42, 16 }
  0x49   : > { %v389_v56 = vshll.u32 %v223_v42, 16  ;;  %v2172_v57 = vor.u32 %v2171_v48, %v2168_v47  ;;  %v2187_v59 = vrot.slane %v2185_v51, 5  ;;  %v395_v0 = vshll.u32 %v224_v26, 16 }
  0x4a   : > { %v2182_v58 = vor.u32 %v2181_v50, %v2177_v49  ;;  %v384_v4 = vsel %vm6987_vm4, %v379_v53, %v383_v31  ;;  %v388_v5 = vrot.slane %v386_v55, 4  ;;  %v399_v7 = vshrl.u32 %v224_v26, 16  ;;  %v252_v26 = vld [vmem:[%s6961_s13 + $0x50] sm:$0x1]  ;;  %v5465_v53 = vld [vmem:[%s6961_s13 + $0x54] sm:$0xf] }
  0x4b   : > { %v391_v6 = vrot.slane %v389_v56, 5  ;;  %v5273_v9 = vcombine.low %v374_v52, %v384_v4  ;;  %v2173_v17 = vrot.slane %v2172_v57, 4  ;;  %v397_v11 = vrot.slane %v395_v0, 5  ;;  %v7145_v4 = vld [vmem:[%s6961_s13 + $0x58] sm:$0xf] }
  0x4c   : > { %v2183_v10 = vrot.slane %v2182_v58, 4  ;;  %v401_v13 = vrot.slane %v399_v7, 4  ;;  %v405_v14 = vshll.u32 %v251_v61, 16  ;;  %v2190_v18 = vshrl.u32 %v5462_v2, 16 }
  0x4d   : > { %v392_v12 = vor.u32 %v391_v6, %v388_v5  ;;  %5977 = vmatprep.mubr.msk.bf16.mxu1 %vm699_vm3, %v5273_v9  ;;  %v2178_v19 = vsel %vm6987_vm4, %v2173_v17, %v2177_v49  ;;  %v2193_v24 = vshll.u32 %v5462_v2, 16  ;;  %v2199_v25 = vshll.u32 %v7114_v8, 16 }
  0x4e   : > { %v2188_v21 = vsel %vm6987_vm4, %v2183_v10, %v2187_v59  ;;  %v402_v35 = vor.u32 %v401_v13, %v397_v11  ;;  %v407_v37 = vrot.slane %v405_v14, 5  ;;  %v2192_v38 = vrot.slane %v2190_v18, 4 }
  0x4f   : > { %v5500_v29 = vcombine.low %v2178_v19, %v2188_v21  ;;  %v393_v31 = vrot.slane %v392_v12, 4  ;;  %v2195_v39 = vrot.slane %v2193_v24, 5  ;;  %v2201_v42 = vrot.slane %v2199_v25, 5  ;;  %v7151_v12 = vld [vmem:[%s6961_s13 + $0x5c] sm:$0x1] }
  0x50   : > { %v2203_v43 = vshrl.u32 %v7114_v8, 16  ;;  %v403_v45 = vrot.slane %v402_v35, 4  ;;  %v2209_v47 = vshll.u32 %v7122_v23, 16  ;;  %v410_v48 = vshrl.u32 %v7126_v27, 16  ;;  %v7155_v24 = vld [vmem:[%s6961_s13 + $0x54] sm:$0xf] }
  0x51   : > { %6113 = vmatprep.mubr.msk.bf16.mxu0 %vm699_vm3, %v5500_v29  ;;  %v398_v44 = vsel %vm6987_vm4, %v393_v31, %v397_v11  ;;  %v2196_v49 = vor.u32 %v2195_v39, %v2192_v38  ;;  %v413_v51 = vshll.u32 %v7126_v27, 16  ;;  %v419_v52 = vshll.u32 %v7129_v36, 16 }
  0x52   : > { %v2205_v50 = vrot.slane %v2203_v43, 4  ;;  %v408_v55 = vsel %vm6987_vm4, %v403_v45, %v407_v37  ;;  %v2211_v56 = vrot.slane %v2209_v47, 5  ;;  %v412_v57 = vrot.slane %v410_v48, 4  ;;  %v7161_v37 = vld [vmem:[%s6961_s13 + $0x58] sm:$0xf] }
  0x53   : > { %v423_v58 = vshrl.u32 %v7129_v36, 16  ;;  %v5274_v59 = vcombine.low %v398_v44, %v408_v55  ;;  %v2197_v61 = vrot.slane %v2196_v49, 4  ;;  %v415_v2 = vrot.slane %v413_v51, 5 }
  0x54   : > { %v2206_v0 = vor.u32 %v2205_v50, %v2201_v42  ;;  %v421_v5 = vrot.slane %v419_v52, 5  ;;  %v429_v7 = vshll.u32 %v252_v26, 16  ;;  %v2214_v9 = vshrl.u32 %v5465_v53, 16  ;;  %v253_v26 = vld [vmem:[%s6961_s13 + $0x5c] sm:$0x1] }
  0x55   : > { %v425_v6 = vrot.slane %v423_v58, 4  ;;  %5978 = vmatmul.mubr.msk.bf16.gmra.mrb[8].mxu1 %vm699_vm3, %v5274_v59  ;;  %v2202_v17 = vsel %vm6987_vm4, %v2197_v61, %v2201_v42  ;;  %v416_v11 = vor.u32 %v415_v2, %v412_v57  ;;  %v2217_v13 = vshll.u32 %v5465_v53, 16  ;;  %v5468_v53 = vld [vmem:[%s6961_s13 + $0x60] sm:$0xf]  ;;  %v7175_v59 = vld [vmem:[%s6961_s13 + $0x64] sm:$0xf] }
  0x56   : > { %v2207_v10 = vrot.slane %v2206_v0, 4  ;;  %v431_v18 = vrot.slane %v429_v7, 5  ;;  %v2216_v19 = vrot.slane %v2214_v9, 4  ;;  %v2223_v21 = vshll.u32 %v7145_v4, 16  ;;  %v7182_v9 = vld [vmem:[%s6961_s13 + $0x68] sm:$0x1] }
  0x57   : > { %v426_v14 = vor.u32 %v425_v6, %v421_v5  ;;  %v417_v29 = vrot.slane %v416_v11, 4  ;;  %v2219_v31 = vrot.slane %v2217_v13, 5  ;;  %v2227_v35 = vshrl.u32 %v7145_v4, 16 }
  0x58   : > { %v2212_v25 = vsel %vm6987_vm4, %v2207_v10, %v2211_v56  ;;  %v2225_v42 = vrot.slane %v2223_v21, 5  ;;  %v2233_v43 = vshll.u32 %v7151_v12, 16  ;;  %v434_v48 = vshrl.u32 %v7155_v24, 16 }
  0x59   : > { %v5501_v38 = vcombine.low %v2202_v17, %v2212_v25  ;;  %v427_v39 = vrot.slane %v426_v14, 4  ;;  %v422_v44 = vsel %vm6987_vm4, %v417_v29, %v421_v5  ;;  %v2220_v45 = vor.u32 %v2219_v31, %v2216_v19  ;;  %v7186_v19 = vld [vmem:[%s6961_s13 + $0x60] sm:$0xf] }
  0x5a   : > { %v2229_v47 = vrot.slane %v2227_v35, 4  ;;  %v2235_v50 = vrot.slane %v2233_v43, 5  ;;  %v437_v51 = vshll.u32 %v7155_v24, 16  ;;  %v443_v52 = vshll.u32 %v7161_v37, 16  ;;  %v7192_v35 = vld [vmem:[%s6961_s13 + $0x64] sm:$0xf] }
  0x5b   : > { %6114 = vmatmul.mubr.msk.bf16.gmra.mrb[8].mxu0 %vm699_vm3, %v5501_v38  ;;  %v432_v49 = vsel %vm6987_vm4, %v427_v39, %v431_v18  ;;  %v2221_v56 = vrot.slane %v2220_v45, 4  ;;  %v436_v58 = vrot.slane %v434_v48, 4  ;;  %v447_v2 = vshrl.u32 %v7161_v37, 16 }
  0x5c   : > { %v5275_v55 = vcombine.low %v422_v44, %v432_v49  ;;  %v2230_v57 = vor.u32 %v2229_v47, %v2225_v42  ;;  %v439_v61 = vrot.slane %v437_v51, 5  ;;  %v445_v0 = vrot.slane %v443_v52, 5 }
  0x5d   : > { %v453_v5 = vshll.u32 %v253_v26, 16  ;;  %v2226_v6 = vsel %vm6987_vm4, %v2221_v56, %v2225_v42  ;;  %v2238_v17 = vshrl.u32 %v5468_v53, 16  ;;  %v2241_v10 = vshll.u32 %v5468_v53, 16 }
  0x5e   : > { %5981 = vmatprep.mubr.msk.bf16.mxu1 %vm699_vm3, %v5275_v55  ;;  %v2231_v7 = vrot.slane %v2230_v57, 4  ;;  %v440_v11 = vor.u32 %v439_v61, %v436_v58  ;;  %v449_v13 = vrot.slane %v447_v2, 4  ;;  %v2247_v18 = vshll.u32 %v7175_v59, 16  ;;  %v5528_v58 = vld [vmem:[%s6961_s13 + $0xc] sm:$0xe] }
  0x5f   : > { %v455_v14 = vrot.slane %v453_v5, 5  ;;  %v2240_v25 = vrot.slane %v2238_v17, 4  ;;  %v2243_v29 = vrot.slane %v2241_v10, 5  ;;  %v2251_v31 = vshrl.u32 %v7175_v59, 16 }
  0x60   : > { %v2236_v21 = vsel %vm6987_vm4, %v2231_v7, %v2235_v50  ;;  %v441_v39 = vrot.slane %v440_v11, 4  ;;  %v450_v42 = vor.u32 %v449_v13, %v445_v0  ;;  %v2249_v43 = vrot.slane %v2247_v18, 5  ;;  %v254_v50 = vld [vmem:[%s6961_s13 + $0x68] sm:$0x1] }
  0x61   : > { %v5502_v38 = vcombine.low %v2226_v6, %v2236_v21  ;;  %v2244_v44 = vor.u32 %v2243_v29, %v2240_v25  ;;  %v2253_v45 = vrot.slane %v2251_v31, 4  ;;  %v2257_v47 = vshll.u32 %v7182_v9, 16  ;;  %v7220_v29 = vld [vmem:[%s6961_s13 + $0x70] sm:$0xf] }
  0x62   : > { %v458_v26 = vshrl.u32 %v7186_v19, 16  ;;  %v446_v48 = vsel %vm6987_vm4, %v441_v39, %v445_v0  ;;  %v451_v49 = vrot.slane %v450_v42, 4  ;;  %v461_v51 = vshll.u32 %v7186_v19, 16  ;;  %v7207_v0 = vld [vmem:[%s6961_s13 + $0x6c] sm:$0xf] }
  0x63   : > { %6117 = vmatprep.mubr.msk.bf16.mxu0 %vm699_vm3, %v5502_v38  ;;  %v467_v52 = vshll.u32 %v7192_v35, 16  ;;  %v2245_v53 = vrot.slane %v2244_v44, 4  ;;  %v2254_v55 = vor.u32 %v2253_v45, %v2249_v43  ;;  %v2259_v56 = vrot.slane %v2257_v47, 5 }
  0x64   : > { %v460_v57 = vrot.slane %v458_v26, 4  ;;  %v456_v61 = vsel %vm6987_vm4, %v451_v49, %v455_v14  ;;  %v463_v2 = vrot.slane %v461_v51, 5  ;;  %v471_v6 = vshrl.u32 %v7192_v35, 16  ;;  %v255_v26 = vld [vmem:[%s6961_s13 + $0x74] sm:$0x1] }
  0x65   : > { %v469_v5 = vrot.slane %v467_v52, 5  ;;  %v5276_v7 = vcombine.low %v446_v48, %v456_v61  ;;  %v2250_v17 = vsel %vm6987_vm4, %v2245_v53, %v2249_v43  ;;  %v2255_v10 = vrot.slane %v2254_v55, 4  ;;  %v5529_v48 = vld [vmem:[%s6961_s13 + $0x18] sm:$0xe] }
  0x66   : > { %v477_v11 = vshll.u32 %v254_v50, 16  ;;  %v464_v14 = vor.u32 %v463_v2, %v460_v57  ;;  %v473_v18 = vrot.slane %v471_v6, 4  ;;  %v5544_v21 = vrot.slane %v5528_v58, 9  ;;  %v7239_v53 = vld [vmem:[%s6961_s13 + $0x78] sm:$0xf] }
  0x67   : > { %v2815_v25 = vrot.slane %v2813_v62, 4  ;;  %5982 = vmatmul.mubr.msk.bf16.gmra.mrb[12].mxu1 %vm699_vm3, %v5276_v7  ;;  %v2260_v31 = vsel %vm6987_vm4, %v2255_v10, %v2259_v56  ;;  %v482_v39 = vshrl.u32 %v7207_v0, 16  ;;  %v485_v42 = vshll.u32 %v7207_v0, 16  ;;  %v256_v57 = vld [vmem:[%s6961_s13 + $0x80] sm:$0x1] }
  0x68   : > { %v479_v38 = vrot.slane %v477_v11, 5  ;;  %v5503_v43 = vcombine.low %v2250_v17, %v2260_v31  ;;  %v465_v44 = vrot.slane %v464_v14, 4  ;;  %v474_v45 = vor.u32 %v473_v18, %v469_v5  ;;  %v5530_v10 = vld [vmem:[%s6961_s13 + $0x24] sm:$0xe] }
  0x69   : > { %v2814_v47 = vsel %vm7213_vm7, %v5544_v21, %v2813_v62  ;;  %v2817_v49 = vsel %vm7213_vm7, %v2815_v25, %v2816_v63  ;;  %v484_v50 = vrot.slane %v482_v39, 4  ;;  %v487_v51 = vrot.slane %v485_v42, 5  ;;  %v7265_v39 = vld [vmem:[%s6961_s13 + $0x84] sm:$0xf] }
  0x6a   : > { %v491_v52 = vshll.u32 %v7220_v29, 16  ;;  %6118 = vmatmul.mubr.msk.bf16.gmra.mrb[12].mxu0 %vm699_vm3, %v5503_v43  ;;  %v470_v15 = vsel %vm6987_vm4, %v465_v44, %v469_v5  ;;  %v475_v62 = vrot.slane %v474_v45, 4  ;;  %v5561_v55 = vcombine.low %v2814_v47, %v2817_v49  ;;  %v7273_v43 = vld [vmem:[%s6961_s13 + $0x88] sm:$0xf] }
  0x6b   : > { %v495_v56 = vshrl.u32 %v7220_v29, 16  ;;  %v488_v63 = vor.u32 %v487_v51, %v484_v50  ;;  %v501_v61 = vshll.u32 %v255_v26, 16  ;;  %v5545_v2 = vrot.slane %v5529_v48, 9 }
  0x6c   : > { %v493_v58 = vrot.slane %v491_v52, 5  ;;  %v480_v6 = vsel %vm6987_vm4, %v475_v62, %v479_v38  ;;  %6139 = vmatprep.mubr.msk.bf16.mxu0 %vm699_vm3, %v5561_v55  ;;  %v2824_v5 = vsel %vm7213_vm7, %v7030_v30, %v2823_v28  ;;  %v506_v17 = vshrl.u32 %v7239_v53, 16  ;;  %v257_v52 = vld [vmem:[%s6961_s13 + $0x8c] sm:$0x1] }
  0x6d   : > { %v497_v7 = vrot.slane %v495_v56, 4  ;;  %v5277_v11 = vcombine.low %v470_v15, %v480_v6  ;;  %v489_v14 = vrot.slane %v488_v63, 4  ;;  %v503_v18 = vrot.slane %v501_v61, 5 }
  0x6e   : > { %v2821_v21 = vsel %vm7213_vm7, %v5545_v2, %v2820_v22  ;;  %v508_v38 = vrot.slane %v506_v17, 4  ;;  %v509_v1 = vshll.u32 %v7239_v53, 16  ;;  %v515_v30 = vshll.u32 %v7246_v16, 16  ;;  %v7278_v22 = vld [vmem:[%s9125_s1 + $0xe] sm:$0x3] }
  0x6f   : > { %v498_v25 = vor.u32 %v497_v7, %v493_v58  ;;  %v5562_v31 = vcombine.low %v2821_v21, %v2824_v5  ;;  %5985 = vmatprep.mubr.msk.bf16.mxu1 %vm699_vm3, %v5277_v11  ;;  %v494_v28 = vsel %vm6987_vm4, %v489_v14, %v493_v58  ;;  %v519_v60 = vshrl.u32 %v7246_v16, 16  ;;  %v7297_v5 = vld [vmem:[%s6961_s13 + $0x90] sm:$0xf] }
  0x70   : > { %v525_v42 = vshll.u32 %v256_v57, 16  ;;  %v511_v45 = vrot.slane %v509_v1, 5  ;;  %v5546_v47 = vrot.slane %v5530_v10, 9  ;;  %v2827_v26 = vrot.slane %v7037_v46, 5  ;;  %v5531_v57 = vld [vmem:[%s6961_s13 + $0x30] sm:$0xe] }
  0x71   : > { %v499_v44 = vrot.slane %v498_v25, 4  ;;  %v517_v48 = vrot.slane %v515_v30, 5  ;;  %v521_v49 = vrot.slane %v519_v60, 4  ;;  %v2830_v51 = vrot.slane %v7046_v54, 5  ;;  %v7309_v30 = vld [vmem:[%s6961_s13 + $0x94] sm:$0xf] }
  0x72   : > { %v527_v50 = vrot.slane %v525_v42, 5  ;;  %6140 = vmatmul.mubr.msk.bf16.vlgmr.msra.gmra.mrb[0].mxu0 %vm699_vm3, %v5562_v31  ;;  %v512_v62 = vor.u32 %v511_v45, %v508_v38  ;;  %v2828_v55 = vsel %vm7213_vm7, %v5546_v47, %v2827_v26  ;;  %v2829_v56 = vrot.slane %v2827_v26, 4  ;;  %v258_v60 = vld [vmem:[%s6961_s13 + $0x98] sm:$0x1]  ;;  %v5532_v26 = vld [vmem:[%s6961_s13 + $0x3c] sm:$0xe] }
  0x73   : > { %v504_v15 = vsel %vm6987_vm4, %v499_v44, %v503_v18  ;;  %6172 = vmatpush3.bf16.msra.mxu0 %v6997_v41  ;;  %v522_v46 = vor.u32 %v521_v49, %v517_v48  ;;  %v530_v58 = vshrl.u32 %v7265_v39, 16  ;;  %v533_v54 = vshll.u32 %v7265_v39, 16 }
  0x74   : > { %v5278_v63 = vcombine.low %v494_v28, %v504_v15  ;;  %v513_v61 = vrot.slane %v512_v62, 4  ;;  %v2831_v2 = vsel %vm7213_vm7, %v2829_v56, %v2830_v51  ;;  %v539_v6 = vshll.u32 %v7273_v43, 16  ;;  %6539 = vmatprep.subr.msk.bf16.mxu0 %vm748_vm0, %v7278_v22 }
  0x75   : > { %v543_v7 = vshrl.u32 %v7273_v43, 16  ;;  %v523_v41 = vrot.slane %v522_v46, 4  ;;  %v5563_v17 = vcombine.low %v2828_v55, %v2831_v2  ;;  %v532_v10 = vrot.slane %v530_v58, 4  ;;  %v7329_v46 = vld [vmem:[%s6961_s13 + $0xa0] sm:$0xf] }
  0x76   : > { %5986 = vmatmul.mubr.msk.bf16.gmra.mrb[16].mxu1 %vm699_vm3, %v5278_v63  ;;  %v535_v11 = vrot.slane %v533_v54, 5  ;;  %v518_v14 = vsel %vm6987_vm4, %v513_v61, %v517_v48  ;;  %v541_v18 = vrot.slane %v539_v6, 5  ;;  %v549_v25 = vshll.u32 %v257_v52, 16  ;;  %v7318_v52 = vld [vmem:[%s6961_s13 + $0x9c] sm:$0xf] }
  0x77   : > { %v545_v21 = vrot.slane %v543_v7, 4  ;;  %v528_v31 = vsel %vm6987_vm4, %v523_v41, %v527_v50  ;;  %6143 = vmatprep.mubr.msk.bf16.mxu0 %vm699_vm3, %v5563_v17  ;;  %v5547_v1 = vrot.slane %v5531_v57, 9  ;;  %v2834_v28 = vrot.slane %v7066_v33, 5 }
  0x78   : > { %v536_v38 = vor.u32 %v535_v11, %v532_v10  ;;  %v5279_v42 = vcombine.low %v518_v14, %v528_v31  ;;  %v551_v45 = vrot.slane %v549_v25, 5  ;;  %v2837_v47 = vrot.slane %v7074_v40, 5  ;;  %v259_v10 = vld [vmem:[%s6961_s13 + $0xa4] sm:$0x1]  ;;  %v5533_v11 = vld [vmem:[%s6961_s13 + $0x48] sm:$0xe] }
  0x79   : > { %v546_v44 = vor.u32 %v545_v21, %v541_v18  ;;  %v2835_v49 = vsel %vm7213_vm7, %v5547_v1, %v2834_v28  ;;  %v2836_v50 = vrot.slane %v2834_v28, 4  ;;  %v554_v51 = vshrl.u32 %v7297_v5, 16 }
  0x7a   : > { %v537_v48 = vrot.slane %v536_v38, 4  ;;  %5989 = vmatprep.mubr.msk.bf16.mxu1 %vm699_vm3, %v5279_v42  ;;  %v557_v15 = vshll.u32 %v7297_v5, 16  ;;  %v563_v62 = vshll.u32 %v7309_v30, 16  ;;  %v567_v40 = vshrl.u32 %v7309_v30, 16 }
  0x7b   : > { %v547_v33 = vrot.slane %v546_v44, 4  ;;  %v2838_v56 = vsel %vm7213_vm7, %v2836_v50, %v2837_v47  ;;  %v556_v57 = vrot.slane %v554_v51, 4  ;;  %v573_v63 = vshll.u32 %v258_v60, 16 }
  0x7c   : > { %v542_v55 = vsel %vm6987_vm4, %v537_v48, %v541_v18  ;;  %v5564_v54 = vcombine.low %v2835_v49, %v2838_v56  ;;  %v559_v61 = vrot.slane %v557_v15, 5  ;;  %v565_v2 = vrot.slane %v563_v62, 5  ;;  %v7355_v56 = vld [vmem:[%s6961_s13 + $0xac] sm:$0xf] }
  0x7d   : > { %v552_v58 = vsel %vm6987_vm4, %v547_v33, %v551_v45  ;;  %v569_v7 = vrot.slane %v567_v40, 4  ;;  %v575_v41 = vrot.slane %v573_v63, 5  ;;  %v5548_v17 = vrot.slane %v5532_v26, 9  ;;  %v7350_v33 = vld [vmem:[%s6961_s13 + $0xa8] sm:$0xf] }
  0x7e   : > { %v5280_v6 = vcombine.low %v542_v55, %v552_v58  ;;  %6144 = vmatmul.mubr.msk.bf16.gmra.mrb[4].mxu0 %vm699_vm3, %v5564_v54  ;;  %v560_v14 = vor.u32 %v559_v61, %v556_v57  ;;  %v2841_v18 = vrot.slane %v7091_v20, 5  ;;  %v2844_v21 = vrot.slane %v7096_v34, 5  ;;  %v260_v61 = vld [vmem:[%s6961_s13 + $0xb0] sm:$0x1] }
  0x7f   : > { %v578_v25 = vshrl.u32 %v7318_v52, 16  ;;  %v570_v31 = vor.u32 %v569_v7, %v565_v2  ;;  %v581_v38 = vshll.u32 %v7318_v52, 16  ;;  %v587_v1 = vshll.u32 %v7329_v46, 16 }
  0x80   : > { %5990 = vmatmul.mubr.msk.bf16.gmra.mrb[20].mxu1 %vm699_vm3, %v5280_v6  ;;  %v591_v28 = vshrl.u32 %v7329_v46, 16  ;;  %v561_v60 = vrot.slane %v560_v14, 4  ;;  %v2842_v42 = vsel %vm7213_vm7, %v5548_v17, %v2841_v18  ;;  %v2843_v20 = vrot.slane %v2841_v18, 4  ;;  %v7370_v14 = vld [vmem:[%s6961_s13 + $0xb4] sm:$0xf] }
  0x81   : > { %v580_v44 = vrot.slane %v578_v25, 4  ;;  %v571_v34 = vrot.slane %v570_v31, 4  ;;  %v583_v45 = vrot.slane %v581_v38, 5  ;;  %v589_v47 = vrot.slane %v587_v1, 5 }
  0x82   : > { %v593_v26 = vrot.slane %v591_v28, 4  ;;  %v566_v48 = vsel %vm6987_vm4, %v561_v60, %v565_v2  ;;  %v2845_v49 = vsel %vm7213_vm7, %v2843_v20, %v2844_v21  ;;  %v597_v50 = vshll.u32 %v259_v10, 16  ;;  %v5534_v2 = vld [vmem:[%s6961_s13 + $0x54] sm:$0xe] }
  0x83   : > { %v5549_v51 = vrot.slane %v5533_v11, 9  ;;  %v576_v15 = vsel %vm6987_vm4, %v571_v34, %v575_v41  ;;  %v5565_v62 = vcombine.low %v2842_v42, %v2845_v49  ;;  %v584_v40 = vor.u32 %v583_v45, %v580_v44  ;;  %v7379_v42 = vld [vmem:[%s6961_s13 + $0xb8] sm:$0xf]  ;;  %v261_v49 = vld [vmem:[%s6961_s13 + $0xbc] sm:$0x1] }
  0x84   : > { %v594_v55 = vor.u32 %v593_v26, %v589_v47  ;;  %v5281_v57 = vcombine.low %v566_v48, %v576_v15  ;;  %v599_v63 = vrot.slane %v597_v50, 5  ;;  %v2848_v58 = vrot.slane %v7114_v8, 5 }
  0x85   : > { %v2851_v54 = vrot.slane %v7122_v23, 5  ;;  %6147 = vmatprep.mubr.msk.bf16.mxu0 %vm699_vm3, %v5565_v62  ;;  %v585_v6 = vrot.slane %v584_v40, 4  ;;  %v602_v41 = vshrl.u32 %v7350_v33, 16  ;;  %v605_v17 = vshll.u32 %v7350_v33, 16 }
  0x86   : > { %v595_v7 = vrot.slane %v594_v55, 4  ;;  %5993 = vmatprep.mubr.msk.bf16.mxu1 %vm699_vm3, %v5281_v57  ;;  %v2849_v10 = vsel %vm7213_vm7, %v5549_v51, %v2848_v58  ;;  %v2850_v11 = vrot.slane %v2848_v58, 4  ;;  %v611_v8 = vshll.u32 %v7355_v56, 16  ;;  %v5535_v55 = vld [vmem:[%s6961_s13 + $0x60] sm:$0xe] }
  0x87   : > { %v615_v23 = vshrl.u32 %v7355_v56, 16  ;;  %v590_v18 = vsel %vm6987_vm4, %v585_v6, %v589_v47  ;;  %v604_v25 = vrot.slane %v602_v41, 4  ;;  %v607_v31 = vrot.slane %v605_v17, 5  ;;  %v5536_v6 = vld [vmem:[%s6961_s13 + $0x6c] sm:$0xe] }
  0x88   : > { %v600_v21 = vsel %vm6987_vm4, %v595_v7, %v599_v63  ;;  %v2852_v1 = vsel %vm7213_vm7, %v2850_v11, %v2851_v54  ;;  %v613_v28 = vrot.slane %v611_v8, 5  ;;  %v621_v34 = vshll.u32 %v260_v61, 16  ;;  %v5472_v11 = vld [vmem:[%s6961_s13 + $0x70] sm:$0xf]  ;;  %v5473_v8 = vld [vmem:[%s6961_s13 + $0x74] sm:$0x1] }
  0x89   : > { %v5282_v38 = vcombine.low %v590_v18, %v600_v21  ;;  %v617_v60 = vrot.slane %v615_v23, 4  ;;  %v5566_v20 = vcombine.low %v2849_v10, %v2852_v1  ;;  %v608_v44 = vor.u32 %v607_v31, %v604_v25 }
  0x8a   : > { %v5550_v45 = vrot.slane %v5534_v2, 9  ;;  %v2855_v26 = vrot.slane %v7145_v4, 5  ;;  %v2858_v48 = vrot.slane %v7151_v12, 5  ;;  %v626_v50 = vshrl.u32 %v7370_v14, 16 }
  0x8b   : > { %5994 = vmatmul.mubr.msk.bf16.gmra.mrb[24].mxu1 %vm699_vm3, %v5282_v38  ;;  %v618_v47 = vor.u32 %v617_v60, %v613_v28  ;;  %6148 = vmatmul.mubr.msk.bf16.gmra.mrb[8].mxu0 %vm699_vm3, %v5566_v20  ;;  %v609_v51 = vrot.slane %v608_v44, 4  ;;  %v623_v15 = vrot.slane %v621_v34, 5  ;;  %v629_v62 = vshll.u32 %v7370_v14, 16 }
  0x8c   : > { %v635_v40 = vshll.u32 %v7379_v42, 16  ;;  %v2856_v4 = vsel %vm7213_vm7, %v5550_v45, %v2855_v26  ;;  %v2857_v12 = vrot.slane %v2855_v26, 4  ;;  %v628_v63 = vrot.slane %v626_v50, 4 }
  0x8d   : > { %v619_v57 = vrot.slane %v618_v47, 4  ;;  %v614_v58 = vsel %vm6987_vm4, %v609_v51, %v613_v28  ;;  %v631_v54 = vrot.slane %v629_v62, 5  ;;  %v639_v2 = vshrl.u32 %v7379_v42, 16  ;;  %v5537_v47 = vld [vmem:[%s6961_s13 + $0x78] sm:$0xe] }
  0x8e   : > { %v637_v61 = vrot.slane %v635_v40, 5  ;;  %v2859_v41 = vsel %vm7213_vm7, %v2857_v12, %v2858_v48  ;;  %v645_v17 = vshll.u32 %v261_v49, 16  ;;  %v5551_v10 = vrot.slane %v5535_v55, 9  ;;  %v6676_v51 = vld [vmem:[%s6961_s13] sm:$0xf] }
  0x8f   : > { %v624_v7 = vsel %vm6987_vm4, %v619_v57, %v623_v15  ;;  %v5567_v18 = vcombine.low %v2856_v4, %v2859_v41  ;;  %v632_v21 = vor.u32 %v631_v54, %v628_v63  ;;  %v641_v25 = vrot.slane %v639_v2, 4  ;;  %v7417_v15 = vld [vmem:[%s6961_s13 + $0x4] sm:$0xf]  ;;  %v7421_v40 = vld [vmem:[%s6961_s13 + $0x7c] sm:$0xf] }
  0x90   : > { %v5283_v23 = vcombine.low %v614_v58, %v624_v7  ;;  %v647_v31 = vrot.slane %v645_v17, 5  ;;  %v2862_v38 = vrot.slane %v7175_v59, 5  ;;  %v2865_v1 = vrot.slane %v7182_v9, 5  ;;  %v7424_v55 = vld [vmem:[%s6961_s13 + $0x80] sm:$0x1] }
  0x91   : > { %v5552_v28 = vrot.slane %v5536_v6, 9  ;;  %6151 = vmatprep.mubr.msk.bf16.mxu0 %vm699_vm3, %v5567_v18  ;;  %v633_v60 = vrot.slane %v632_v21, 4  ;;  %v642_v20 = vor.u32 %v641_v25, %v637_v61  ;;  %v2869_v44 = vrot.slane %v5472_v11, 5  ;;  %v5478_v57 = vld [vmem:[%s6961_s13 + $0x88] sm:$0xf] }
  0x92   : > { %5997 = vmatprep.mubr.msk.bf16.mxu1 %vm699_vm3, %v5283_v23  ;;  %v2872_v34 = vrot.slane %v5473_v8, 5  ;;  %v2863_v45 = vsel %vm7213_vm7, %v5551_v10, %v2862_v38  ;;  %v2864_v59 = vrot.slane %v2862_v38, 4  ;;  %v5301_v62 = vcombine.low %v6676_v51, %v7417_v15  ;;  %v5479_v54 = vld [vmem:[%s6961_s13 + $0x8c] sm:$0x1]  ;;  %v5481_v17 = vld [vmem:[%s6961_s13 + $0x94] sm:$0xf] }
  0x93   : > { %v638_v9 = vsel %vm6987_vm4, %v633_v60, %v637_v61  ;;  %v643_v26 = vrot.slane %v642_v20, 4  ;;  %v2870_v48 = vsel %vm7213_vm7, %v5552_v28, %v2869_v44  ;;  %v2871_v49 = vrot.slane %v2869_v44, 4  ;;  %v5538_v61 = vld [vmem:[%s6961_s13 + $0x84] sm:$0xe]  ;;  %v5539_v23 = vld [vmem:[%s6961_s13 + $0x90] sm:$0xe] }
  0x94   : > { %v2866_v50 = vsel %vm7213_vm7, %v2864_v59, %v2865_v1  ;;  %v5553_v58 = vrot.slane %v5537_v47, 9  ;;  %v2876_v7 = vrot.slane %v7421_v40, 5  ;;  %v2879_v41 = vrot.slane %v7424_v55, 5  ;;  %v5482_v25 = vld [vmem:[%s6961_s13 + $0x98] sm:$0x1] }
  0x95   : > { %v648_v4 = vsel %vm6987_vm4, %v643_v26, %v647_v31  ;;  %v5568_v12 = vcombine.low %v2863_v45, %v2866_v50  ;;  %v2873_v63 = vsel %vm7213_vm7, %v2871_v49, %v2872_v34  ;;  %v5554_v10 = vrot.slane %v5538_v61, 9  ;;  %v5484_v31 = vld [vmem:[%s6961_s13 + $0xa0] sm:$0xf]  ;;  %v5485_v60 = vld [vmem:[%s6961_s13 + $0xa4] sm:$0x1] }
  0x96   : > { %v5284_v2 = vcombine.low %v638_v9, %v648_v4  ;;  %v5569_v6 = vcombine.low %v2870_v48, %v2873_v63  ;;  %v2883_v11 = vrot.slane %v5478_v57, 5  ;;  %v2886_v8 = vrot.slane %v5479_v54, 5  ;;  %v5540_v20 = vld [vmem:[%s6961_s13 + $0x9c] sm:$0xe]  ;;  %v6678_v44 = vld [vmem:[%s6961_s13 + $0xc] sm:$0xf] }
  0x97   : > { %6152 = vmatmul.mubr.msk.bf16.gmra.mrb[12].mxu0 %vm699_vm3, %v5568_v12  ;;  %v2877_v18 = vsel %vm7213_vm7, %v5553_v58, %v2876_v7  ;;  %v2878_v21 = vrot.slane %v2876_v7, 4  ;;  %v2890_v28 = vrot.slane %v5481_v17, 5  ;;  %v7451_v34 = vld [vmem:[%s6961_s13 + $0x10] sm:$0xf]  ;;  %v6680_v47 = vld [vmem:[%s6961_s13 + $0x18] sm:$0xf] }
  0x98   : > { %5998 = vmatmul.mubr.msk.bf16.gmra.mrb[28].mxu1 %vm699_vm3, %v5284_v2  ;;  %6155 = vmatprep.mubr.msk.bf16.mxu0 %vm699_vm3, %v5569_v6  ;;  %v2884_v38 = vsel %vm7213_vm7, %v5554_v10, %v2883_v11  ;;  %v2885_v1 = vrot.slane %v2883_v11, 4  ;;  %v5302_v45 = vcombine.low %v6678_v44, %v7451_v34  ;;  %v7458_v9 = vld [vmem:[%s6961_s13 + $0x1c] sm:$0xf]  ;;  %v5555_v48 = vrot.slane %v5539_v23, 9  ;;  %v5487_v57 = vld [vmem:[%s6961_s13 + $0xac] sm:$0xf] }
  0x99   : > { %6003 = vmatprep.mubr.msk.bf16.mxu1 %vm699_vm3, %v5301_v62  ;;  %v2880_v59 = vsel %vm7213_vm7, %v2878_v21, %v2879_v41  ;;  %v5303_v26 = vcombine.low %v6680_v47, %v7458_v9  ;;  %v2892_v51 = vrot.slane %v2890_v28, 4  ;;  %v2893_v62 = vrot.slane %v5482_v25, 5  ;;  %v6682_v54 = vld [vmem:[%s9125_s1 + $0x4] sm:$0x3]  ;;  %v5490_v2 = vld [vmem:[%s6961_s13 + $0xb8] sm:$0xf] }
  0x9a   : > { %v5570_v49 = vcombine.low %v2877_v18, %v2880_v59  ;;  %v2887_v50 = vsel %vm7213_vm7, %v2885_v1, %v2886_v8  ;;  %v5556_v12 = vrot.slane %v5540_v20, 9  ;;  %v2897_v63 = vrot.slane %v5484_v31, 5  ;;  %v7473_v7 = vld [vmem:[%s9125_s1 + $0x6] sm:$0x3]  ;;  %v5488_v10 = vld [vmem:[%s6961_s13 + $0xb0] sm:$0x1] }
  0x9b   : > { %v5571_v4 = vcombine.low %v2884_v38, %v2887_v50  ;;  %v2900_v58 = vrot.slane %v5485_v60, 5  ;;  %v1467_v61 = vsel %vm748_vm0, %v6682_v54, 0  ;;  %v2891_v41 = vsel %vm7213_vm7, %v5555_v48, %v2890_v28  ;;  %v5541_v11 = vld [vmem:[%s6961_s13 + $0xa8] sm:$0xe]  ;;  %v5491_v25 = vld [vmem:[%s6961_s13 + $0xbc] sm:$0x1] }
  0x9c   : > { %v2899_v6 = vrot.slane %v2897_v63, 4  ;;  %v2894_v17 = vsel %vm7213_vm7, %v2892_v51, %v2893_v62  ;;  %v2904_v8 = vrot.slane %v5487_v57, 5  ;;  %v2898_v23 = vsel %vm7213_vm7, %v5556_v12, %v2897_v63  ;;  %v5542_v31 = vld [vmem:[%s6961_s13 + $0xb4] sm:$0xe]  ;;  %v6683_v38 = vld [vmem:[%s6961_s13 + $0x24] sm:$0xf] }
  0x9d   : > { %v2911_v21 = vrot.slane %v5490_v2, 5  ;;  %v7494_v1 = vld [vmem:[%s6961_s13 + $0x28] sm:$0xf]  ;;  %v5572_v60 = vcombine.low %v2891_v41, %v2894_v17  ;;  %v5557_v44 = vrot.slane %v5541_v11, 9  ;;  %v2907_v59 = vrot.slane %v5488_v10, 5 }
  0x9e   : > { %v2901_v18 = vsel %vm7213_vm7, %v2899_v6, %v2900_v58  ;;  %v5304_v28 = vcombine.low %v6683_v38, %v7494_v1  ;;  %v6685_v47 = vld [vmem:[%s6961_s13 + $0x30] sm:$0xf]  ;;  %v2914_v51 = vrot.slane %v5491_v25, 5  ;;  %v5493_v62 = vld [vmem:[%s6961_s13 + $0xc4] sm:$0xf]  ;;  %v2299_v25 = vshrl.u32 %v7421_v40, 16 }
  0x9f   : > { %6156 = vmatmul.mubr.msk.bf16.gmra.mrb[16].mxu0 %vm699_vm3, %v5570_v49  ;;  %v5573_v20 = vcombine.low %v2898_v23, %v2901_v18  ;;  %v5558_v49 = vrot.slane %v5542_v31, 9  ;;  %v2913_v50 = vrot.slane %v2911_v21, 4  ;;  %v2905_v57 = vsel %vm7213_vm7, %v5557_v44, %v2904_v8  ;;  %v5543_v12 = vld [vmem:[%s6961_s13 + $0xc0] sm:$0xe]  ;;  %v6687_v41 = vld [vmem:[%s6961_s13 + $0x3c] sm:$0xf] }
  0xa0   : > { %6004 = vmatmul.mubr.msk.bf16.vlgmr.msra.gmra.mrb[0].mxu1 %vm699_vm3, %v5302_v45  ;;  %6159 = vmatprep.mubr.msk.bf16.mxu0 %vm699_vm3, %v5571_v4  ;;  %v2906_v45 = vrot.slane %v2904_v8, 4  ;;  %v2918_v63 = vrot.slane %v5493_v62, 5  ;;  %v5559_v6 = vrot.slane %v5543_v12, 9  ;;  %v7519_v17 = vld [vmem:[%s6961_s13 + $0x40] sm:$0xf]  ;;  %v5307_v18 = vcombine.low %v7126_v27, %v7129_v36  ;;  %v6639_v62 = vld [vmem:[%s6961_s13 + $0x24] sm:$0xff]  }
  0xa1   : > { %6036 = vmatpush3.bf16.msra.mxu1 %v1467_v61  ;;  %6007 = vmatprep.mubr.msk.bf16.mxu1 %vm699_vm3, %v5303_v26  ;;  %v7499_v26 = vld [vmem:[%s6961_s13 + $0x34] sm:$0xf]  ;;  %v2912_v58 = vsel %vm7213_vm7, %v5558_v49, %v2911_v21  ;;  %v2915_v54 = vsel %vm7213_vm7, %v2913_v50, %v2914_v51  ;;  %v5494_v61 = vld [vmem:[%s6961_s13 + $0xc8] sm:$0x1]  ;;  %v5306_v10 = vcombine.low %v6687_v41, %v7519_v17  ;;  %v2295_v21 = vshll.u32 %v7421_v40, 16 }
  0xa2   : > { %6534 = vmatprep.subr.msk.bf16.mxu1 %vm748_vm0, %v7473_v7  ;;  %v5305_v48 = vcombine.low %v6685_v47, %v7499_v26  ;;  %v2908_v4 = vsel %vm7213_vm7, %v2906_v45, %v2907_v59  ;;  %v5575_v11 = vcombine.low %v2912_v58, %v2915_v54  ;;  %v2920_v8 = vrot.slane %v2918_v63, 4  ;;  %v1205_v45 = vld [vmem:[%s6961_s13] sm:$0xe]  ;;  %v1206_v59 = vld [vmem:[%s6961_s13 + $0xc] sm:$0xe] }
  0xa3   : > { %v5574_v2 = vcombine.low %v2905_v57, %v2908_v4  ;;  %v2921_v23 = vrot.slane %v5494_v61, 5  ;;  %v2919_v31 = vsel %vm7213_vm7, %v5559_v6, %v2918_v63  ;;  %v7534_v27 = vrot.slane %v2295_v21, 5  ;;  %v1209_v41 = vld [vmem:[%s6961_s13 + $0x30] sm:$0xe] }
  0xa4   : > { %v2301_v36 = vrot.slane %v2299_v25, 4  ;;  %v5309_v44 = vcombine.low %v7186_v19, %v7192_v35  ;;  %v2305_v47 = vshll.u32 %v7424_v55, 16  ;;  %v5333_v19 = vrot.slane %v1205_v45, 9 }
  0xa5   : > { %v2922_v38 = vsel %vm7213_vm7, %v2920_v8, %v2921_v23  ;;  %9149 = vst [vmem:[#allocation10_spill] sm:$0xff] %v7534_v27  ;;  %v5334_v35 = vrot.slane %v1206_v59, 9  ;;  %v1272_v4 = vrot.slane %v7458_v9, 5  ;;  %v1279_v12 = vrot.slane %v7494_v1, 5  ;;  %v1210_v8 = vld [vmem:[%s6961_s13 + $0x3c] sm:$0xe] }
  0xa6   : > { %v5576_v40 = vcombine.low %v2919_v31, %v2922_v38  ;;  %v2302_v49 = vor.u32 %v2301_v36, %v7534_v27  ;;  %v7554_v51 = vrot.slane %v2305_v47, 5  ;;  %v5310_v58 = vcombine.low %v7207_v0, %v7220_v29  ;;  %v1211_v31 = vld [vmem:[%s6961_s13 + $0x48] sm:$0xe]  ;;  %v6693_v59 = vld [vmem:[%s6961_s13 + $0x38] sm:$0x1] }
  0xa7   : > { %6160 = vmatmul.mubr.msk.bf16.gmra.mrb[20].mxu0 %vm699_vm3, %v5572_v60  ;;  %v5308_v60 = vcombine.low %v7155_v24, %v7161_v37  ;;  %v6690_v24 = vld [vmem:[%s6961_s13 + $0x14] sm:$0x1]  ;;  %v4107_v54 = vsel %vm748_vm0, %v7278_v22, 0  ;;  %v5311_v61 = vcombine.low %v7239_v53, %v7246_v16  ;;  %v5312_v6 = vcombine.low %v7265_v39, %v7273_v43  ;;  %v6691_v16 = vld [vmem:[%s6961_s13 + $0x20] sm:$0x1] }
  0xa8   : > { %6008 = vmatmul.mubr.msk.bf16.gmra.mrb[4].mxu1 %vm699_vm3, %v5304_v28  ;;  %6163 = vmatprep.mubr.msk.bf16.mxu0 %vm699_vm3, %v5573_v20  ;;  %v1265_v28 = vrot.slane %v7451_v34, 5  ;;  %v6637_v20 = vld [vmem:[%s6961_s13 + $0x18] sm:$0xff]   ;;  %v6689_v34 = vld [vmem:[%s6961_s13 + $0x8] sm:$0x1]  ;;  %v1268_v37 = vrot.slane %v6690_v24, 5  ;;  %9150 = vst [vmem:[#allocation11_spill] sm:$0xff] %v7554_v51  ;;  %v5313_v9 = vcombine.low %v7297_v5, %v7309_v30 }
  0xa9   : > { %6011 = vmatprep.mubr.msk.bf16.mxu1 %vm699_vm3, %v5305_v48  ;;  %v1258_v48 = vrot.slane %v7417_v15, 5  ;;  %v1261_v50 = vrot.slane %v6689_v34, 5  ;;  %v1207_v15 = vld [vmem:[%s6961_s13 + $0x18] sm:$0xe]  ;;  %v7559_v63 = vrot.slane %v2302_v49, 4  ;;  %v1275_v22 = vrot.slane %v6691_v16, 5 }
  0xaa   : > { %v1267_v55 = vrot.slane %v1265_v28, 4  ;;  %v5335_v1 = vrot.slane %v1207_v15, 9  ;;  %v7581_v29 = vsel %vm7213_vm7, %v5334_v35, %v1265_v28  ;;  %v1281_v25 = vrot.slane %v1279_v12, 4  ;;  %v5658_v24 = vld [vmem:[%s6961_s13 + $0x18] sm:$0xf] }
  0xab   : > { %v1260_v57 = vrot.slane %v1258_v48, 4  ;;  %9151 = vst [vmem:[#allocation12_spill] sm:$0xff] %v7559_v63  ;;  %v7577_v0 = vsel %vm7213_vm7, %v5333_v19, %v1258_v48  ;;  %v1289_v47 = vrot.slane %v6693_v59, 5  ;;  %v7618_v49 = vsel %vm748_vm0, %v7473_v7, 0  ;;  %v5659_v7 = vld [vmem:[%s6961_s13 + $0x1c] sm:$0xf] }
  0xac   : > { %v7585_v53 = vsel %vm7213_vm7, %v1267_v55, %v1268_v37  ;;  %v7622_v34 = vsel %vm7213_vm7, %v5335_v1, %v1272_v4  ;;  %v6643_v37 = vld [vmem:[%s6961_s13 + $0x3c] sm:$0xff]   ;;  %v5338_v35 = vrot.slane %v1210_v8, 9  ;;  %v6694_v55 = vld [vmem:[%s6961_s13 + $0x44] sm:$0x1]  ;;  %v3628_v8 = vshll.u32 %v5658_v24, 16 }
  0xad   : > { %v7596_v23 = vsel %vm7213_vm7, %v1260_v57, %v1261_v50  ;;  %v1212_v50 = vld [vmem:[%s6961_s13 + $0x54] sm:$0xe]  ;;  %v1296_v15 = vrot.slane %v6694_v55, 5  ;;  %v5662_v39 = vld [vmem:[%s6961_s13 + $0x28] sm:$0xf] }
  0xae   : > { %v6701_v5 = vld [vmem:[%s6961_s13 + $0x70] sm:$0xf] }
  0xaf   : > { %6164 = vmatmul.mubr.msk.bf16.gmra.mrb[24].mxu0 %vm699_vm3, %v5574_v2  ;;  %v1208_v2 = vld [vmem:[%s6961_s13 + $0x24] sm:$0xe]  ;;  %v1321_v30 = vrot.slane %v6701_v5, 5 }
  0xb0   : > { %6012 = vmatmul.mubr.msk.bf16.gmra.mrb[8].mxu1 %vm699_vm3, %v5306_v10  ;;  %6167 = vmatprep.mubr.msk.bf16.mxu0 %vm699_vm3, %v5575_v11  ;;  %v1286_v10 = vrot.slane %v7499_v26, 5  ;;  %v6641_v11 = vld [vmem:[%s6961_s13 + $0x30] sm:$0xff]   ;;  %v5336_v21 = vrot.slane %v1208_v2, 9 }
  0xb1   : > { %6015 = vmatprep.mubr.msk.bf16.mxu1 %vm699_vm3, %v5307_v18  ;;  %v7592_v26 = vld [vmem:[%s9125_s1 + $0x10] sm:$0x3]  ;;  %v1274_v18 = vrot.slane %v1272_v4, 4  ;;  %v1323_v48 = vrot.slane %v1321_v30, 4 }
  0xb2   : > { %v1288_v45 = vrot.slane %v1286_v10, 4  ;;  %v7629_v19 = vsel %vm7213_vm7, %v5336_v21, %v1279_v12  ;;  %v3638_v21 = vshrl.u32 %v5659_v7, 16 }
  0xb3   : > { %v7638_v4 = vsel %vm7213_vm7, %v1274_v18, %v1275_v22  ;;  %v3625_v22 = vshrl.u32 %v5658_v24, 16  ;;  %v3634_v18 = vshll.u32 %v5659_v7, 16  ;;  %v5661_v24 = vld [vmem:[%s6961_s13 + $0x24] sm:$0xf] }
  0xb4   : > { %v7651_v1 = vsel %vm7213_vm7, %v1288_v45, %v1289_v47 }
  0xb5   : > { %v3627_v43 = vrot.slane %v3625_v22, 4  ;;  %v7693_v7 = vrot.slane %v3634_v18, 5  ;;  %v3652_v22 = vshll.u32 %v5661_v24, 16  ;;  %v3662_v18 = vshrl.u32 %v5662_v39, 16 }
  0xb7   : > { %6168 = vmatmul.mubr.msk.bf16.gmra.mrb[28].mxu0 %vm699_vm3, %v5576_v40  ;;  %v6692_v40 = vld [vmem:[%s6961_s13 + $0x2c] sm:$0x1]  ;;  %v3654_v27 = vrot.slane %v3652_v22, 5 }
  0xb8   : > { %6016 = vmatmul.mubr.msk.bf16.gmra.mrb[12].mxu1 %vm699_vm3, %v5308_v60  ;;  %6173 = vmatprep.mubr.msk.bf16.mxu0 %vm699_vm3, %v6637_v20  ;;  %v1282_v28 = vrot.slane %v6692_v40, 5  ;;  %v1293_v60 = vrot.slane %v7519_v17, 5  ;;  %v6697_v40 = vld [vmem:[%s6961_s13 + $0x50] sm:$0x1]  ;;  %v6702_v17 = vld [vmem:[%s6961_s13 + $0x74] sm:$0x1] }
  0xb9   : > { %6019 = vmatprep.mubr.msk.bf16.mxu1 %vm699_vm3, %v5309_v44  ;;  %v5337_v44 = vrot.slane %v1209_v41, 9  ;;  %v5340_v41 = vrot.slane %v1212_v50, 9  ;;  %v1213_v50 = vld [vmem:[%s6961_s13 + $0x60] sm:$0xe]  ;;  %v5663_v20 = vld [vmem:[%s6961_s13 + $0x2c] sm:$0x1] }
  0xba   : > { %v1295_v12 = vrot.slane %v1293_v60, 4  ;;  %v7664_v45 = vsel %vm7213_vm7, %v5338_v35, %v1293_v60  ;;  %v6698_v35 = vld [vmem:[%s6961_s13 + $0x5c] sm:$0x1] }
  0xbb   : > { %v7647_v2 = vsel %vm7213_vm7, %v5337_v44, %v1286_v10  ;;  %v1310_v55 = vrot.slane %v6698_v35, 5  ;;  %v1214_v35 = vld [vmem:[%s6961_s13 + $0x6c] sm:$0xe] }
  0xbc   : > { %v7668_v59 = vsel %vm7213_vm7, %v1295_v12, %v1296_v15  ;;  %v6699_v15 = vld [vmem:[%s6961_s13 + $0x64] sm:$0xf]  ;;  %v3640_v12 = vrot.slane %v3638_v21, 4  ;;  %v5342_v5 = vrot.slane %v1214_v35, 9 }
  0xbd   : > { %v6649_v21 = vld [vmem:[%s6961_s13 + $0x60] sm:$0xff]  }
  0xbf   : > { %6174 = vmatmul.mubr.msk.bf16.vlgmr.msra.gmra.mrb[0].mxu0 %vm699_vm3, %v6639_v62  ;;  %v6695_v62 = vld [vmem:[%s6961_s13 + $0x4c] sm:$0xf] }
  0xc0   : > { %6020 = vmatmul.mubr.msk.bf16.gmra.mrb[16].mxu1 %vm699_vm3, %v5310_v58  ;;  %6206 = vmatpush3.bf16.msra.mxu0 %v4107_v54  ;;  %v1300_v57 = vrot.slane %v6695_v62, 5  ;;  %v7642_v58 = vsel %vm7213_vm7, %v1281_v25, %v1282_v28  ;;  %v5339_v54 = vrot.slane %v1211_v31, 9  ;;  %v1303_v28 = vrot.slane %v6697_v40, 5 }
  0xc1   : > { %6023 = vmatprep.mubr.msk.bf16.mxu1 %vm699_vm3, %v5311_v61  ;;  %6177 = vmatprep.mubr.msk.bf16.mxu0 %vm699_vm3, %v6641_v11  ;;  %v6645_v61 = vld [vmem:[%s6961_s13 + $0x48] sm:$0xff]   ;;  %v6696_v11 = vld [vmem:[%s6961_s13 + $0x58] sm:$0xf]  ;;  %v1314_v62 = vrot.slane %v6699_v15, 5  ;;  %v5665_v15 = vld [vmem:[%s6961_s13 + $0x34] sm:$0xf] }
  0xc2   : > { %6540 = vmatprep.subr.msk.bf16.mxu0 %vm748_vm0, %v7592_v26  ;;  %v1307_v16 = vrot.slane %v6696_v11, 5  ;;  %v1302_v31 = vrot.slane %v1300_v57, 4  ;;  %v7672_v47 = vsel %vm7213_vm7, %v5339_v54, %v1300_v57  ;;  %v5660_v57 = vld [vmem:[%s6961_s13 + $0x20] sm:$0x1]  ;;  %v5664_v54 = vld [vmem:[%s6961_s13 + $0x30] sm:$0xf] }
  0xc3   : > { %v5341_v11 = vrot.slane %v1213_v50, 9  ;;  %v3676_v50 = vshll.u32 %v5664_v54, 16  ;;  %v3644_v25 = vshll.u32 %v5660_v57, 16  ;;  %v3682_v36 = vshll.u32 %v5665_v15, 16 }
  0xc4   : > { %v7683_v60 = vsel %vm7213_vm7, %v5340_v41, %v1307_v16  ;;  %v7699_v41 = vsel %vm7213_vm7, %v1302_v31, %v1303_v28  ;;  %v1316_v31 = vrot.slane %v1314_v62, 4  ;;  %v3673_v28 = vshrl.u32 %v5664_v54, 16 }
  0xc5   : > { %v7741_v35 = vrot.slane %v3682_v36, 5 }
  0xc7   : > { %6178 = vmatmul.mubr.msk.bf16.gmra.mrb[4].mxu0 %vm699_vm3, %v6643_v37  ;;  %v1309_v37 = vrot.slane %v1307_v16, 4  ;;  %v6700_v16 = vld [vmem:[%s6961_s13 + $0x68] sm:$0x1] }
  0xc8   : > { %6024 = vmatmul.mubr.msk.bf16.gmra.mrb[20].mxu1 %vm699_vm3, %v5312_v6  ;;  %6181 = vmatprep.mubr.msk.bf16.mxu0 %vm699_vm3, %v6645_v61  ;;  %v3630_v6 = vrot.slane %v3628_v8, 5  ;;  %v6647_v61 = vld [vmem:[%s6961_s13 + $0x54] sm:$0xff]   ;;  %v1317_v40 = vrot.slane %v6700_v16, 5  ;;  %v3658_v8 = vshll.u32 %v5662_v39, 16  ;;  %v3641_v16 = vor.u32 %v3640_v12, %v7693_v7 }
  0xc9   : > { %6027 = vmatprep.mubr.msk.bf16.mxu1 %vm699_vm3, %v5313_v9  ;;  %v3649_v9 = vshrl.u32 %v5661_v24, 16  ;;  %v7708_v44 = vsel %vm7213_vm7, %v1309_v37, %v1310_v55  ;;  %v1324_v24 = vrot.slane %v6702_v17, 5  ;;  %v3686_v39 = vshrl.u32 %v5665_v15, 16 }
  0xca   : > { %v3631_v10 = vor.u32 %v3630_v6, %v3627_v43  ;;  %v7714_v37 = vrot.slane %v3658_v8, 5  ;;  %v3664_v55 = vrot.slane %v3662_v18, 4  ;;  %v9152_v43 = vcombine.low %v7318_v52, %v7329_v46  ;;  %v6703_v8 = vld [vmem:[%s6961_s13 + $0x7c] sm:$0xf]  ;;  %v7750_v18 = vld [vmem:[%s6961_s13 + $0x38] sm:$0x1] }
  0xcb   : > { %v3651_v38 = vrot.slane %v3649_v9, 4  ;;  %v7723_v17 = vsel %vm7213_vm7, %v5341_v11, %v1314_v62  ;;  %v7727_v57 = vsel %vm7213_vm7, %v1316_v31, %v1317_v40  ;;  %v3675_v6 = vrot.slane %v3673_v28, 4  ;;  %9154 = vst [vmem:[#allocation13_spill] sm:$0xff] %v7750_v18 }
  0xcc   : > { %v3678_v12 = vrot.slane %v3676_v50, 5  ;;  %v9153_v52 = vcombine.low %v7350_v33, %v7355_v56  ;;  %v3632_v46 = vrot.slane %v3631_v10, 4  ;;  %v3642_v54 = vrot.slane %v3641_v16, 4  ;;  %v6651_v33 = vld [vmem:[%s6961_s13 + $0x6c] sm:$0xff]   ;;  %v1216_v16 = vld [vmem:[%s6961_s13 + $0x84] sm:$0xe] }
  0xcd   : > { %v3668_v62 = vshll.u32 %v5663_v20, 16  ;;  %v7735_v11 = vsel %vm7213_vm7, %v5342_v5, %v1321_v30  ;;  %v7739_v40 = vsel %vm7213_vm7, %v1323_v48, %v1324_v24  ;;  %v3688_v9 = vrot.slane %v3686_v39, 4  ;;  %v6652_v48 = vld [vmem:[%s6961_s13 + $0x78] sm:$0xff]  }
  0xce   : > { %v3655_v10 = vor.u32 %v3654_v27, %v3651_v38  ;;  %v3665_v20 = vor.u32 %v3664_v55, %v7714_v37  ;;  %v1328_v30 = vrot.slane %v6703_v8, 5  ;;  %v3679_v38 = vor.u32 %v3678_v12, %v3675_v6  ;;  %v5667_v5 = vld [vmem:[%s6961_s13 + $0x3c] sm:$0xf] }
  0xcf   : > { %6182 = vmatmul.mubr.msk.bf16.gmra.mrb[8].mxu0 %vm699_vm3, %v6647_v61  ;;  %v3646_v61 = vrot.slane %v3644_v25, 5  ;;  %v1215_v25 = vld [vmem:[%s6961_s13 + $0x78] sm:$0xe]  ;;  %v7766_v50 = vrot.slane %v3668_v62, 5  ;;  %v3689_v39 = vor.u32 %v3688_v9, %v7741_v35  ;;  %v3692_v55 = vshll.u32 %v7750_v18, 16 }
  0xd0   : > { %6028 = vmatmul.mubr.msk.bf16.gmra.mrb[24].mxu1 %vm699_vm3, %v9152_v43  ;;  %6185 = vmatprep.mubr.msk.bf16.mxu0 %vm699_vm3, %v6649_v21  ;;  %v3637_v21 = vsel %vm6987_vm4, %v3632_v46, %v7693_v7  ;;  %v5343_v24 = vrot.slane %v1215_v25, 9  ;;  %v6704_v43 = vld [vmem:[%s6961_s13 + $0x88] sm:$0xf]  ;;  %v7774_v7 = vld [vmem:[%s6961_s13 + $0x40] sm:$0xf]  ;;  %v3656_v12 = vrot.slane %v3655_v10, 4  ;;  %v9156_v62 = vcombine.low %v7370_v14, %v7379_v42 }
  0xd1   : > { %6031 = vmatprep.mubr.msk.bf16.mxu1 %vm699_vm3, %v9153_v52  ;;  %v3647_v31 = vsel %vm6987_vm4, %v3642_v54, %v3646_v61  ;;  %v1335_v6 = vrot.slane %v6704_v43, 5  ;;  %9155 = vst [vmem:[#allocation14_spill] sm:$0xff] %v7774_v7  ;;  %v3666_v52 = vrot.slane %v3665_v20, 4  ;;  %v1330_v46 = vrot.slane %v1328_v30, 4  ;;  %v6705_v54 = vld [vmem:[%s6961_s13 + $0x80] sm:$0x1] }
  0xd2   : > { %v1331_v61 = vrot.slane %v6705_v54, 5  ;;  %v3680_v9 = vrot.slane %v3679_v38, 4  ;;  %v5344_v25 = vrot.slane %v1216_v16, 9  ;;  %v3697_v8 = vshrl.u32 %v5667_v5, 16  ;;  %v6653_v10 = vld [vmem:[%s6961_s13 + $0x84] sm:$0xff]  }
  0xd3   : > { %v3700_v43 = vshll.u32 %v5667_v5, 16  ;;  %v7788_v20 = vcombine.low %v3637_v21, %v3647_v31  ;;  %v7792_v14 = vsel %vm748_vm0, %v7592_v26, 0  ;;  %v3710_v38 = vshrl.u32 %v7774_v7, 16  ;;  %v6654_v21 = vld [vmem:[%s6961_s13 + $0x90] sm:$0xff]   ;;  %v6710_v18 = vld [vmem:[%s6961_s13 + $0xa0] sm:$0xf] }
  0xd4   : > { %v3690_v16 = vrot.slane %v3689_v39, 4  ;;  %v3694_v5 = vrot.slane %v3692_v55, 5  ;;  %v1337_v54 = vrot.slane %v1335_v6, 4  ;;  %v3661_v31 = vsel %vm6987_vm4, %v3656_v12, %v7714_v37 }
  0xd5   : > { %v3671_v26 = vsel %vm6987_vm4, %v3666_v52, %v7766_v50  ;;  %v7807_v39 = vsel %vm7213_vm7, %v5343_v24, %v1328_v30  ;;  %v7811_v55 = vsel %vm7213_vm7, %v1330_v46, %v1331_v61  ;;  %v3685_v37 = vsel %vm6987_vm4, %v3680_v9, %v7741_v35  ;;  %v5673_v30 = vld [vmem:[%s6961_s13 + $0x54] sm:$0xf]  ;;  %v7828_v24 = vld [vmem:[%s6961_s13 + $0x58] sm:$0xf]  ;;  %v7833_v61 = vld [vmem:[%s6961_s13 + $0x90] sm:$0xe] }
  0xd6   : > { %v7824_v12 = vsel %vm7213_vm7, %v5344_v25, %v1335_v6  ;;  %v3699_v50 = vrot.slane %v3697_v8, 4  ;;  %v3702_v52 = vrot.slane %v3700_v43, 5  ;;  %v3712_v46 = vrot.slane %v3710_v38, 4 }
  0xd7   : > { %6186 = vmatmul.mubr.msk.bf16.gmra.mrb[12].mxu0 %vm699_vm3, %v6651_v33  ;;  %v9157_v33 = vcombine.low %v7577_v0, %v7596_v23  ;;  %v6706_v0 = vld [vmem:[%s6961_s13 + $0x8c] sm:$0x1]  ;;  %v3695_v36 = vsel %vm6987_vm4, %v3690_v16, %v3694_v5  ;;  %v3745_v25 = vshrl.u32 %v5673_v30, 16  ;;  %v3748_v8 = vshll.u32 %v5673_v30, 16 }
  0xd8   : > { %6032 = vmatmul.mubr.msk.bf16.gmra.mrb[28].mxu1 %vm699_vm3, %v9156_v62  ;;  %6189 = vmatprep.mubr.msk.bf16.mxu0 %vm699_vm3, %v6652_v48  ;;  %v3706_v48 = vshll.u32 %v7774_v7, 16  ;;  %v1338_v23 = vrot.slane %v6706_v0, 5  ;;  %v5670_v62 = vld [vmem:[%s6961_s13 + $0x48] sm:$0xf]  ;;  %v7817_v0 = vld [vmem:[%s6961_s13 + $0x4c] sm:$0xf]  ;;  %v9159_v38 = vcombine.low %v7581_v29, %v7585_v53  ;;  %v7851_v16 = vcombine.low %v3661_v31, %v3671_v26 }
  0xd9   : > { %6037 = vmatprep.mubr.msk.bf16.mxu1 %vm699_vm3, %v9157_v33  ;;  %v7814_v33 = vld [vmem:[%s6961_s13 + $0x44] sm:$0x1]  ;;  %v3721_v27 = vshrl.u32 %v5670_v62, 16  ;;  %v3724_v15 = vshll.u32 %v5670_v62, 16  ;;  %v3730_v6 = vshll.u32 %v7817_v0, 16  ;;  %v3734_v9 = vshrl.u32 %v7817_v0, 16 }
  0xda   : > { %9158 = vst [vmem:[#allocation15_spill] sm:$0xff] %v7814_v33  ;;  %v7830_v28 = vrot.slane %v3706_v48, 5  ;;  %v7839_v35 = vsel %vm7213_vm7, %v1337_v54, %v1338_v23  ;;  %v3754_v43 = vshll.u32 %v7828_v24, 16  ;;  %v3758_v48 = vshrl.u32 %v7828_v24, 16  ;;  %v5676_v31 = vld [vmem:[%s6961_s13 + $0x60] sm:$0xf] }
  0xdb   : > { %v3716_v5 = vshll.u32 %v7814_v33, 16  ;;  %v5345_v54 = vrot.slane %v7833_v61, 9  ;;  %v9160_v23 = vcombine.low %v7622_v34, %v7638_v4  ;;  %v7862_v29 = vcombine.low %v3685_v37, %v3695_v36  ;;  %v6655_v26 = vld [vmem:[%s6961_s13 + $0x9c] sm:$0xff]   ;;  %v6656_v30 = vld [vmem:[%s6961_s13 + $0xa8] sm:$0xff]  }
  0xdc   : > { %v3703_v53 = vor.u32 %v3702_v52, %v3699_v50  ;;  %v3723_v62 = vrot.slane %v3721_v27, 4  ;;  %v7873_v34 = vrot.slane %v3730_v6, 5  ;;  %v3736_v4 = vrot.slane %v3734_v9, 4  ;;  %v6707_v36 = vld [vmem:[%s9125_s1 + $0x8] sm:$0x3] }
  0xdd   : > { %v3747_v27 = vrot.slane %v3745_v25, 4  ;;  %v3750_v37 = vrot.slane %v3748_v8, 5  ;;  %v7882_v50 = vrot.slane %v3754_v43, 5  ;;  %v3760_v52 = vrot.slane %v3758_v48, 4  ;;  %v6708_v6 = vld [vmem:[%s6961_s13 + $0x94] sm:$0xf] }
  0xde   : > { %v7888_v9 = vld [vmem:[%s6961_s13 + $0x64] sm:$0xf]  ;;  %v3769_v61 = vshrl.u32 %v5676_v31, 16  ;;  %v7890_v22 = vrot.slane %v3703_v53, 4  ;;  %v1349_v25 = vrot.slane %v6710_v18, 5  ;;  %v3737_v43 = vor.u32 %v3736_v4, %v7873_v34 }
  0xdf   : > { %6190 = vmatmul.mubr.msk.bf16.gmra.mrb[16].mxu0 %vm699_vm3, %v6653_v10  ;;  %9161 = vst [vmem:[#allocation16_spill] sm:$0xff] %v7888_v9  ;;  %v3772_v10 = vshll.u32 %v5676_v31, 16  ;;  %v3751_v31 = vor.u32 %v3750_v37, %v3747_v27  ;;  %v3761_v53 = vor.u32 %v3760_v52, %v7882_v50  ;;  %v9162_v18 = vcombine.low %v7629_v19, %v7642_v58  ;;  %v6657_v37 = vld [vmem:[%s6961_s13 + $0xb4] sm:$0xff]  }
  0xe0   : > { %6038 = vmatmul.mubr.msk.bf16.vlgmr.msra.gmra.mrb[0].mxu1 %vm699_vm3, %v9159_v38  ;;  %6193 = vmatprep.mubr.msk.bf16.mxu0 %vm699_vm3, %v6654_v21  ;;  %v3726_v21 = vrot.slane %v3724_v15, 5  ;;  %v7871_v38 = vld [vmem:[%s6961_s13 + $0x50] sm:$0x1]  ;;  %v7880_v15 = vld [vmem:[%s6961_s13 + $0x5c] sm:$0x1]  ;;  %v9163_v27 = vcombine.low %v7647_v2, %v7651_v1  ;;  %v1351_v52 = vrot.slane %v1349_v25, 4 }
  0xe1   : > { %6070 = vmatpush3.bf16.msra.mxu1 %v7618_v49  ;;  %6041 = vmatprep.mubr.msk.bf16.mxu1 %vm699_vm3, %v9160_v23  ;;  %v3713_v49 = vor.u32 %v3712_v46, %v7830_v28  ;;  %v7884_v46 = vrot.slane %v3716_v5, 5  ;;  %v1342_v23 = vrot.slane %v6708_v6, 5  ;;  %v3740_v48 = vshll.u32 %v7871_v38, 16  ;;  %v1218_v5 = vld [vmem:[%s6961_s13 + $0x9c] sm:$0xe] }
  0xe2   : > { %6536 = vmatprep.subr.msk.bf16.mxu1 %vm748_vm0, %v6707_v36  ;;  %v6709_v36 = vld [vmem:[%s6961_s13 + $0x98] sm:$0x1]  ;;  %v3727_v7 = vor.u32 %v3726_v21, %v3723_v62  ;;  %v3764_v6 = vshll.u32 %v7880_v15, 16  ;;  %v3782_v62 = vshrl.u32 %v7888_v9, 16  ;;  %v3774_v4 = vrot.slane %v3772_v10, 5 }
  0xe3   : > { %v1345_v33 = vrot.slane %v6709_v36, 5  ;;  %v3714_v8 = vrot.slane %v3713_v49, 4  ;;  %v3778_v36 = vshll.u32 %v7888_v9, 16  ;;  %v7909_v21 = vsel %vm7213_vm7, %v5345_v54, %v1342_v23  ;;  %v7920_v2 = vld [vmem:[%s6961_s13 + $0x68] sm:$0x1] }
  0xe4   : > { %v3771_v49 = vrot.slane %v3769_v61, 4  ;;  %v3728_v19 = vrot.slane %v3727_v7, 4  ;;  %v5346_v58 = vrot.slane %v1218_v5, 9  ;;  %v3738_v3 = vrot.slane %v3737_v43, 4  ;;  %9164 = vst [vmem:[#allocation17_spill] sm:$0xff] %v7920_v2  ;;  %v6658_v5 = vld [vmem:[%s6961_s13 + $0xc0] sm:$0xff]  }
  0xe5   : > { %v3742_v54 = vrot.slane %v3740_v48, 5  ;;  %v3766_v63 = vrot.slane %v3764_v6, 5  ;;  %v1356_v61 = vrot.slane %v7355_v56, 5  ;;  %v3752_v10 = vrot.slane %v3751_v31, 4  ;;  %v1220_v31 = vld [vmem:[%s6961_s13 + $0xb4] sm:$0xe] }
  0xe6   : > { %v3762_v51 = vrot.slane %v3761_v53, 4  ;;  %v7922_v1 = vrot.slane %v3778_v36, 5  ;;  %v3784_v7 = vrot.slane %v3782_v62, 4  ;;  %v3709_v43 = vsel %vm6987_vm4, %v7890_v22, %v7830_v28  ;;  %v6712_v62 = vld [vmem:[%s6961_s13 + $0xb0] sm:$0x1] }
  0xe7   : > { %6194 = vmatmul.mubr.msk.bf16.gmra.mrb[20].mxu0 %vm699_vm3, %v6655_v26  ;;  %v1344_v26 = vrot.slane %v1342_v23, 4  ;;  %v1219_v23 = vld [vmem:[%s6961_s13 + $0xa8] sm:$0xe]  ;;  %v3719_v48 = vsel %vm6987_vm4, %v3714_v8, %v7884_v46  ;;  %v3775_v6 = vor.u32 %v3774_v4, %v3771_v49  ;;  %v3733_v53 = vsel %vm6987_vm4, %v3728_v19, %v7873_v34  ;;  %v5679_v46 = vld [vmem:[%s6961_s13 + $0x6c] sm:$0xf] }
  0xe8   : > { %6042 = vmatmul.mubr.msk.bf16.gmra.mrb[4].mxu1 %vm699_vm3, %v9162_v18  ;;  %6197 = vmatprep.mubr.msk.bf16.mxu0 %vm699_vm3, %v6656_v30  ;;  %v6711_v18 = vld [vmem:[%s6961_s13 + $0xa4] sm:$0x1]  ;;  %v7942_v36 = vsel %vm7213_vm7, %v5346_v58, %v1349_v25  ;;  %v5347_v28 = vrot.slane %v1219_v23, 9  ;;  %v1358_v8 = vrot.slane %v1356_v61, 4  ;;  %v3788_v49 = vshll.u32 %v7920_v2, 16 }
  0xe9   : > { %6045 = vmatprep.mubr.msk.bf16.mxu1 %vm699_vm3, %v9163_v27  ;;  %v1352_v30 = vrot.slane %v6711_v18, 5  ;;  %v7934_v56 = vsel %vm7213_vm7, %v1344_v26, %v1345_v33  ;;  %v3743_v33 = vsel %vm6987_vm4, %v3738_v3, %v3742_v54  ;;  %v1359_v26 = vrot.slane %v6712_v62, 5  ;;  %v5682_v18 = vld [vmem:[%s6961_s13 + $0x78] sm:$0xf]  ;;  %v7997_v54 = vld [vmem:[%s6961_s13 + $0xbc] sm:$0x1] }
  0xea   : > { %v3757_v34 = vsel %vm6987_vm4, %v3752_v10, %v7882_v50  ;;  %v3767_v25 = vsel %vm6987_vm4, %v3762_v51, %v3766_v63  ;;  %v3785_v4 = vor.u32 %v3784_v7, %v7922_v1  ;;  %v5348_v27 = vrot.slane %v1220_v31, 9  ;;  %v7971_v51 = vld [vmem:[%s6961_s13 + $0x70] sm:$0xf]  ;;  %v8001_v10 = vld [vmem:[%s6961_s13 + $0x7c] sm:$0xf] }
  0xeb   : > { %v7946_v22 = vsel %vm7213_vm7, %v1351_v52, %v1352_v30  ;;  %v9166_v3 = vcombine.low %v7664_v45, %v7668_v59  ;;  %v7967_v19 = vrot.slane %v3775_v6, 4  ;;  %v1363_v50 = vrot.slane %v7379_v42, 5  ;;  %9167 = vst [vmem:[#allocation19_spill] sm:$0xff] %v7971_v51  ;;  %9169 = vst [vmem:[#allocation20_spill] sm:$0xff] %v8001_v10  ;;  %v5685_v7 = vld [vmem:[%s6961_s13 + $0x84] sm:$0xf] }
  0xec   : > { %9165 = vst [vmem:[#allocation18_spill] sm:$0xff] %v7946_v22  ;;  %v3793_v63 = vshrl.u32 %v5679_v46, 16  ;;  %v9168_v45 = vcombine.low %v7672_v47, %v7699_v41  ;;  %v7979_v58 = vcombine.low %v3733_v53, %v3743_v33  ;;  %v7985_v42 = vsel %vm7213_vm7, %v5347_v28, %v1356_v61  ;;  %v6659_v61 = vld [vmem:[%s6961_s13 + $0xcc] sm:$0xff]   ;;  %v8013_v31 = vld [vmem:[%s6961_s13 + $0x88] sm:$0xf] }
  0xed   : > { %v7988_v30 = vcombine.low %v3757_v34, %v3767_v25  ;;  %v7992_v47 = vsel %vm7213_vm7, %v1358_v8, %v1359_v26  ;;  %v7994_v41 = vrot.slane %v3788_v49, 5  ;;  %v3802_v6 = vshll.u32 %v7971_v51, 16  ;;  %9170 = vst [vmem:[#allocation21_spill] sm:$0xff] %v8013_v31  ;;  %v5688_v62 = vld [vmem:[%s6961_s13 + $0x90] sm:$0xf] }
  0xee   : > { %v8019_v28 = vrot.slane %v1363_v50, 4  ;;  %v8021_v33 = vrot.slane %v3793_v63, 4  ;;  %v3806_v8 = vshrl.u32 %v7971_v51, 16  ;;  %v3817_v26 = vshrl.u32 %v5682_v18, 16  ;;  %v8028_v25 = vld [vmem:[%s6961_s13 + $0x94] sm:$0xf] }
  0xef   : > { %6198 = vmatmul.mubr.msk.bf16.gmra.mrb[24].mxu0 %vm699_vm3, %v6657_v37  ;;  %v7965_v37 = vcombine.low %v3709_v43, %v3719_v48  ;;  %v8009_v43 = vsel %vm7213_vm7, %v5348_v27, %v1363_v50  ;;  %v3796_v48 = vshll.u32 %v5679_v46, 16  ;;  %v3820_v49 = vshll.u32 %v5682_v18, 16  ;;  %9171 = vst [vmem:[#allocation22_spill] sm:$0xff] %v8028_v25  ;;  %v8066_v2 = vld [vmem:[%s6961_s13 + $0x8c] sm:$0x1] }
  0xf0   : > { %6046 = vmatmul.mubr.msk.bf16.gmra.mrb[8].mxu1 %vm699_vm3, %v9166_v3  ;;  %6201 = vmatprep.mubr.msk.bf16.mxu0 %vm699_vm3, %v6658_v5  ;;  %v8005_v5 = vrot.slane %v3785_v4, 4  ;;  %v3826_v46 = vshll.u32 %v8001_v10, 16  ;;  %v3830_v34 = vshrl.u32 %v8001_v10, 16  ;;  %v3841_v4 = vshrl.u32 %v5685_v7, 16 }
  0xf1   : > { %6049 = vmatprep.mubr.msk.bf16.mxu1 %vm699_vm3, %v9168_v45  ;;  %v3844_v27 = vshll.u32 %v5685_v7, 16  ;;  %v3850_v3 = vshll.u32 %v8013_v31, 16  ;;  %v3854_v50 = vshrl.u32 %v8013_v31, 16  ;;  %v8038_v45 = vld [vmem:[%s6961_s13 + $0x74] sm:$0x1]  ;;  %v3798_v18 = vrot.slane %v3796_v48, 5 }
  0xf2   : > { %v3865_v52 = vshrl.u32 %v5688_v62, 16  ;;  %v3868_v53 = vshll.u32 %v5688_v62, 16  ;;  %v9172_v7 = vcombine.low %v7683_v60, %v7708_v44  ;;  %v3808_v59 = vrot.slane %v3806_v8, 4  ;;  %v5691_v48 = vld [vmem:[%s6961_s13 + $0x9c] sm:$0xf] }
  0xf3   : > { %v3874_v63 = vshll.u32 %v8028_v25, 16  ;;  %v3878_v23 = vshrl.u32 %v8028_v25, 16  ;;  %v9173_v62 = vcombine.low %v7723_v17, %v7727_v57  ;;  %v8056_v44 = vld [vmem:[%s6961_s13 + $0x80] sm:$0x1]  ;;  %v3819_v60 = vrot.slane %v3817_v26, 4 }
  0xf4   : > { %9174 = vst [vmem:[#allocation23_spill] sm:$0xff] %v8056_v44  ;;  %v3843_v31 = vrot.slane %v3841_v4, 4  ;;  %v3846_v8 = vrot.slane %v3844_v27, 5  ;;  %v8060_v10 = vrot.slane %v3850_v3, 5  ;;  %v3856_v51 = vrot.slane %v3854_v50, 4 }
  0xf5   : > { %v8063_v25 = vld [vmem:[%s6961_s13 + $0xa0] sm:$0xf]  ;;  %v3867_v17 = vrot.slane %v3865_v52, 4  ;;  %v3870_v57 = vrot.slane %v3868_v53, 5  ;;  %v3892_v9 = vshll.u32 %v5691_v48, 16  ;;  %v3799_v26 = vor.u32 %v3798_v18, %v8021_v33 }
  0xf6   : > { %v3836_v27 = vshll.u32 %v8056_v44, 16  ;;  %v8075_v3 = vld [vmem:[%s6961_s13 + $0x98] sm:$0x1]  ;;  %v3898_v50 = vshll.u32 %v8063_v25, 16  ;;  %v3902_v52 = vshrl.u32 %v8063_v25, 16  ;;  %v3847_v22 = vor.u32 %v3846_v8, %v3843_v31 }
  0xf7   : > { %6202 = vmatmul.mubr.msk.bf16.gmra.mrb[28].mxu0 %vm699_vm3, %v6659_v61  ;;  %v8046_v61 = vrot.slane %v3802_v6, 5  ;;  %v3832_v6 = vrot.slane %v3830_v34, 4  ;;  %v3880_v34 = vrot.slane %v3878_v23, 4  ;;  %v3860_v33 = vshll.u32 %v8066_v2, 16 }
  0xf8   : > { %6050 = vmatmul.mubr.msk.bf16.gmra.mrb[12].mxu1 %vm699_vm3, %v9172_v7  ;;  %6207 = vmatprep.mubr.msk.bf16.mxu0 %vm699_vm3, %v7788_v20  ;;  %v3822_v7 = vrot.slane %v3820_v49, 5  ;;  %v8058_v20 = vrot.slane %v3826_v46, 5  ;;  %v3812_v49 = vshll.u32 %v8038_v45, 16  ;;  %v8070_v46 = vrot.slane %v3874_v63, 5 }
  0xf9   : > { %6053 = vmatprep.mubr.msk.bf16.mxu1 %vm699_vm3, %v9173_v62  ;;  %v3889_v62 = vshrl.u32 %v5691_v48, 16  ;;  %v3809_v4 = vor.u32 %v3808_v59, %v8046_v61  ;;  %v3857_v23 = vor.u32 %v3856_v51, %v8060_v10  ;;  %v3871_v59 = vor.u32 %v3870_v57, %v3867_v17  ;;  %v8108_v57 = vld [vmem:[%s6961_s13 + $0xa4] sm:$0x1] }
  0xfa   : > { %v3823_v53 = vor.u32 %v3822_v7, %v3819_v60  ;;  %v3833_v48 = vor.u32 %v3832_v6, %v8058_v20  ;;  %v3894_v18 = vrot.slane %v3892_v9, 5  ;;  %v9175_v44 = vcombine.low %v7735_v11, %v7739_v40 }
  0xfb   : > { %v3891_v63 = vrot.slane %v3889_v62, 4  ;;  %v9176_v31 = vrot.slane %v7997_v54, 5  ;;  %v3814_v51 = vrot.slane %v3812_v49, 5  ;;  %v3881_v60 = vor.u32 %v3880_v34, %v8070_v46  ;;  %v8111_v34 = vld [vmem:[%s6961_s13 + $0xac] sm:$0xf] }
  0xfc   : > { %v3884_v9 = vshll.u32 %v8075_v3, 16  ;;  %v9177_v11 = vcombine.low %v7807_v39, %v7811_v55  ;;  %v3800_v40 = vrot.slane %v3799_v26, 4  ;;  %v8104_v54 = vrot.slane %v3898_v50, 5 }
  0xfd   : > { %v3824_v7 = vrot.slane %v3823_v53, 4  ;;  %v3834_v6 = vrot.slane %v3833_v48, 4  ;;  %v3838_v8 = vrot.slane %v3836_v27, 5  ;;  %v3862_v17 = vrot.slane %v3860_v33, 5  ;;  %v8121_v48 = vld [vmem:[%s6961_s13 + $0xb0] sm:$0x1] }
  0xfe   : > { %v3848_v39 = vrot.slane %v3847_v22, 4  ;;  %v3858_v55 = vrot.slane %v3857_v23, 4  ;;  %v3872_v62 = vrot.slane %v3871_v59, 4  ;;  %v3895_v49 = vor.u32 %v3894_v18, %v3891_v63 }
  0xff   : > { %6208 = vmatmul.mubr.msk.bf16.vlgmr.msra.gmra.mrb[0].mxu0 %vm699_vm3, %v7851_v16  ;;  %v8094_v16 = vsel %vm7213_vm7, %v8019_v28, %v9176_v31  ;;  %v3904_v28 = vrot.slane %v3902_v52, 4  ;;  %v3886_v26 = vrot.slane %v3884_v9, 5  ;;  %v3805_v52 = vsel %vm6987_vm4, %v3800_v40, %v8046_v61 }
 0x100   : > { %6054 = vmatmul.mubr.msk.bf16.gmra.mrb[16].mxu1 %vm699_vm3, %v9175_v44  ;;  %6240 = vmatpush3.bf16.msra.mxu0 %v7792_v14  ;;  %v3810_v14 = vrot.slane %v3809_v4, 4  ;;  %v5694_v44 = vld [vmem:[%s6961_s13 + $0xa8] sm:$0xf]  ;;  %v3908_v22 = vshll.u32 %v8108_v57, 16  ;;  %v3829_v33 = vsel %vm6987_vm4, %v3824_v7, %v8058_v20  ;;  %v3839_v23 = vsel %vm6987_vm4, %v3834_v6, %v3838_v8 }
 0x101   : > { %6057 = vmatprep.mubr.msk.bf16.mxu1 %vm699_vm3, %v9177_v11  ;;  %6211 = vmatprep.mubr.msk.bf16.mxu0 %vm699_vm3, %v7862_v29  ;;  %v3882_v29 = vrot.slane %v3881_v60, 4  ;;  %v3913_v4 = vshrl.u32 %v5694_v44, 16  ;;  %v3916_v50 = vshll.u32 %v5694_v44, 16  ;;  %v3905_v53 = vor.u32 %v3904_v28, %v8104_v54  ;;  %v5743_v11 = vld [vmem:[%s6961_s13 + $0x48] sm:$0xe] }
 0x102   : > { %v3815_v27 = vsel %vm6987_vm4, %v3810_v14, %v3814_v51  ;;  %v3922_v59 = vshll.u32 %v8111_v34, 16  ;;  %v3926_v61 = vshrl.u32 %v8111_v34, 16  ;;  %v3853_v63 = vsel %vm6987_vm4, %v3848_v39, %v8060_v10  ;;  %v8186_v39 = vld [vmem:[%s6961_s13 + $0xb8] sm:$0xf] }
 0x103   : > { %v3863_v18 = vsel %vm6987_vm4, %v3858_v55, %v3862_v17  ;;  %v3877_v20 = vsel %vm6987_vm4, %v3872_v62, %v8070_v46  ;;  %v3896_v31 = vrot.slane %v3895_v49, 4  ;;  %v9178_v51 = vcombine.low %v7824_v12, %v7839_v35 }
 0x104   : > { %v3915_v10 = vrot.slane %v3913_v4, 4  ;;  %v3918_v60 = vrot.slane %v3916_v50, 5  ;;  %v3932_v9 = vshll.u32 %v8121_v48, 16  ;;  %v9179_v46 = vcombine.low %v7909_v21, %v7934_v56  ;;  %v5697_v21 = vld [vmem:[%s6961_s13 + $0xb4] sm:$0xf] }
 0x105   : > { %v5364_v12 = vcombine.low %v7985_v42, %v7992_v47  ;;  %v9180_v35 = vsel %vm6987_vm4, %v8005_v5, %v7994_v41  ;;  %v3906_v14 = vrot.slane %v3905_v53, 4  ;;  %v3910_v28 = vrot.slane %v3908_v22, 5  ;;  %v5745_v4 = vld [vmem:[%s6961_s13 + $0x60] sm:$0xe]  ;;  %v5746_v53 = vld [vmem:[%s6961_s13 + $0x6c] sm:$0xe] }
 0x106   : > { %v5365_v56 = vcombine.low %v8009_v43, %v8094_v16  ;;  %v8169_v44 = vcombine.low %v3805_v52, %v3815_v27  ;;  %v8171_v42 = vrot.slane %v3922_v59, 5  ;;  %v3928_v47 = vrot.slane %v3926_v61, 4  ;;  %v9189_v16 = vld [vmem:[#allocation11_spill] sm:$0xff] }
 0x107   : > { %6212 = vmatmul.mubr.msk.bf16.gmra.mrb[4].mxu0 %vm699_vm3, %v7965_v37  ;;  %v3887_v37 = vsel %vm6987_vm4, %v3882_v29, %v3886_v26  ;;  %v8173_v41 = vcombine.low %v3829_v33, %v3839_v23  ;;  %v8175_v5 = vcombine.low %v3853_v63, %v3863_v18  ;;  %v3901_v6 = vsel %vm6987_vm4, %v3896_v31, %v8104_v54  ;;  %v9182_v23 = vld [vmem:[#allocation18_spill] sm:$0xff]  ;;  %v9184_v18 = vld [vmem:[#allocation16_spill] sm:$0xff]  ;;  %v9185_v31 = vld [vmem:[#allocation17_spill] sm:$0xff] }
 0x108   : > { %6058 = vmatmul.mubr.msk.bf16.gmra.mrb[20].mxu1 %vm699_vm3, %v9178_v51  ;;  %6215 = vmatprep.mubr.msk.bf16.mxu0 %vm699_vm3, %v7979_v58  ;;  %v9181_v58 = vsel %vm6987_vm4, %v7967_v19, %v7922_v1  ;;  %v8177_v7 = vcombine.low %v3877_v20, %v3887_v37  ;;  %v5759_v1 = vrot.slane %v5743_v11, 9  ;;  %v5744_v19 = vld [vmem:[%s6961_s13 + $0x54] sm:$0xe]  ;;  %v3919_v8 = vor.u32 %v3918_v60, %v3915_v10  ;;  %v5700_v63 = vld [vmem:[%s6961_s13 + $0xc0] sm:$0xf] }
 0x109   : > { %6061 = vmatprep.mubr.msk.bf16.mxu1 %vm699_vm3, %v9179_v46  ;;  %v5713_v40 = vcombine.low %v9181_v58, %v9180_v35  ;;  %v8183_v17 = vrot.slane %v3932_v9, 5  ;;  %v3937_v55 = vshrl.u32 %v5697_v21, 16  ;;  %v3911_v62 = vsel %vm6987_vm4, %v3906_v14, %v3910_v28  ;;  %v9186_v9 = vld [vmem:[#allocation19_spill] sm:$0xff]  ;;  %v8235_v35 = vld [vmem:[%s6961_s13 + $0xbc] sm:$0x1] }
 0x10a   : > { %v3940_v49 = vshll.u32 %v5697_v21, 16  ;;  %v4396_v29 = vrot.slane %v7817_v0, 5  ;;  %v4399_v26 = vrot.slane %v7871_v38, 5  ;;  %v3929_v50 = vor.u32 %v3928_v47, %v8171_v42  ;;  %v8238_v58 = vld [vmem:[%s6961_s13 + $0xc4] sm:$0xf] }
 0x10b   : > { %v5760_v52 = vrot.slane %v5744_v19, 9  ;;  %v4403_v54 = vrot.slane %v7828_v24, 5  ;;  %v4406_v27 = vrot.slane %v7880_v15, 5  ;;  %v3946_v22 = vshll.u32 %v8186_v39, 16  ;;  %v5747_v19 = vld [vmem:[%s6961_s13 + $0x78] sm:$0xe] }
 0x10c   : > { %v3950_v33 = vshrl.u32 %v8186_v39, 16  ;;  %v8203_v0 = vsel %vm7213_vm7, %v5759_v1, %v4396_v29  ;;  %v4398_v38 = vrot.slane %v4396_v29, 4  ;;  %v9183_v59 = vcombine.low %v7942_v36, %v9182_v23  ;;  %v9187_v23 = vld [vmem:[#allocation20_spill] sm:$0xff] }
 0x10d   : > { %v8210_v24 = vcombine.low %v3901_v6, %v3911_v62  ;;  %v8214_v15 = vsel %vm7213_vm7, %v5760_v52, %v4403_v54  ;;  %v5761_v61 = vrot.slane %v5745_v4, 9  ;;  %v4410_v20 = vrot.slane %v9184_v18, 5  ;;  %v6660_v6 = vld [vmem:[%s6961_s13 + $0xc] sm:$0xff]  }
 0x10e   : > { %v8220_v36 = vsel %vm7213_vm7, %v4398_v38, %v4399_v26  ;;  %v4413_v51 = vrot.slane %v9185_v31, 5  ;;  %v5762_v37 = vrot.slane %v5746_v53, 9  ;;  %v4417_v11 = vrot.slane %v9186_v9, 5 }
 0x10f   : > { %6216 = vmatmul.mubr.msk.bf16.gmra.mrb[8].mxu0 %vm699_vm3, %v7988_v30  ;;  %v4405_v30 = vrot.slane %v4403_v54, 4  ;;  %v5776_v10 = vcombine.low %v8203_v0, %v8220_v36  ;;  %v4420_v46 = vrot.slane %v8038_v45, 5  ;;  %v8244_v14 = vsel %vm7213_vm7, %v5761_v61, %v4410_v20 }
 0x110   : > { %6062 = vmatmul.mubr.msk.bf16.gmra.mrb[24].mxu1 %vm699_vm3, %v9183_v59  ;;  %6219 = vmatprep.mubr.msk.bf16.mxu0 %vm699_vm3, %v5713_v40  ;;  %v4412_v28 = vrot.slane %v4410_v20, 4  ;;  %v8246_v21 = vrot.slane %v3937_v55, 4  ;;  %v3961_v47 = vshrl.u32 %v5700_v63, 16  ;;  %v8250_v45 = vsel %vm7213_vm7, %v5762_v37, %v4417_v11  ;;  %v5474_v55 = vld [vmem:[%s6961_s13 + $0x78] sm:$0xf]  ;;  %v9188_v59 = vld [vmem:[#allocation23_spill] sm:$0xff] }
 0x111   : > { %6065 = vmatprep.mubr.msk.bf16.mxu1 %vm699_vm3, %v5364_v12  ;;  %v8228_v60 = vsel %vm7213_vm7, %v4405_v30, %v4406_v27  ;;  %v8232_v12 = vrot.slane %v3919_v8, 4  ;;  %v4419_v1 = vrot.slane %v4417_v11, 4  ;;  %v8254_v8 = vrot.slane %v3929_v50, 4 }
 0x112   : > { %v5777_v40 = vcombine.low %v8214_v15, %v8228_v60  ;;  %v8256_v62 = vrot.slane %v3940_v49, 5  ;;  %v3964_v29 = vshll.u32 %v5700_v63, 16  ;;  %v8260_v26 = vsel %vm7213_vm7, %v4412_v28, %v4413_v51  ;;  %v9191_v28 = vld [vmem:[#allocation21_spill] sm:$0xff]  ;;  %v6723_v60 = vld [vmem:[%s6961_s13 + $0xa0] sm:$0xf] }
 0x113   : > { %v8263_v4 = vrot.slane %v3946_v22, 5  ;;  %v8265_v52 = vrot.slane %v3950_v33, 4  ;;  %v5778_v54 = vcombine.low %v8244_v14, %v8260_v26  ;;  %v8271_v27 = vsel %vm7213_vm7, %v4419_v1, %v4420_v46  ;;  %v5748_v33 = vld [vmem:[%s6961_s13 + $0x84] sm:$0xe]  ;;  %v6661_v1 = vld [vmem:[%s6961_s13 + $0x18] sm:$0xff]  }
 0x114   : > { %v3956_v49 = vshll.u32 %v8235_v35, 16  ;;  %v3970_v50 = vshll.u32 %v8238_v58, 16  ;;  %v5779_v53 = vcombine.low %v8250_v45, %v8271_v27  ;;  %v5763_v22 = vrot.slane %v5747_v19, 9  ;;  %v6727_v27 = vld [vmem:[%s6961_s13 + $0xac] sm:$0xf] }
 0x115   : > { %v3963_v38 = vrot.slane %v3961_v47, 4  ;;  %v4427_v30 = vrot.slane %v9188_v59, 5  ;;  %v2286_v61 = vshrl.u32 %v5474_v55, 16  ;;  %v3966_v63 = vrot.slane %v3964_v29, 5  ;;  %v5703_v29 = vld [vmem:[%s6961_s13 + $0xcc] sm:$0xf] }
 0x116   : > { %v3974_v18 = vshrl.u32 %v8238_v58, 16  ;;  %v2289_v43 = vshll.u32 %v5474_v55, 16  ;;  %v5764_v37 = vrot.slane %v5748_v33, 9  ;;  %v3925_v9 = vsel %vm6987_vm4, %v8232_v12, %v8171_v42  ;;  %v8314_v55 = vld [vmem:[%s6961_s13 + $0xd0] sm:$0xf] }
 0x117   : > { %6220 = vmatmul.mubr.msk.bf16.gmra.mrb[12].mxu0 %vm699_vm3, %v8169_v44  ;;  %v4424_v44 = vrot.slane %v9187_v23, 5  ;;  %v2288_v51 = vrot.slane %v2286_v61, 4  ;;  %v3943_v11 = vor.u32 %v8256_v62, %v8246_v21  ;;  %v4431_v47 = vrot.slane %v9191_v28, 5  ;;  %v6662_v21 = vld [vmem:[%s6961_s13 + $0x24] sm:$0xff]  }
 0x118   : > { %6066 = vmatmul.mubr.msk.bf16.gmra.mrb[28].mxu1 %vm699_vm3, %v5365_v56  ;;  %6223 = vmatprep.mubr.msk.bf16.mxu0 %vm699_vm3, %v8173_v41  ;;  %v9190_v56 = vld [vmem:[#allocation12_spill] sm:$0xff]  ;;  %v2291_v46 = vrot.slane %v2289_v43, 5  ;;  %v3935_v19 = vsel %vm6987_vm4, %v8254_v8, %v8183_v17  ;;  %v4434_v12 = vrot.slane %v8066_v2, 5  ;;  %v8322_v62 = vrot.slane %v3970_v50, 5 }
 0x119   : > { %6071 = vmatprep.mubr.msk.bf16.mxu1 %vm699_vm3, %v6660_v6  ;;  %v2308_v41 = vsel %vm6987_vm4, %v9190_v56, %v9189_v16  ;;  %v8296_v20 = vsel %vm7213_vm7, %v5763_v22, %v4424_v44  ;;  %v4426_v31 = vrot.slane %v4424_v44, 4  ;;  %v3953_v6 = vor.u32 %v8265_v52, %v8263_v4  ;;  %v5749_v8 = vld [vmem:[%s6961_s13 + $0x90] sm:$0xe]  ;;  %v8328_v52 = vld [vmem:[%s6961_s13 + $0xc8] sm:$0x1]  ;;  %v9193_v16 = vld [vmem:[#allocation9_spill] sm:$0xff] }
 0x11a   : > { %v3976_v22 = vrot.slane %v3974_v18, 4  ;;  %v2292_v17 = vor.u32 %v2291_v46, %v2288_v51  ;;  %v3958_v23 = vrot.slane %v3956_v49, 5  ;;  %v3967_v44 = vor.u32 %v3966_v63, %v3963_v38  ;;  %v9194_v51 = vld [vmem:[#allocation10_spill] sm:$0xff] }
 0x11b   : > { %v8318_v42 = vsel %vm7213_vm7, %v4426_v31, %v4427_v30  ;;  %v8332_v59 = vsel %vm7213_vm7, %v5764_v37, %v4431_v47  ;;  %v4433_v30 = vrot.slane %v4431_v47, 4  ;;  %v3985_v2 = vshrl.u32 %v5703_v29, 16 }
 0x11c   : > { %v5780_v33 = vcombine.low %v8296_v20, %v8318_v42  ;;  %v3988_v50 = vshll.u32 %v5703_v29, 16  ;;  %v3994_v61 = vshll.u32 %v8314_v55, 16  ;;  %v2293_v18 = vrot.slane %v2292_v17, 4  ;;  %v6663_v29 = vld [vmem:[%s6961_s13 + $0x30] sm:$0xff]  }
 0x11d   : > { %v3998_v49 = vshrl.u32 %v8314_v55, 16  ;;  %v8343_v38 = vsel %vm7213_vm7, %v4433_v30, %v4434_v12  ;;  %v5765_v63 = vrot.slane %v5749_v8, 9  ;;  %v3977_v56 = vor.u32 %v3976_v22, %v8322_v62 }
 0x11e   : > { %v3980_v31 = vshll.u32 %v8328_v52, 16  ;;  %v5781_v37 = vcombine.low %v8332_v59, %v8343_v38  ;;  %v5719_v46 = vcombine.low %v3925_v9, %v3935_v19  ;;  %v3944_v28 = vrot.slane %v3943_v11, 4  ;;  %v5750_v11 = vld [vmem:[%s6961_s13 + $0x9c] sm:$0xe] }
 0x11f   : > { %6224 = vmatmul.mubr.msk.bf16.gmra.mrb[16].mxu0 %vm699_vm3, %v8175_v5  ;;  %v9192_v5 = vld [vmem:[#allocation22_spill] sm:$0xff]  ;;  %v3954_v47 = vrot.slane %v3953_v6, 4  ;;  %v3968_v12 = vrot.slane %v3967_v44, 4  ;;  %v4441_v8 = vrot.slane %v8075_v3, 5  ;;  %v3987_v30 = vrot.slane %v3985_v2, 4 }
 0x120   : > { %6072 = vmatmul.mubr.msk.bf16.vlgmr.msra.gmra.mrb[0].mxu1 %vm699_vm3, %v6661_v1  ;;  %6227 = vmatprep.mubr.msk.bf16.mxu0 %vm699_vm3, %v8177_v7  ;;  %v4438_v43 = vrot.slane %v9192_v5, 5  ;;  %v2298_v7 = vsel %vm6987_vm4, %v2293_v18, %v9194_v51  ;;  %v3990_v18 = vrot.slane %v3988_v50, 5  ;;  %v8366_v5 = vrot.slane %v3994_v61, 5  ;;  %v6664_v19 = vld [vmem:[%s6961_s13 + $0x3c] sm:$0xff]  }
 0x121   : > { %6274 = vmatpush3.bf16.msra.mxu1 %v9193_v16  ;;  %6075 = vmatprep.mubr.msk.bf16.mxu1 %vm699_vm3, %v6662_v21  ;;  %v8355_v1 = vcombine.low %v2298_v7, %v2308_v41  ;;  %v8359_v21 = vld [vmem:[%s6961_s13 + $0xd4] sm:$0x1]  ;;  %v4000_v9 = vrot.slane %v3998_v49, 4  ;;  %v3978_v41 = vrot.slane %v3977_v56, 4  ;;  %v3982_v6 = vrot.slane %v3980_v31, 5 }
 0x122   : > { %v8363_v22 = vsel %vm7213_vm7, %v5765_v63, %v4438_v43  ;;  %v4440_v17 = vrot.slane %v4438_v43, 4  ;;  %v3949_v63 = vsel %vm6987_vm4, %v3944_v28, %v8263_v4  ;;  %v3959_v2 = vsel %vm6987_vm4, %v3954_v47, %v3958_v23  ;;  %v6714_v16 = vld [vmem:[%s6961_s13 + $0x1c] sm:$0xf]  ;;  %v5751_v28 = vld [vmem:[%s6961_s13 + $0xa8] sm:$0xe] }
 0x123   : > { %v4004_v50 = vshll.u32 %v8359_v21, 16  ;;  %v5766_v61 = vrot.slane %v5750_v11, 9  ;;  %v4445_v49 = vrot.slane %v8063_v25, 5  ;;  %v3973_v4 = vsel %vm6987_vm4, %v3968_v12, %v8322_v62  ;;  %v5739_v62 = vld [vmem:[%s6961_s13 + $0x18] sm:$0xe]  ;;  %v6665_v47 = vld [vmem:[%s6961_s13 + $0x48] sm:$0xff]  }
 0x124   : > { %v8372_v44 = vsel %vm7213_vm7, %v4440_v17, %v4441_v8  ;;  %v4001_v43 = vor.u32 %v4000_v9, %v8366_v5  ;;  %v4448_v23 = vrot.slane %v8108_v57, 5  ;;  %v3983_v25 = vsel %vm6987_vm4, %v3978_v41, %v3982_v6  ;;  %v6715_v11 = vld [vmem:[%s6961_s13 + $0x20] sm:$0x1] }
 0x125   : > { %v5782_v3 = vcombine.low %v8363_v22, %v8372_v44  ;;  %v4368_v56 = vrot.slane %v6714_v16, 5  ;;  %v8398_v31 = vsel %vm7213_vm7, %v5766_v61, %v4445_v49  ;;  %v4447_v51 = vrot.slane %v4445_v49, 4  ;;  %v5752_v49 = vld [vmem:[%s6961_s13 + $0xb4] sm:$0xe] }
 0x126   : > { %v5720_v7 = vcombine.low %v3949_v63, %v3959_v2  ;;  %v4002_v17 = vrot.slane %v4001_v43, 4  ;;  %v5767_v41 = vrot.slane %v5751_v28, 9  ;;  %v4452_v6 = vrot.slane %v8111_v34, 5  ;;  %v5740_v2 = vld [vmem:[%s6961_s13 + $0x24] sm:$0xe] }
 0x127   : > { %6228 = vmatmul.mubr.msk.bf16.gmra.mrb[20].mxu0 %vm699_vm3, %v8210_v24  ;;  %v3991_v24 = vor.u32 %v3990_v18, %v3987_v30  ;;  %v8403_v57 = vsel %vm7213_vm7, %v4447_v51, %v4448_v23  ;;  %v6666_v30 = vld [vmem:[%s6961_s13 + $0x54] sm:$0xff]   ;;  %v5755_v18 = vrot.slane %v5739_v62, 9  ;;  %v4370_v9 = vrot.slane %v4368_v56, 4  ;;  %v6718_v28 = vld [vmem:[%s6961_s13 + $0x2c] sm:$0x1] }
 0x128   : > { %6076 = vmatmul.mubr.msk.bf16.gmra.mrb[4].mxu1 %vm699_vm3, %v6663_v29  ;;  %6231 = vmatprep.mubr.msk.bf16.mxu0 %vm699_vm3, %v5719_v46  ;;  %v4006_v46 = vrot.slane %v4004_v50, 5  ;;  %v5721_v29 = vcombine.low %v3973_v4, %v3983_v25  ;;  %v5783_v8 = vcombine.low %v8398_v31, %v8403_v57  ;;  %v4455_v63 = vrot.slane %v8121_v48, 5  ;;  %v6716_v50 = vld [vmem:[%s6961_s13 + $0x28] sm:$0xf]  ;;  %v5741_v25 = vld [vmem:[%s6961_s13 + $0x30] sm:$0xe] }
 0x129   : > { %6079 = vmatprep.mubr.msk.bf16.mxu1 %vm699_vm3, %v6664_v19  ;;  %v3992_v12 = vrot.slane %v3991_v24, 4  ;;  %v4371_v19 = vrot.slane %v6715_v11, 5  ;;  %v4375_v61 = vrot.slane %v6716_v50, 5  ;;  %v8426_v48 = vsel %vm7213_vm7, %v5767_v41, %v4452_v6  ;;  %v6668_v11 = vld [vmem:[%s6961_s13 + $0x6c] sm:$0xff]   ;;  %v9195_v41 = vld [vmem:[#allocation13_spill] sm:$0xff] }
 0x12a   : > { %v4007_v34 = vsel %vm6987_vm4, %v4002_v17, %v4006_v46  ;;  %v4454_v24 = vrot.slane %v4452_v6, 4  ;;  %v4369_v43 = vsel %vm7213_vm7, %v5755_v18, %v4368_v56  ;;  %v5756_v51 = vrot.slane %v5740_v2, 9  ;;  %v5753_v50 = vld [vmem:[%s6961_s13 + $0xc0] sm:$0xe]  ;;  %v6732_v31 = vld [vmem:[%s6961_s13 + $0xc8] sm:$0x1] }
 0x12b   : > { %v3997_v4 = vsel %vm6987_vm4, %v3992_v12, %v8366_v5  ;;  %v4372_v23 = vsel %vm7213_vm7, %v4370_v9, %v4371_v19  ;;  %v6717_v5 = vld [vmem:[%s6961_s13 + $0x34] sm:$0xf]  ;;  %v6667_v12 = vld [vmem:[%s6961_s13 + $0x60] sm:$0xff]   ;;  %v5757_v18 = vrot.slane %v5741_v25, 9  ;;  %v4462_v9 = vrot.slane %v8235_v35, 5 }
 0x12c   : > { %v4382_v16 = vrot.slane %v6717_v5, 5  ;;  %v8437_v62 = vsel %vm7213_vm7, %v4454_v24, %v4455_v63  ;;  %v5722_v46 = vcombine.low %v3997_v4, %v4007_v34  ;;  %v5772_v17 = vcombine.low %v4369_v43, %v4372_v23  ;;  %v5742_v24 = vld [vmem:[%s6961_s13 + $0x3c] sm:$0xe] }
 0x12d   : > { %v5784_v56 = vcombine.low %v8426_v48, %v8437_v62  ;;  %v4385_v6 = vrot.slane %v9195_v41, 5  ;;  %v4376_v35 = vsel %vm7213_vm7, %v5756_v51, %v4375_v61  ;;  %v5769_v5 = vrot.slane %v5753_v50, 9 }
 0x12e   : > { %v4384_v19 = vrot.slane %v4382_v16, 4  ;;  %v4383_v23 = vsel %vm7213_vm7, %v5757_v18, %v4382_v16  ;;  %v4469_v51 = vrot.slane %v8328_v52, 5  ;;  %v2449_v57 = vshll.u32 %v6732_v31, 16 }
 0x12f   : > { %6232 = vmatmul.mubr.msk.bf16.gmra.mrb[24].mxu0 %vm699_vm3, %v5720_v7  ;;  %v5768_v7 = vrot.slane %v5752_v49, 9 }
 0x130   : > { %6080 = vmatmul.mubr.msk.bf16.gmra.mrb[8].mxu1 %vm699_vm3, %v6665_v47  ;;  %6235 = vmatprep.mubr.msk.bf16.mxu0 %vm699_vm3, %v5721_v29  ;;  %v4378_v47 = vrot.slane %v6718_v28, 5  ;;  %v4459_v29 = vrot.slane %v8186_v39, 5  ;;  %v9196_v39 = vld [vmem:[#allocation14_spill] sm:$0xff]  ;;  %v4386_v25 = vsel %vm7213_vm7, %v4384_v19, %v4385_v6  ;;  %v5758_v28 = vrot.slane %v5742_v24, 9 }
 0x131   : > { %6083 = vmatprep.mubr.msk.bf16.mxu1 %vm699_vm3, %v6666_v30  ;;  %v4377_v30 = vrot.slane %v4375_v61, 4  ;;  %v4389_v49 = vrot.slane %v9196_v39, 5  ;;  %v4466_v61 = vrot.slane %v8238_v58, 5  ;;  %v6719_v39 = vld [vmem:[%s6961_s13 + $0x70] sm:$0xf]  ;;  %v4473_v24 = vrot.slane %v8314_v55, 5 }
 0x132   : > { %v8449_v63 = vsel %vm7213_vm7, %v5768_v7, %v4459_v29  ;;  %v4461_v2 = vrot.slane %v4459_v29, 4  ;;  %v5471_v7 = vld [vmem:[%s6961_s13 + $0x6c] sm:$0xf]  ;;  %v9197_v29 = vld [vmem:[#allocation15_spill] sm:$0xff] }
 0x133   : > { %v4379_v34 = vsel %vm7213_vm7, %v4377_v30, %v4378_v47  ;;  %v4391_v47 = vrot.slane %v4389_v49, 4  ;;  %v6669_v30 = vld [vmem:[%s6961_s13 + $0x78] sm:$0xff]   ;;  %v8480_v16 = vsel %vm7213_vm7, %v5769_v5, %v4466_v61  ;;  %v4468_v18 = vrot.slane %v4466_v61, 4 }
 0x134   : > { %v8456_v4 = vsel %vm7213_vm7, %v4461_v2, %v4462_v9  ;;  %v5774_v9 = vcombine.low %v4383_v23, %v4386_v25  ;;  %v2262_v19 = vshrl.u32 %v5471_v7, 16  ;;  %v2265_v41 = vshll.u32 %v5471_v7, 16 }
 0x135   : > { %v5785_v43 = vcombine.low %v8449_v63, %v8456_v4  ;;  %v8485_v58 = vsel %vm7213_vm7, %v4468_v18, %v4469_v51  ;;  %v4390_v6 = vsel %vm7213_vm7, %v5758_v28, %v4389_v49  ;;  %v4476_v49 = vrot.slane %v8359_v21, 5  ;;  %v6671_v51 = vld [vmem:[%s6961_s13 + $0x90] sm:$0xff]   ;;  %v6672_v21 = vld [vmem:[%s6961_s13 + $0x9c] sm:$0xff]  }
 0x136   : > { %v5786_v50 = vcombine.low %v8480_v16, %v8485_v58  ;;  %v2264_v23 = vrot.slane %v2262_v19, 4  ;;  %v2267_v25 = vrot.slane %v2265_v41, 5  ;;  %v4475_v7 = vrot.slane %v4473_v24, 4 }
 0x137   : > { %6236 = vmatmul.mubr.msk.bf16.gmra.mrb[28].mxu0 %vm699_vm3, %v5722_v46  ;;  %v5773_v46 = vcombine.low %v4376_v35, %v4379_v34  ;;  %v2271_v35 = vshll.u32 %v6719_v39, 16  ;;  %v2275_v34 = vshrl.u32 %v6719_v39, 16 }
 0x138   : > { %6084 = vmatmul.mubr.msk.bf16.gmra.mrb[12].mxu1 %vm699_vm3, %v6667_v12  ;;  %6241 = vmatprep.mubr.msk.bf16.mxu0 %vm699_vm3, %v5772_v17  ;;  %v4392_v12 = vrot.slane %v9197_v29, 5  ;;  %v5754_v17 = vld [vmem:[%s6961_s13 + $0xcc] sm:$0xe]  ;;  %v8507_v55 = vsel %vm7213_vm7, %v4475_v7, %v4476_v49 }
 0x139   : > { %6087 = vmatprep.mubr.msk.bf16.mxu1 %vm699_vm3, %v6668_v11  ;;  %v6670_v11 = vld [vmem:[%s6961_s13 + $0x84] sm:$0xff]   ;;  %v5770_v52 = vrot.slane %v5754_v17, 9  ;;  %v2277_v28 = vrot.slane %v2275_v34, 4  ;;  %v6720_v17 = vld [vmem:[%s6961_s13 + $0x74] sm:$0x1] }
 0x13a   : > { %v4393_v2 = vsel %vm7213_vm7, %v4391_v47, %v4392_v12  ;;  %v5477_v47 = vld [vmem:[%s6961_s13 + $0x84] sm:$0xf]  ;;  %v2268_v12 = vor.u32 %v2267_v25, %v2264_v23  ;;  %v6674_v34 = vld [vmem:[%s6961_s13 + $0xb4] sm:$0xff]  }
 0x13b   : > { %v8502_v5 = vsel %vm7213_vm7, %v5770_v52, %v4473_v24  ;;  %v5775_v61 = vcombine.low %v4390_v6, %v4393_v2  ;;  %v2313_v18 = vshll.u32 %v5477_v47, 16  ;;  %v5480_v6 = vld [vmem:[%s6961_s13 + $0x90] sm:$0xf]  ;;  %v6673_v2 = vld [vmem:[%s6961_s13 + $0xa8] sm:$0xff]  }
 0x13c   : > { %v5787_v29 = vcombine.low %v8502_v5, %v8507_v55  ;;  %v2269_v52 = vrot.slane %v2268_v12, 4  ;;  %v2334_v23 = vshrl.u32 %v5480_v6, 16  ;;  %v2337_v25 = vshll.u32 %v5480_v6, 16 }
 0x13d   : > { %v2367_v12 = vshll.u32 %v6723_v60, 16 }
 0x13e   : > { %v2339_v14 = vrot.slane %v2337_v25, 5  ;;  %v6726_v25 = vld [vmem:[%s6961_s13 + $0xa4] sm:$0x1] }
 0x13f   : > { %6242 = vmatmul.mubr.msk.bf16.vlgmr.msra.gmra.mrb[0].mxu0 %vm699_vm3, %v5773_v46  ;;  %v2273_v46 = vrot.slane %v2271_v35, 5  ;;  %v5483_v35 = vld [vmem:[%s6961_s13 + $0x9c] sm:$0xf]  ;;  %v8549_v6 = vrot.slane %v2367_v12, 5 }
 0x140   : > { %6088 = vmatmul.mubr.msk.bf16.gmra.mrb[16].mxu1 %vm699_vm3, %v6669_v30  ;;  %6245 = vmatprep.mubr.msk.bf16.mxu0 %vm699_vm3, %v5774_v9  ;;  %v2281_v30 = vshll.u32 %v6720_v17, 16  ;;  %v2310_v9 = vshrl.u32 %v5477_v47, 16  ;;  %v2361_v47 = vshll.u32 %v5483_v35, 16  ;;  %v6724_v17 = vld [vmem:[%s6961_s13 + $0x8c] sm:$0x1] }
 0x141   : > { %6091 = vmatprep.mubr.msk.bf16.mxu1 %vm699_vm3, %v6670_v11  ;;  %v2278_v13 = vor.u32 %v2277_v28, %v2273_v46  ;;  %v6721_v11 = vld [vmem:[%s6961_s13 + $0x88] sm:$0xf]  ;;  %v2274_v7 = vsel %vm6987_vm4, %v2269_v52, %v2273_v46 }
 0x142   : > { %v2319_v19 = vshll.u32 %v6721_v11, 16  ;;  %v2323_v41 = vshrl.u32 %v6721_v11, 16  ;;  %v2283_v0 = vrot.slane %v2281_v30, 5  ;;  %v2312_v36 = vrot.slane %v2310_v9, 4 }
 0x143   : > { %v2279_v39 = vrot.slane %v2278_v13, 4  ;;  %v2329_v30 = vshll.u32 %v6724_v17, 16  ;;  %v2336_v9 = vrot.slane %v2334_v23, 4  ;;  %v2363_v11 = vrot.slane %v2361_v47, 5 }
 0x144   : > { %v8526_v24 = vrot.slane %v2319_v19, 5  ;;  %v2325_v49 = vrot.slane %v2323_v41, 4  ;;  %v6675_v19 = vld [vmem:[%s6961_s13 + $0xc0] sm:$0xff]  }
 0x145   : > { %v2284_v46 = vsel %vm6987_vm4, %v2279_v39, %v2283_v0  ;;  %v5486_v39 = vld [vmem:[%s6961_s13 + $0xa8] sm:$0xf] }
 0x146   : > { %v2326_v13 = vor.u32 %v2325_v49, %v8526_v24  ;;  %v5504_v41 = vcombine.low %v2274_v7, %v2284_v46  ;;  %v2377_v7 = vshll.u32 %v6726_v25, 16  ;;  %v2385_v45 = vshll.u32 %v5486_v39, 16 }
 0x147   : > { %6246 = vmatmul.mubr.msk.bf16.gmra.mrb[4].mxu0 %vm699_vm3, %v5775_v61  ;;  %v6722_v61 = vld [vmem:[%s6961_s13 + $0x94] sm:$0xf] }
 0x148   : > { %6092 = vmatmul.mubr.msk.bf16.gmra.mrb[20].mxu1 %vm699_vm3, %v6671_v51  ;;  %6249 = vmatprep.mubr.msk.bf16.mxu0 %vm699_vm3, %v5776_v10  ;;  %v2315_v10 = vrot.slane %v2313_v18, 5  ;;  %v2343_v51 = vshll.u32 %v6722_v61, 16  ;;  %v2347_v28 = vshrl.u32 %v6722_v61, 16  ;;  %v2327_v0 = vrot.slane %v2326_v13, 4 }
 0x149   : > { %6095 = vmatprep.mubr.msk.bf16.mxu1 %vm699_vm3, %v6672_v21  ;;  %v2358_v21 = vshrl.u32 %v5483_v35, 16  ;;  %v6725_v35 = vld [vmem:[%s6961_s13 + $0x98] sm:$0x1]  ;;  %v2382_v61 = vshrl.u32 %v5486_v39, 16  ;;  %v5492_v39 = vld [vmem:[%s6961_s13 + $0xc0] sm:$0xf] }
 0x14a   : > { %v2316_v15 = vor.u32 %v2315_v10, %v2312_v36  ;;  %v8546_v26 = vrot.slane %v2343_v51, 5  ;;  %v2331_v36 = vrot.slane %v2329_v30, 5  ;;  %v2340_v10 = vor.u32 %v2339_v14, %v2336_v9  ;;  %v5489_v51 = vld [vmem:[%s6961_s13 + $0xb4] sm:$0xf] }
 0x14b   : > { %v2360_v18 = vrot.slane %v2358_v21, 4  ;;  %v2395_v21 = vshrl.u32 %v6727_v27, 16  ;;  %v2406_v20 = vshrl.u32 %v5489_v51, 16  ;;  %v2409_v42 = vshll.u32 %v5489_v51, 16 }
 0x14c   : > { %v2317_v52 = vrot.slane %v2316_v15, 4  ;;  %v2332_v46 = vsel %vm6987_vm4, %v2327_v0, %v2331_v36  ;;  %v2341_v15 = vrot.slane %v2340_v10, 4  ;;  %v2379_v30 = vrot.slane %v2377_v7, 5 }
 0x14d   : > { %v2364_v23 = vor.u32 %v2363_v11, %v2360_v18  ;;  %v2384_v9 = vrot.slane %v2382_v61, 4  ;;  %v2397_v11 = vrot.slane %v2395_v21, 4  ;;  %v6731_v61 = vld [vmem:[%s6961_s13 + $0xbc] sm:$0x1] }
 0x14e   : > { %v2322_v47 = vsel %vm6987_vm4, %v2317_v52, %v8526_v24  ;;  %v2346_v0 = vsel %vm6987_vm4, %v2341_v15, %v8546_v26  ;;  %v2425_v22 = vshll.u32 %v6731_v61, 16 }
 0x14f   : > { %6250 = vmatmul.mubr.msk.bf16.gmra.mrb[8].mxu0 %vm699_vm3, %v5777_v40  ;;  %v2371_v40 = vshrl.u32 %v6723_v60, 16  ;;  %v2365_v17 = vrot.slane %v2364_v23, 4  ;;  %v5506_v24 = vcombine.low %v2322_v47, %v2332_v46 }
 0x150   : > { %6096 = vmatmul.mubr.msk.bf16.gmra.mrb[24].mxu1 %vm699_vm3, %v6673_v2  ;;  %6253 = vmatprep.mubr.msk.bf16.mxu0 %vm699_vm3, %v5778_v54  ;;  %v2349_v54 = vrot.slane %v2347_v28, 4 }
 0x151   : > { %6099 = vmatprep.mubr.msk.bf16.mxu1 %vm699_vm3, %v6674_v34  ;;  %v2373_v2 = vrot.slane %v2371_v40, 4  ;;  %v2353_v34 = vshll.u32 %v6725_v35, 16  ;;  %v2370_v10 = vsel %vm6987_vm4, %v2365_v17, %v8549_v6  ;;  %v2451_v17 = vrot.slane %v2449_v57, 5 }
 0x152   : > { %v2350_v49 = vor.u32 %v2349_v54, %v8546_v26  ;;  %v2387_v54 = vrot.slane %v2385_v45, 5  ;;  %v6729_v26 = vld [vmem:[%s6961_s13 + $0xb0] sm:$0x1] }
 0x153   : > { %v2374_v28 = vor.u32 %v2373_v2, %v8549_v6  ;;  %v2355_v60 = vrot.slane %v2353_v34, 5  ;;  %v2401_v35 = vshll.u32 %v6729_v26, 16  ;;  %v2430_v34 = vshrl.u32 %v5492_v39, 16 }
 0x154   : > { %v2351_v13 = vrot.slane %v2350_v49, 4  ;;  %v2388_v38 = vor.u32 %v2387_v54, %v2384_v9  ;;  %v2433_v6 = vshll.u32 %v5492_v39, 16  ;;  %v6730_v49 = vld [vmem:[%s6961_s13 + $0xc4] sm:$0xf] }
 0x155   : > { %v2375_v14 = vrot.slane %v2374_v28, 4  ;;  %v2439_v23 = vshll.u32 %v6730_v49, 16  ;;  %v2443_v25 = vshrl.u32 %v6730_v49, 16  ;;  %v2403_v45 = vrot.slane %v2401_v35, 5 }
 0x156   : > { %v2356_v36 = vsel %vm6987_vm4, %v2351_v13, %v2355_v60  ;;  %v2389_v51 = vrot.slane %v2388_v38, 4  ;;  %v2427_v60 = vrot.slane %v2425_v22, 5 }
 0x157   : > { %6254 = vmatmul.mubr.msk.bf16.gmra.mrb[12].mxu0 %vm699_vm3, %v5779_v53  ;;  %v2391_v53 = vshll.u32 %v6727_v27, 16  ;;  %v2380_v59 = vsel %vm6987_vm4, %v2375_v14, %v2379_v30  ;;  %v5507_v44 = vcombine.low %v2346_v0, %v2356_v36  ;;  %v2432_v27 = vrot.slane %v2430_v34, 4 }
 0x158   : > { %6100 = vmatmul.mubr.msk.bf16.gmra.mrb[28].mxu1 %vm699_vm3, %v6675_v19  ;;  %6257 = vmatprep.mubr.msk.bf16.mxu0 %vm699_vm3, %v5780_v33  ;;  %v6728_v33 = vld [vmem:[%s6961_s13 + $0xb8] sm:$0xf]  ;;  %v2408_v19 = vrot.slane %v2406_v20, 4  ;;  %v2441_v21 = vrot.slane %v2439_v23, 5  ;;  %v2445_v47 = vrot.slane %v2443_v25, 4  ;;  %s5106_s13 = sand.u32 1, %s6906_s19  }
 0x159   : > { %6121 = vmatprep.mubr.msk.bf16.mxu1 %vm699_vm3, %v5504_v41  ;;  %v2415_v12 = vshll.u32 %v6728_v33, 16  ;;  %v2419_v40 = vshrl.u32 %v6728_v33, 16  ;;  %v2393_v18 = vrot.slane %v2391_v53, 5  ;;  %v2411_v41 = vrot.slane %v2409_v42, 5  ;;  %s8825_s30 = scalar_lea.sflag [#allocation5], %s5106_s13 }
 0x15a   : > { %v2435_v53 = vrot.slane %v2433_v6, 5 }
 0x15b   : > { %v2417_v52 = vrot.slane %v2415_v12, 5  ;;  %v2421_v2 = vrot.slane %v2419_v40, 4  ;;  %v2394_v20 = vsel %vm6987_vm4, %v2389_v51, %v2393_v18  ;;  %v2446_v12 = vor.u32 %v2445_v47, %v2441_v21 }
 0x15c   : > { %v2436_v33 = vor.u32 %v2435_v53, %v2432_v27 }
 0x15d   : > { %v2422_v7 = vor.u32 %v2421_v2, %v2417_v52  ;;  %v2447_v13 = vrot.slane %v2446_v12, 4 }
 0x15e   : > { %v2437_v40 = vrot.slane %v2436_v33, 4 }
 0x15f   : > { %6258 = vmatmul.mubr.msk.bf16.gmra.mrb[16].mxu0 %vm699_vm3, %v5781_v37  ;;  %v2398_v37 = vor.u32 %v2397_v11, %v2393_v18  ;;  %v2423_v15 = vrot.slane %v2422_v7, 4  ;;  %v2452_v9 = vsel %vm6987_vm4, %v2447_v13, %v2451_v17 }
 0x160   : > { %6122 = vmatmul.mubr.msk.bf16.vlgmr.msra.gmra.mrb[16].mxu1 %vm699_vm3, %v8355_v1  ;;  %6261 = vmatprep.mubr.msk.bf16.mxu0 %vm699_vm3, %v5782_v3  ;;  %v2412_v1 = vor.u32 %v2411_v41, %v2408_v19  ;;  %v5508_v3 = vcombine.low %v2370_v10, %v2380_v59  ;;  %v2442_v30 = vsel %vm6987_vm4, %v2437_v40, %v2441_v21 }
 0x161   : > { %6125 = vmatprep.mubr.msk.bf16.mxu1 %vm699_vm3, %v5506_v24  ;;  %v2399_v28 = vrot.slane %v2398_v37, 4  ;;  %v2428_v48 = vsel %vm6987_vm4, %v2423_v15, %v2427_v60  ;;  %v5511_v14 = vcombine.low %v2442_v30, %v2452_v9 }
 0x162   : > { %v2413_v46 = vrot.slane %v2412_v1, 4 }
 0x163   : > { %v2404_v42 = vsel %vm6987_vm4, %v2399_v28, %v2403_v45 }
 0x164   : > { %v5509_v62 = vcombine.low %v2394_v20, %v2404_v42 }
 0x167   : > { %6262 = vmatmul.mubr.msk.bf16.gmra.mrb[20].mxu0 %vm699_vm3, %v5783_v8  ;;  %v2418_v8 = vsel %vm6987_vm4, %v2413_v46, %v2417_v52 }
 0x168   : > { %6126 = vmatmul.mubr.msk.bf16.gmra.mrb[20].mxu1 %vm699_vm3, %v5507_v44  ;;  %6265 = vmatprep.mubr.msk.bf16.mxu0 %vm699_vm3, %v5784_v56  ;;  %v5510_v56 = vcombine.low %v2418_v8, %v2428_v48 }
 0x169   : > { %6129 = vmatprep.mubr.msk.bf16.mxu1 %vm699_vm3, %v5508_v3 }
 0x16f   : > { %6266 = vmatmul.mubr.msk.bf16.gmra.mrb[24].mxu0 %vm699_vm3, %v5785_v43 }
 0x170   : > { %6130 = vmatmul.mubr.msk.bf16.gmra.mrb[24].mxu1 %vm699_vm3, %v5509_v62  ;;  %6269 = vmatprep.mubr.msk.bf16.mxu0 %vm699_vm3, %v5786_v50 }
 0x171   : > { %6133 = vmatprep.mubr.msk.bf16.mxu1 %vm699_vm3, %v5510_v56 }
 0x177   : > { %6270 = vmatmul.mubr.msk.bf16.gmra.mrb[28].mxu0 %vm699_vm3, %v5787_v29 }
 0x178   : > { %6134 = vmatmul.mubr.msk.bf16.gmra.mrb[28].mxu1 %vm699_vm3, %v5511_v14 }
 0x1f3   : > { %v6073_v63 = vpop.f32.mrb[0].mxu1 }
 0x1f4   : > { %v1862_v4 = vpop.f32.mrb[1].mxu1 }
 0x1f5   : > { %v6074_v43 = vpop.f32.mrb[2].mxu1 }
 0x1f6   : > { %v1865_v16 = vpop.f32.mrb[3].mxu1 }
 0x1fb   : > { %v6077_v58 = vpop.f32.mrb[4].mxu1 }
 0x1fc   : > { %v1878_v50 = vpop.f32.mrb[5].mxu1 }
 0x1fd   : > { %v6078_v54 = vpop.f32.mrb[6].mxu1 }
 0x1fe   : > { %v1881_v18 = vpop.f32.mrb[7].mxu1 }
 0x203   : > { %v6081_v11 = vpop.f32.mrb[8].mxu1 }
 0x204   : > { %v1894_v24 = vpop.f32.mrb[9].mxu1 }
 0x205   : > { %v6082_v32 = vpop.f32.mrb[10].mxu1 }
 0x206   : > { %v1897_v19 = vpop.f32.mrb[11].mxu1 }
 0x20b   : > { %v6085_v41 = vpop.f32.mrb[12].mxu1 }
 0x20c   : > { %v8637_v52 = vpop.f32.mrb[13].mxu1 }
 0x20d   : > { %v8639_v5 = vpop.f32.mrb[14].mxu1 }
 0x20e   : > { %v8641_v55 = vpop.f32.mrb[15].mxu1 }
 0x212   : > { %v6243_v29 = vpop.f32.mrb[0].mxu0 }
 0x213   : > { %v6275_v2 = vadd.f32 %v6243_v29, %v6073_v63  ;;  %v4613_v39 = vpop.f32.mrb[1].mxu0 }
 0x214   : > { %v6276_v0 = vadd.f32 %v4613_v39, %v1862_v4  ;;  %v6244_v36 = vpop.f32.mrb[2].mxu0 }
 0x215   : > { %v6277_v10 = vadd.f32 %v6244_v36, %v6074_v43  ;;  %v4616_v59 = vpop.f32.mrb[3].mxu0 }
 0x216   : > { %v6278_v38 = vadd.f32 %v4616_v59, %v1865_v16 }
 0x217   : > { %v4773_v37 = vpack.c.bf16 %v6277_v10, %v6275_v2 }
 0x218   : > { %v4772_v26 = vpack.c.bf16 %v6278_v38, %v6276_v0 }
 0x219   : > { %v8643_v35 = vunpack.c.l.bf16 %v4773_v37  ;;  %v8653_v28 = vunpack.c.h.bf16 %v4773_v37 }
 0x21a   : > { %v8645_v34 = vunpack.c.h.bf16 %v4772_v26  ;;  %v6247_v6 = vpop.f32.mrb[4].mxu0  ;;  %v8647_v49 = vunpack.c.l.bf16 %v4772_v26 }
 0x21b   : > { %v6279_v23 = vadd.f32 %v6247_v6, %v6077_v58  ;;  %v4629_v25 = vpop.f32.mrb[5].mxu0  ;;  %v4824_v45 = vsel %vm4820_vm8, %v8643_v35, 0.0  ;;  %v4826_v46 = vsel %vm4820_vm8, %v8653_v28, 0.0 }
 0x21c   : > { %v4822_v1 = vsel %vm4820_vm8, %v8645_v34, 0.0  ;;  %v6280_v7 = vadd.f32 %v4629_v25, %v1878_v50  ;;  %v6248_v61 = vpop.f32.mrb[6].mxu0  ;;  %v4821_v22 = vsel %vm4820_vm8, %v8647_v49, 0.0 }
 0x21d   : > { %v6281_v44 = vadd.f32 %v6248_v61, %v6078_v54  ;;  %v4632_v3 = vpop.f32.mrb[7].mxu0  ;;  %v4823_v51 = vadd.f32 %v4822_v1, %v4821_v22 }
 0x21e   : > { %v6282_v27 = vadd.f32 %v4632_v3, %v1881_v18 }
 0x21f   : > { %v4775_v53 = vpack.c.bf16 %v6281_v44, %v6279_v23  ;;  %v4825_v21 = vadd.f32 %v4824_v45, %v4823_v51 }
 0x220   : > { %v4774_v47 = vpack.c.bf16 %v6282_v27, %v6280_v7 }
 0x221   : > { %v4827_v12 = vadd.f32 %v4826_v46, %v4825_v21  ;;  %v8663_v31 = vunpack.c.l.bf16 %v4775_v53  ;;  %v8667_v13 = vunpack.c.h.bf16 %v4775_v53 }
 0x222   : > { %v8659_v15 = vunpack.c.l.bf16 %v4774_v47  ;;  %v8661_v60 = vunpack.c.h.bf16 %v4774_v47  ;;  %v6251_v20 = vpop.f32.mrb[8].mxu0 }
 0x223   : > { %v6283_v42 = vadd.f32 %v6251_v20, %v6081_v11  ;;  %v4645_v33 = vpop.f32.mrb[9].mxu0  ;;  %v4832_v63 = vsel %vm4820_vm8, %v8663_v31, 0.0  ;;  %v4834_v16 = vsel %vm4820_vm8, %v8667_v13, 0.0 }
 0x224   : > { %v4828_v57 = vsel %vm4820_vm8, %v8659_v15, 0.0  ;;  %v6284_v8 = vadd.f32 %v4645_v33, %v1894_v24  ;;  %v6252_v48 = vpop.f32.mrb[10].mxu0  ;;  %v4830_v17 = vsel %vm4820_vm8, %v8661_v60, 0.0 }
 0x225   : > { %v6285_v62 = vadd.f32 %v6252_v48, %v6082_v32  ;;  %v4648_v56 = vpop.f32.mrb[11].mxu0  ;;  %v4829_v40 = vadd.f32 %v4828_v57, %v4827_v12 }
 0x226   : > { %v6286_v30 = vadd.f32 %v4648_v56, %v1897_v19 }
 0x227   : > { %v4777_v9 = vpack.c.bf16 %v6285_v62, %v6283_v42  ;;  %v4831_v14 = vadd.f32 %v4830_v17, %v4829_v40 }
 0x228   : > { %v4776_v4 = vpack.c.bf16 %v6286_v30, %v6284_v8 }
 0x229   : > { %v4833_v43 = vadd.f32 %v4832_v63, %v4831_v14  ;;  %v8679_v32 = vunpack.c.l.bf16 %v4777_v9  ;;  %v8685_v10 = vunpack.c.h.bf16 %v4777_v9 }
 0x22a   : > { %v8675_v58 = vunpack.c.l.bf16 %v4776_v4  ;;  %v8677_v50 = vunpack.c.h.bf16 %v4776_v4  ;;  %v6255_v54 = vpop.f32.mrb[12].mxu0 }
 0x22b   : > { %v6287_v18 = vadd.f32 %v6255_v54, %v6085_v41  ;;  %v4661_v11 = vpop.f32.mrb[13].mxu0  ;;  %v4835_v24 = vadd.f32 %v4834_v16, %v4833_v43  ;;  %v4840_v26 = vsel %vm4820_vm8, %v8679_v32, 0.0 }
 0x22c   : > { %v4836_v19 = vsel %vm4820_vm8, %v8675_v58, 0.0  ;;  %v6288_v29 = vadd.f32 %v4661_v11, %v8637_v52  ;;  %v6256_v2 = vpop.f32.mrb[14].mxu0  ;;  %v4838_v59 = vsel %vm4820_vm8, %v8677_v50, 0.0  ;;  %v4842_v52 = vsel %vm4820_vm8, %v8685_v10, 0.0 }
 0x22d   : > { %v6289_v39 = vadd.f32 %v6256_v2, %v8639_v5  ;;  %v4664_v0 = vpop.f32.mrb[15].mxu0  ;;  %v4837_v36 = vadd.f32 %v4836_v19, %v4835_v24 }
 0x22e   : > { %v6290_v41 = vadd.f32 %v4664_v0, %v8641_v55 }
 0x22f   : > { %v4779_v38 = vpack.c.bf16 %v6289_v39, %v6287_v18  ;;  %v4839_v37 = vadd.f32 %v4838_v59, %v4837_v36 }
 0x230   : > { %v4778_v6 = vpack.c.bf16 %v6290_v41, %v6288_v29 }
 0x231   : > { %v4841_v23 = vadd.f32 %v4840_v26, %v4839_v37  ;;  %v8698_v44 = vunpack.c.l.bf16 %v4779_v38  ;;  %v8702_v46 = vunpack.c.h.bf16 %v4779_v38 }
 0x232   : > { %v8694_v5 = vunpack.c.l.bf16 %v4778_v6  ;;  %v8696_v25 = vunpack.c.h.bf16 %v4778_v6  ;;  %v6259_v1 = vpop.f32.mrb[16].mxu0 }
 0x233   : > { %v6123_v7 = vpop.f32.mrb[16].mxu1  ;;  %v4677_v61 = vpop.f32.mrb[17].mxu0  ;;  %v4843_v22 = vadd.f32 %v4842_v52, %v4841_v23  ;;  %v4848_v8 = vsel %vm4820_vm8, %v8698_v44, 0.0  ;;  %v4850_v40 = vsel %vm4820_vm8, %v8702_v46, 0.0 }
 0x234   : > { %v4844_v55 = vsel %vm4820_vm8, %v8694_v5, 0.0  ;;  %v6291_v3 = vadd.f32 %v6259_v1, %v6123_v7  ;;  %v2652_v51 = vpop.f32.mrb[17].mxu1  ;;  %v6260_v45 = vpop.f32.mrb[18].mxu0  ;;  %v4846_v20 = vsel %vm4820_vm8, %v8696_v25, 0.0 }
 0x235   : > { %v6292_v27 = vadd.f32 %v4677_v61, %v2652_v51  ;;  %v6124_v53 = vpop.f32.mrb[18].mxu1  ;;  %v4680_v21 = vpop.f32.mrb[19].mxu0  ;;  %v4845_v47 = vadd.f32 %v4844_v55, %v4843_v22 }
 0x236   : > { %v6293_v42 = vadd.f32 %v6260_v45, %v6124_v53  ;;  %v2655_v33 = vpop.f32.mrb[19].mxu1 }
 0x237   : > { %v6294_v12 = vadd.f32 %v4680_v21, %v2655_v33  ;;  %v4847_v57 = vadd.f32 %v4846_v20, %v4845_v47 }
 0x238   : > { %v4781_v48 = vpack.c.bf16 %v6293_v42, %v6291_v3 }
 0x239   : > { %v4780_v62 = vpack.c.bf16 %v6294_v12, %v6292_v27  ;;  %v4849_v56 = vadd.f32 %v4848_v8, %v4847_v57 }
 0x23a   : > { %v6263_v17 = vpop.f32.mrb[20].mxu0  ;;  %v8714_v18 = vunpack.c.l.bf16 %v4781_v48  ;;  %v8720_v59 = vunpack.c.h.bf16 %v4781_v48 }
 0x23b   : > { %v8710_v30 = vunpack.c.h.bf16 %v4780_v62  ;;  %v6127_v9 = vpop.f32.mrb[20].mxu1  ;;  %v4693_v14 = vpop.f32.mrb[21].mxu0  ;;  %v8712_v63 = vunpack.c.l.bf16 %v4780_v62  ;;  %v4851_v4 = vadd.f32 %v4850_v40, %v4849_v56 }
 0x23c   : > { %v6295_v43 = vadd.f32 %v6263_v17, %v6127_v9  ;;  %v2668_v16 = vpop.f32.mrb[21].mxu1  ;;  %v6264_v54 = vpop.f32.mrb[22].mxu0  ;;  %v4856_v6 = vsel %vm4820_vm8, %v8714_v18, 0.0  ;;  %v4858_v61 = vsel %vm4820_vm8, %v8720_v59, 0.0  ;;  %v6595_v57 = vpack.i.bf16 %v8714_v18, %v8643_v35 }
 0x23d   : > { %v6296_v11 = vadd.f32 %v4693_v14, %v2668_v16  ;;  %v6128_v24 = vpop.f32.mrb[22].mxu1  ;;  %v4696_v19 = vpop.f32.mrb[23].mxu0  ;;  %v6591_v29 = vpack.i.bf16 %v8712_v63, %v8647_v49  ;;  %v4852_v2 = vsel %vm4820_vm8, %v8712_v63, 0.0  ;;  %v4854_v41 = vsel %vm4820_vm8, %v8710_v30, 0.0 }
 0x23e   : > { %v6297_v39 = vadd.f32 %v6264_v54, %v6128_v24  ;;  %v2671_v0 = vpop.f32.mrb[23].mxu1  ;;  %v4853_v36 = vadd.f32 %v4852_v2, %v4851_v4  ;;  %v6593_v52 = vpack.i.bf16 %v8710_v30, %v8645_v34  ;;  %v6597_v16 = vpack.i.bf16 %v8720_v59, %v8653_v28 }
 0x23f   : > { %v6298_v38 = vadd.f32 %v4696_v19, %v2671_v0  ;;  %6592 = vxpose.xlu0.b32.start [1/16] (narrow) %v6591_v29, 8 }
 0x240   : > { %v4783_v37 = vpack.c.bf16 %v6297_v39, %v6295_v43  ;;  %v4855_v26 = vadd.f32 %v4854_v41, %v4853_v36 }
 0x241   : > { %v4782_v23 = vpack.c.bf16 %v6298_v38, %v6296_v11 }
 0x242   : > { %v4857_v1 = vadd.f32 %v4856_v6, %v4855_v26  ;;  %v6267_v7 = vpop.f32.mrb[24].mxu0  ;;  %v8734_v47 = vunpack.c.l.bf16 %v4783_v37  ;;  %v8740_v56 = vunpack.c.h.bf16 %v4783_v37 }
 0x243   : > { %v8730_v22 = vunpack.c.l.bf16 %v4782_v23  ;;  %v8732_v55 = vunpack.c.h.bf16 %v4782_v23  ;;  %6594 = vxpose.xlu0.b32.cont [2/16] (narrow) %v6593_v52, 8  ;;  %v6131_v3 = vpop.f32.mrb[24].mxu1  ;;  %v4709_v51 = vpop.f32.mrb[25].mxu0 }
 0x244   : > { %v4859_v45 = vadd.f32 %v4858_v61, %v4857_v1  ;;  %v6299_v27 = vadd.f32 %v6267_v7, %v6131_v3  ;;  %v2684_v53 = vpop.f32.mrb[25].mxu1  ;;  %v6268_v21 = vpop.f32.mrb[26].mxu0  ;;  %v4864_v4 = vsel %vm4820_vm8, %v8734_v47, 0.0  ;;  %v4866_v24 = vsel %vm4820_vm8, %v8740_v56, 0.0 }
 0x245   : > { %v4860_v20 = vsel %vm4820_vm8, %v8730_v22, 0.0  ;;  %v6300_v42 = vadd.f32 %v4709_v51, %v2684_v53  ;;  %v6132_v33 = vpop.f32.mrb[26].mxu1  ;;  %v4712_v12 = vpop.f32.mrb[27].mxu0  ;;  %v4862_v40 = vsel %vm4820_vm8, %v8732_v55, 0.0  ;;  %v6599_v1 = vpack.i.bf16 %v8730_v22, %v8659_v15 }
 0x246   : > { %v6301_v8 = vadd.f32 %v6268_v21, %v6132_v33  ;;  %v2687_v48 = vpop.f32.mrb[27].mxu1  ;;  %v4861_v62 = vadd.f32 %v4860_v20, %v4859_v45  ;;  %v6601_v33 = vpack.i.bf16 %v8732_v55, %v8661_v60 }
 0x247   : > { %v6302_v17 = vadd.f32 %v4712_v12, %v2687_v48  ;;  %6596 = vxpose.xlu0.b32.cont [3/16] (narrow) %v6595_v57, 8 }
 0x248   : > { %v4785_v9 = vpack.c.bf16 %v6301_v8, %v6299_v27  ;;  %v4863_v14 = vadd.f32 %v4862_v40, %v4861_v62 }
 0x249   : > { %v4784_v43 = vpack.c.bf16 %v6302_v17, %v6300_v42 }
 0x24a   : > { %v4865_v54 = vadd.f32 %v4864_v4, %v4863_v14  ;;  %v6271_v11 = vpop.f32.mrb[28].mxu0  ;;  %v8754_v37 = vunpack.c.l.bf16 %v4785_v9  ;;  %v8760_v51 = vunpack.c.h.bf16 %v4785_v9  ;;  %v6603_v4 = vpack.i.bf16 %v8734_v47, %v8663_v31 }
 0x24b   : > { %v8750_v19 = vunpack.c.l.bf16 %v4784_v43  ;;  %v8752_v29 = vunpack.c.h.bf16 %v4784_v43  ;;  %6598 = vxpose.xlu0.b32.cont [4/16] (narrow) %v6597_v16, 8  ;;  %v6135_v2 = vpop.f32.mrb[28].mxu1  ;;  %v4725_v39 = vpop.f32.mrb[29].mxu0 }
 0x24c   : > { %v4867_v0 = vadd.f32 %v4866_v24, %v4865_v54  ;;  %v6303_v36 = vadd.f32 %v6271_v11, %v6135_v2  ;;  %v2700_v41 = vpop.f32.mrb[29].mxu1  ;;  %v6272_v38 = vpop.f32.mrb[30].mxu0  ;;  %v4872_v20 = vsel %vm4820_vm8, %v8754_v37, 0.0  ;;  %v4874_v48 = vsel %vm4820_vm8, %v8760_v51, 0.0 }
 0x24d   : > { %v4868_v26 = vsel %vm4820_vm8, %v8750_v19, 0.0  ;;  %v6304_v6 = vadd.f32 %v4725_v39, %v2700_v41  ;;  %v6136_v23 = vpop.f32.mrb[30].mxu1  ;;  %v4728_v52 = vpop.f32.mrb[31].mxu0  ;;  %v4870_v45 = vsel %vm4820_vm8, %v8752_v29, 0.0 }
 0x24e   : > { %v4869_v7 = vadd.f32 %v4868_v26, %v4867_v0  ;;  %v6305_v61 = vadd.f32 %v6272_v38, %v6136_v23  ;;  %v2703_v3 = vpop.f32.mrb[31].mxu1  ;;  %v6605_v0 = vpack.i.bf16 %v8740_v56, %v8667_v13  ;;  %v6607_v26 = vpack.i.bf16 %v8750_v19, %v8675_v58 }
 0x24f   : > { %v6306_v27 = vadd.f32 %v4728_v52, %v2703_v3  ;;  %6600 = vxpose.xlu0.b32.cont [5/16] (narrow) %v6599_v1, 8  ;;  %v6609_v52 = vpack.i.bf16 %v8752_v29, %v8677_v50 }
 0x250   : > { %v4871_v53 = vadd.f32 %v4870_v45, %v4869_v7  ;;  %v4787_v21 = vpack.c.bf16 %v6305_v61, %v6303_v36  ;;  %v6611_v61 = vpack.i.bf16 %v8754_v37, %v8679_v32 }
 0x251   : > { %v4786_v42 = vpack.c.bf16 %v6306_v27, %v6304_v6  ;;  %v6613_v27 = vpack.i.bf16 %v8760_v51, %v8685_v10 }
 0x252   : > { %v4873_v12 = vadd.f32 %v4872_v20, %v4871_v53  ;;  %v8768_v57 = vunpack.c.l.bf16 %v4787_v21  ;;  %v8770_v8 = vunpack.c.h.bf16 %v4787_v21 }
 0x253   : > { %v8774_v62 = vunpack.c.l.bf16 %v4786_v42  ;;  %v8776_v40 = vunpack.c.h.bf16 %v4786_v42  ;;  %6602 = vxpose.xlu0.b32.cont [6/16] (narrow) %v6601_v33, 8 }
 0x254   : > { %v4875_v17 = vadd.f32 %v4874_v48, %v4873_v12  ;;  %v6619_v9 = vpack.i.bf16 %v8768_v57, %v8698_v44  ;;  %v6621_v11 = vpack.i.bf16 %v8770_v8, %v8702_v46  ;;  %v4880_v39 = vsel %vm4820_vm8, %v8768_v57, 0.0 }
 0x255   : > { %v4876_v14 = vsel %vm4820_vm8, %v8774_v62, 0.0  ;;  %v6615_v43 = vpack.i.bf16 %v8774_v62, %v8694_v5  ;;  %v6617_v16 = vpack.i.bf16 %v8776_v40, %v8696_v25  ;;  %v4878_v24 = vsel %vm4820_vm8, %v8776_v40, 0.0 }
 0x256   : > { %v4877_v54 = vadd.f32 %v4876_v14, %v4875_v17  ;;  %v4882_v41 = vsel %vm4820_vm8, %v8770_v8, 0.0 }
 0x257   : > { %6604 = vxpose.xlu0.b32.cont [7/16] (narrow) %v6603_v4, 8 }
 0x258   : > { %v4879_v2 = vadd.f32 %v4878_v24, %v4877_v54 }
 0x25a   : > { %v4881_v36 = vadd.f32 %v4880_v39, %v4879_v2 }
 0x25b   : > { %6606 = vxpose.xlu0.b32.cont [8/16] (narrow) %v6605_v0, 8 }
 0x25c   : > { %v4883_v38 = vadd.f32 %v4882_v41, %v4881_v36 }
 0x25e   : > { %v4884_v6 = vrot.slane %v4883_v38, 4 }
 0x25f   : > { %6608 = vxpose.xlu0.b32.cont [9/16] (narrow) %v6607_v26, 8 }
 0x260   : > { %v4885_v23 = vadd.f32 %v4884_v6, %v4883_v38 }
 0x262   : > { %v4886_v1 = vrot.slane %v4885_v23, 2 }
 0x263   : > { %6610 = vxpose.xlu0.b32.cont [10/16] (narrow) %v6609_v52, 8 }
 0x264   : > { %v4887_v7 = vadd.f32 %v4886_v1, %v4885_v23 }
 0x266   : > { %v4888_v3 = vrot.slane %v4887_v7, 1 }
 0x267   : > { %6612 = vxpose.xlu0.b32.cont [11/16] (narrow) %v6611_v61, 8 }
 0x268   : > { %v4889_v45 = vadd.f32 %v4888_v3, %v4887_v7 }
 0x26a   : > { %v8812_v53 = vmul.f32 0.00390625, %v4889_v45 }
 0x26b   : > { %6614 = vxpose.xlu0.b32.cont [12/16] (narrow) %v6613_v27, 8 }
 0x26c   : > { %4893 = vst.msk [vmem:[%s200_s22] sm:$0x1] %vm4892_vm9, %v8812_v53 }
 0x26d   : > { %6746 = shalt.err (!%p6743_p3)
}
 0x26e   : > { %s6747_s9 = scalar_lea.hbm %s8819_s29, 16  ;;  %s6751_s13 = scalar_lea.hbm %s9127_s3, 32 }
 0x26f   : > { %p6748_p4 = scmp.ne.s32.totalorder %s8819_s29, %s6747_s9  ;;  %p6752_p9 = scmp.lt.u32.totalorder %s8819_s29, %s9127_s3 }
 0x270   : > { %p6753_p10 = scmp.lt.u32.totalorder %s6751_s13, %s6747_s9  ;;  %p6755_p12 = scmp.lt.u32.totalorder %s6747_s9, %s8819_s29 }
 0x271   : > { %p6749_p7 = pnand %p6748_p4, %p6925_p5 }
 0x272   : > { %p6754_p11 = por %p6753_p10, %p6752_p9 }
 0x273   : > { %p6750_p8 = pneg %p6749_p7 }
 0x274   : > { %p6756_p13 = por %p6755_p12, %p6754_p11 }
 0x276   : > { %p6757_p0 = pnand %p6756_p13, %p6750_p8 }
 0x278   : > { %6760 = shalt.err (!%p6757_p0)
}
 0x279   : > { %6543 = dma.vmem_to_hbm [thread:$0]  (%p6925_p5), %s8821_s23, 16, %s8819_s29, %s8825_s30   ;;  %v4894_v21 = vsub.f32 %v8647_v49, %v8812_v53  ;;  %v8853_v20 = vsub.f32 %v8694_v5, %v8812_v53  ;;  %v8857_v42 = vsub.f32 %v8696_v25, %v8812_v53  ;;  %v8861_v33 = vsub.f32 %v8698_v44, %v8812_v53  ;;  %6616 = vxpose.xlu0.b32.cont [13/16] (narrow) %v6615_v43, 8 }
 0x27a   : > { %v8865_v12 = vsub.f32 %v8702_v46, %v8812_v53  ;;  %v8872_v49 = vsub.f32 %v8712_v63, %v8812_v53  ;;  %v8876_v48 = vsub.f32 %v8710_v30, %v8812_v53  ;;  %v8880_v17 = vsub.f32 %v8714_v18, %v8812_v53  ;;  %s5266_s23 = sshll.u32 %s8803_s12, 3  ;;  %s5813_s28 = sshll.u32 %s6906_s19, 7 }
 0x27b   : > { %v8884_v14 = vsub.f32 %v8720_v59, %v8812_v53  ;;  %v8888_v5 = vsub.f32 %v8730_v22, %v8812_v53  ;;  %v8892_v63 = vsub.f32 %v8732_v55, %v8812_v53  ;;  %v8896_v30 = vsub.f32 %v8734_v47, %v8812_v53  ;;  %s194_s29 = scalar_lea.vmem [#allocation2], %s5266_s23  ;;  %s206_s6 = scalar_lea.vmem [#allocation6], %s8803_s12 }
 0x27c   : > { %v8900_v18 = vsub.f32 %v8740_v56, %v8812_v53  ;;  %v8904_v59 = vsub.f32 %v8750_v19, %v8812_v53  ;;  %v8908_v22 = vsub.f32 %v8752_v29, %v8812_v53  ;;  %v8912_v55 = vsub.f32 %v8754_v37, %v8812_v53  ;;  %s5124_s5 = sshll.u32 %s194_s29, 4  ;;  %s5150_s7 = sshll.u32 %s206_s6, 4  ;;  %s9047_s5 = int_to_ptr.vmem [resolvable:$true] %s5124_s5  ;;  %s9056_s7 = int_to_ptr.vmem [resolvable:$true] %s5150_s7 }
 0x27d   : > { %v8916_v47 = vsub.f32 %v8760_v51, %v8812_v53  ;;  %v4895_v56 = vsub.f32 %v8645_v34, %v8812_v53  ;;  %v8922_v4 = vsub.f32 %v8774_v62, %v8812_v53  ;;  %v8926_v19 = vsub.f32 %v8776_v40, %v8812_v53  ;;  %6618 = vxpose.xlu0.b32.cont [14/16] (narrow) %v6617_v16, 8  ;;  %s9045_s10 = scalar_lea.hbm %s9126_s2, %s5813_s28  ;;  %s9054_s22 = scalar_lea.hbm %s9128_s4, %s5808_s14 }
 0x27e   : > { %v8930_v29 = vsub.f32 %v8768_v57, %v8812_v53  ;;  %v4896_v37 = vsub.f32 %v8643_v35, %v8812_v53  ;;  %v4897_v34 = vsub.f32 %v8653_v28, %v8812_v53  ;;  %v4926_v51 = vmul.f32 %v4894_v21, %v4894_v21  ;;  %s5102_s27 = scalar_lea.sflag [#allocation3], %s8803_s12  ;;  %s6761_s23 = scalar_lea.vmem %s9047_s5, 128 }
 0x27f   : > { %v4927_v62 = vmul.f32 %v4895_v56, %v4895_v56  ;;  %v4898_v43 = vsub.f32 %v8659_v15, %v8812_v53  ;;  %v4899_v25 = vsub.f32 %v8661_v60, %v8812_v53  ;;  %v4900_v44 = vsub.f32 %v8663_v31, %v8812_v53  ;;  %p6762_p1 = scmp.ne.s32.totalorder %s9047_s5, %s6761_s23  ;;  %s6858_s28 = smov [#allocation2]  }
 0x280   : > { %v4928_v54 = vmul.f32 %v4896_v37, %v4896_v37  ;;  %v4929_v40 = vmul.f32 %v4897_v34, %v4897_v34  ;;  %v4958_v16 = vsel %vm4820_vm8, %v4926_v51, 0.0  ;;  %v4901_v60 = vsub.f32 %v8667_v13, %v8812_v53  ;;  %s6765_s8 = sshll.u32 %s6858_s28, 4  ;;  %s6766_s8 = int_to_ptr.vmem [resolvable:$false] %s6765_s8 }
 0x281   : > { %6620 = vxpose.xlu0.b32.cont [15/16] (narrow) %v6619_v9, 8  ;;  %v4959_v35 = vsel %vm4820_vm8, %v4927_v62, 0.0  ;;  %v4930_v57 = vmul.f32 %v4898_v43, %v4898_v43  ;;  %v4931_v24 = vmul.f32 %v4899_v25, %v4899_v25  ;;  %v4902_v0 = vsub.f32 %v8675_v58, %v8812_v53  ;;  %p6763_p2 = pnand %p6762_p1, %p6925_p5  ;;  %s6767_s9 = scalar_lea.vmem %s6766_s8, 256 }
 0x282   : > { %v4960_v28 = vadd.f32 %v4959_v35, %v4958_v16  ;;  %v4961_v15 = vsel %vm4820_vm8, %v4928_v54, 0.0  ;;  %v4963_v2 = vsel %vm4820_vm8, %v4929_v40, 0.0  ;;  %v4932_v46 = vmul.f32 %v4900_v44, %v4900_v44  ;;  %p6768_p4 = scmp.lt.s32.totalorder %s9047_s5, %s6766_s8  ;;  %p6769_p7 = scmp.lt.s32.totalorder %s6767_s9, %s6761_s23 }
 0x283   : > { %v4903_v31 = vsub.f32 %v8677_v50, %v8812_v53  ;;  %v4933_v41 = vmul.f32 %v4901_v60, %v4901_v60  ;;  %v4967_v38 = vsel %vm4820_vm8, %v4931_v24, 0.0  ;;  %v8965_v13 = vsub.f32 %v8770_v8, %v8812_v53  ;;  %p6764_p3 = pneg %p6763_p2 }
 0x284   : > { %v4962_v9 = vadd.f32 %v4961_v15, %v4960_v28  ;;  %v4904_v6 = vsub.f32 %v8679_v32, %v8812_v53  ;;  %v4934_v23 = vmul.f32 %v4902_v0, %v4902_v0  ;;  %v4969_v58 = vsel %vm4820_vm8, %v4932_v46, 0.0  ;;  %p6770_p8 = por %p6769_p7, %p6768_p4 }
 0x285   : > { %6622 = vxpose.xlu0.b32.end [16/16] (narrow) %v6621_v11, 8  ;;  %v4965_v11 = vsel %vm4820_vm8, %v4930_v57, 0.0  ;;  %v4905_v1 = vsub.f32 %v8685_v10, %v8812_v53  ;;  %v4935_v7 = vmul.f32 %v4903_v31, %v4903_v31  ;;  %v4971_v50 = vsel %vm4820_vm8, %v4933_v41, 0.0 }
 0x286   : > { %v4964_v39 = vadd.f32 %v4963_v2, %v4962_v9  ;;  %v4936_v3 = vmul.f32 %v4904_v6, %v4904_v6  ;;  %v4973_v45 = vsel %vm4820_vm8, %v4934_v23, 0.0  ;;  %v4938_v32 = vmul.f32 %v8853_v20, %v8853_v20  ;;  %p6771_p9 = pnand %p6770_p8, %p6764_p3 }
 0x287   : > { %v4937_v8 = vmul.f32 %v4905_v1, %v4905_v1  ;;  %v4975_v21 = vsel %vm4820_vm8, %v4935_v7, 0.0  ;;  %v4939_v10 = vmul.f32 %v8857_v42, %v8857_v42  ;;  %v4940_v62 = vmul.f32 %v8861_v33, %v8861_v33 }
 0x288   : > { %v4966_v36 = vadd.f32 %v4965_v11, %v4964_v39  ;;  %v4977_v37 = vsel %vm4820_vm8, %v4936_v3, 0.0  ;;  %v4981_v43 = vsel %vm4820_vm8, %v4938_v32, 0.0  ;;  %v4941_v25 = vmul.f32 %v8865_v12, %v8865_v12 }
 0x289   : > { %v4979_v53 = vsel %vm4820_vm8, %v4937_v8, 0.0  ;;  %v4983_v20 = vsel %vm4820_vm8, %v4939_v10, 0.0  ;;  %v4942_v16 = vmul.f32 %v8872_v49, %v8872_v49  ;;  %v4985_v42 = vsel %vm4820_vm8, %v4940_v62, 0.0 }
 0x28a   : > { %v4968_v26 = vadd.f32 %v4967_v38, %v4966_v36  ;;  %v4943_v28 = vmul.f32 %v8876_v48, %v8876_v48  ;;  %v4987_v33 = vsel %vm4820_vm8, %v4941_v25, 0.0  ;;  %v4944_v57 = vmul.f32 %v8880_v17, %v8880_v17 }
 0x28b   : > { %v4989_v12 = vsel %vm4820_vm8, %v4942_v16, 0.0  ;;  %v4945_v9 = vmul.f32 %v8884_v14, %v8884_v14  ;;  %v4946_v24 = vmul.f32 %v8888_v5, %v8888_v5  ;;  %v4947_v39 = vmul.f32 %v8892_v63, %v8892_v63 }
 0x28c   : > { %v4970_v52 = vadd.f32 %v4969_v58, %v4968_v26  ;;  %v4991_v49 = vsel %vm4820_vm8, %v4943_v28, 0.0  ;;  %v4993_v48 = vsel %vm4820_vm8, %v4944_v57, 0.0  ;;  %v4948_v46 = vmul.f32 %v8896_v30, %v8896_v30 }
 0x28d   : > { %v4995_v17 = vsel %vm4820_vm8, %v4945_v9, 0.0  ;;  %v4997_v14 = vsel %vm4820_vm8, %v4946_v24, 0.0  ;;  %v4949_v36 = vmul.f32 %v8900_v18, %v8900_v18  ;;  %v4999_v5 = vsel %vm4820_vm8, %v4947_v39, 0.0 }
 0x28e   : > { %v4972_v61 = vadd.f32 %v4971_v50, %v4970_v52  ;;  %v4950_v41 = vmul.f32 %v8904_v59, %v8904_v59  ;;  %v5001_v63 = vsel %vm4820_vm8, %v4948_v46, 0.0  ;;  %v4951_v26 = vmul.f32 %v8908_v22, %v8908_v22 }
 0x28f   : > { %v5003_v30 = vsel %vm4820_vm8, %v4949_v36, 0.0  ;;  %v4952_v23 = vmul.f32 %v8912_v55, %v8912_v55  ;;  %v4953_v52 = vmul.f32 %v8916_v47, %v8916_v47  ;;  %v4954_v7 = vmul.f32 %v8922_v4, %v8922_v4 }
 0x290   : > { %v4974_v27 = vadd.f32 %v4973_v45, %v4972_v61  ;;  %v5005_v18 = vsel %vm4820_vm8, %v4950_v41, 0.0  ;;  %v5007_v59 = vsel %vm4820_vm8, %v4951_v26, 0.0  ;;  %v4955_v61 = vmul.f32 %v8926_v19, %v8926_v19 }
 0x291   : > { %v5009_v22 = vsel %vm4820_vm8, %v4952_v23, 0.0  ;;  %v5011_v55 = vsel %vm4820_vm8, %v4953_v52, 0.0  ;;  %v4956_v47 = vmul.f32 %v8930_v29, %v8930_v29  ;;  %v5013_v45 = vsel %vm4820_vm8, %v4954_v7, 0.0 }
 0x292   : > { %v4976_v56 = vadd.f32 %v4975_v21, %v4974_v27  ;;  %v5015_v8 = vsel %vm4820_vm8, %v4955_v61, 0.0  ;;  %v4957_v4 = vmul.f32 %v8965_v13, %v8965_v13 }
 0x294   : > { %v4978_v34 = vadd.f32 %v4977_v37, %v4976_v56  ;;  %v5017_v56 = vsel %vm4820_vm8, %v4956_v47, 0.0  ;;  %v5019_v32 = vsel %vm4820_vm8, %v4957_v4, 0.0 }
 0x296   : > { %v4980_v51 = vadd.f32 %v4979_v53, %v4978_v34 }
 0x298   : > { %v4982_v54 = vadd.f32 %v4981_v43, %v4980_v51 }
 0x29a   : > { %v4984_v40 = vadd.f32 %v4983_v20, %v4982_v54 }
 0x29c   : > { %v4986_v35 = vadd.f32 %v4985_v42, %v4984_v40 }
 0x29e   : > { %v4988_v44 = vadd.f32 %v4987_v33, %v4986_v35 }
 0x2a0   : > { %v4990_v15 = vadd.f32 %v4989_v12, %v4988_v44 }
 0x2a2   : > { %v4992_v60 = vadd.f32 %v4991_v49, %v4990_v15 }
 0x2a4   : > { %v4994_v2 = vadd.f32 %v4993_v48, %v4992_v60 }
 0x2a6   : > { %v4996_v0 = vadd.f32 %v4995_v17, %v4994_v2 }
 0x2a8   : > { %v4998_v11 = vadd.f32 %v4997_v14, %v4996_v0 }
 0x2aa   : > { %v5000_v31 = vadd.f32 %v4999_v5, %v4998_v11 }
 0x2ac   : > { %v5002_v38 = vadd.f32 %v5001_v63, %v5000_v31 }
 0x2ae   : > { %v5004_v6 = vadd.f32 %v5003_v30, %v5002_v38 }
 0x2b0   : > { %v5006_v58 = vadd.f32 %v5005_v18, %v5004_v6 }
 0x2b2   : > { %v5008_v1 = vadd.f32 %v5007_v59, %v5006_v58 }
 0x2b4   : > { %v5010_v50 = vadd.f32 %v5009_v22, %v5008_v1 }
 0x2b6   : > { %v5012_v3 = vadd.f32 %v5011_v55, %v5010_v50 }
 0x2b8   : > { %v5014_v27 = vadd.f32 %v5013_v45, %v5012_v3 }
 0x2ba   : > { %v5016_v21 = vadd.f32 %v5015_v8, %v5014_v27 }
 0x2bc   : > { %v5018_v19 = vadd.f32 %v5017_v56, %v5016_v21 }
 0x2be   : > { %v5020_v37 = vadd.f32 %v5019_v32, %v5018_v19 }
 0x2c0   : > { %v5021_v34 = vrot.slane %v5020_v37, 4 }
 0x2c2   : > { %v5022_v29 = vadd.f32 %v5021_v34, %v5020_v37 }
 0x2c4   : > { %v5023_v10 = vrot.slane %v5022_v29, 2 }
 0x2c6   : > { %v5024_v62 = vadd.f32 %v5023_v10, %v5022_v29 }
 0x2c8   : > { %v5025_v54 = vrot.slane %v5024_v62, 1 }
 0x2c9   : > { %v6623_v53 = vpop.trf.xlu0 }
 0x2ca   : > { %v6627_v13 = vunpack.i.h.bf16 %v6623_v53  ;;  %v6624_v51 = vunpack.i.l.bf16 %v6623_v53 }
 0x2cc   : > { %v5812_v43 = vpack.c.bf16 %v6627_v13, %v6624_v51 }
 0x2ce   : > { %5100 = vst [vmem:[%s194_s29] sm:$0xff] %v5812_v43 }
 0x2cf   : > { %6774 = shalt.err (!%p6771_p9)
}
 0x2d0   : > { %s6775_s19 = scalar_lea.hbm %s9045_s10, 128  ;;  %s6779_s11 = scalar_lea.hbm %s9126_s2, 256 }
 0x2d1   : > { %p6776_p10 = scmp.ne.s32.totalorder %s9045_s10, %s6775_s19  ;;  %p6780_p13 = scmp.lt.u32.totalorder %s9045_s10, %s9126_s2 }
 0x2d2   : > { %p6781_p0 = scmp.lt.u32.totalorder %s6779_s11, %s6775_s19  ;;  %p6783_p2 = scmp.lt.u32.totalorder %s6775_s19, %s9045_s10 }
 0x2d3   : > { %p6777_p11 = pnand %p6776_p10, %p6925_p5 }
 0x2d4   : > { %p6782_p1 = por %p6781_p0, %p6780_p13 }
 0x2d5   : > { %p6778_p12 = pneg %p6777_p11 }
 0x2d6   : > { %p6784_p3 = por %p6783_p2, %p6782_p1 }
 0x2d8   : > { %p6785_p4 = pnand %p6784_p3, %p6778_p12 }
 0x2da   : > { %6788 = shalt.err (!%p6785_p4)
}
 0x2db   : > { %6542 = dma.vmem_to_hbm [thread:$0]  (%p6925_p5), %s9047_s5, 128, %s9045_s10, %s5102_s27   ;;  %v5026_v25 = vadd.f32 %v5025_v54, %v5024_v62 }
 0x2dc   : > { %s6789_s23 = scalar_lea.vmem %s9056_s7, 16  ;;  %s6859_s8 = smov [#allocation6]  }
 0x2dd   : > { %5027 = vst.msk [vmem:[%s206_s6] sm:$0x1] %vm4892_vm9, %v5026_v25  ;;  %p6790_p7 = scmp.ne.s32.totalorder %s9056_s7, %s6789_s23  ;;  %s6793_s9 = sshll.u32 %s6859_s8, 4  ;;  %s6794_s9 = int_to_ptr.vmem [resolvable:$false] %s6793_s9 }
 0x2de   : > { %s6795_s19 = scalar_lea.vmem %s6794_s9, 32  ;;  %p6796_p10 = scmp.lt.s32.totalorder %s9056_s7, %s6794_s9 }
 0x2df   : > { %p6791_p8 = pnand %p6790_p7, %p6925_p5  ;;  %p6797_p11 = scmp.lt.s32.totalorder %s6795_s19, %s6789_s23 }
 0x2e1   : > { %p6792_p9 = pneg %p6791_p8  ;;  %p6798_p12 = por %p6797_p11, %p6796_p10 }
 0x2e3   : > { %p6799_p13 = pnand %p6798_p12, %p6792_p9 }
 0x2e5   : > { %6802 = shalt.err (!%p6799_p13)
}
 0x2e6   : > { %s6803_s12 = scalar_lea.hbm %s9054_s22, 16  ;;  %s6807_s10 = scalar_lea.hbm %s9128_s4, 32 }
 0x2e7   : > { %p6804_p0 = scmp.ne.s32.totalorder %s9054_s22, %s6803_s12  ;;  %p6808_p3 = scmp.lt.u32.totalorder %s9054_s22, %s9128_s4 }
 0x2e8   : > { %p6809_p4 = scmp.lt.u32.totalorder %s6807_s10, %s6803_s12  ;;  %p6811_p8 = scmp.lt.u32.totalorder %s6803_s12, %s9054_s22 }
 0x2e9   : > { %p6805_p1 = pnand %p6804_p0, %p6925_p5 }
 0x2ea   : > { %p6810_p7 = por %p6809_p4, %p6808_p3 }
 0x2eb   : > { %p6806_p2 = pneg %p6805_p1 }
 0x2ec   : > { %p6812_p9 = por %p6811_p8, %p6810_p7 }
 0x2ee   : > { %p6813_p10 = pnand %p6812_p9, %p6806_p2 }
 0x2f0   : > { %6816 = shalt.err (!%p6813_p10)
}
 0x2f1   : > { %6544 = dma.vmem_to_hbm [thread:$0]  (%p6925_p5), %s9056_s7, 16, %s9054_s22, %s8825_s30  }
 0x2f2 PF: > { %p6558_p11 = scmp.ge.s32.totalorder %s6855_s18, 2  ;;  %s5162_s29 = sand.u32 1, %s6843_s15  }
 0x2f3   : > { %s5163_s11 = scalar_lea.sflag [#allocation3], %s5162_s29 }
 0x2f4   : > { %p6549_p12 = pnand %p6558_p11, %p6929_p6 }
 0x2f6   : > { %6834 = dma.done.wait (!%p6549_p12), %s5163_s11, 128  }
 0x2f7   : > { %6836 = vsyncadd (!%p6549_p12), %s5163_s11, 4294967168  ;;  %s5171_s13 = sand.u32 1, %s5262_s20  }
 0x2f8   : > { %s5172_s28 = scalar_lea.sflag [#allocation5], %s5171_s13 }
 0x2f9   : > { %6838 = dma.done.wait (!%p6549_p12), %s5172_s28, 32  }
 0x2fa   : > { %6840 = vsyncadd (!%p6549_p12), %s5172_s28, 4294967264  ;;  %p18_p5 = scmp.ge.s32.totalorder %s6910_s21, 4   ;;  %s9198_s15 = smov %s6847_s16 }
 0x2fb   : > { %s9199_s16 = smov %s6851_s17  ;;  %s9200_s17 = smov %s6923_s24 }
 0x2fc   : > { %s9201_s18 = smov %s6910_s21  ;;  %20 = sbr.rel (!%p18_p5) target bundleno = 5 (0x5), region = 105 }
 0x303   :  { %5184 = vsyncpa [#allocation3], 1 }
 0x304   :  { %5186 = vsyncpa [#allocation3 + $0x1], 1 }
 0x305   :  { %5187 = vsyncpa [#allocation5], 1 }
 0x306   :  { %5189 = vsyncpa [#allocation5 + $0x1], 1 }

</bundles_post_ra>
